<compile_context>
chip_gen: v6e
topology: v6e:2x2x1
jax: 0.10.0
libtpu: 0.0.40
codegen_flags: <defaults>
</compile_context>

<pallas_src>
import jax
import jax.numpy as jnp
from jax import lax
from jax.experimental import pallas as pl
from jax.experimental.pallas import tpu as pltpu


def _round_up(x, m):
    return ((x + m - 1) // m) * m


def _conv3x3_taps(xpad, w_ref, H, W, Cp):
    """3x3 'same' conv of a zero-padded NHWC tile via shifted-tap MXU matmuls.

    xpad : (H+2, W+2, Cp) bf16 value; zero spatial halo and zero lane padding.
    w_ref: (9*Cp, CoutP) bf16 ref; row index = (dy*3 + dx)*Cp + cin.
    Returns (H*W, CoutP) f32.

    Consecutive taps are paired so each MXU matmul has K = 2*Cp (>= 256, full
    systolic depth); tap slices feed the MXU directly, no im2col buffer.
    """
    taps = []
    for t in range(9):
        dy, dx = divmod(t, 3)
        taps.append(xpad[dy:dy + H, dx:dx + W, :].reshape(H * W, Cp))

    acc = None
    t = 0
    while t < 9:
        span = 2 if t + 1 < 9 else 1
        if span == 2:
            lhs = jnp.concatenate(taps[t:t + 2], axis=-1)      # lane-axis concat
        else:
            lhs = taps[t]
        rhs = w_ref[t * Cp:(t + span) * Cp, :]                 # 128-aligned row slice
        part = jnp.dot(lhs, rhs, preferred_element_type=jnp.float32)
        acc = part if acc is None else acc + part
        t += span
    return acc


def _double_conv_kernel(x_ref, w1_ref, b1_ref, w2_ref, b2_ref,
                        y_ref, xpad_ref, hpad_ref):
    """One batch element per grid step.

    x_ref   : (1, H, W, Cin)     unpadded input tile (bf16)
    w1_ref  : (9*CinP, CmidP)    conv1 weights * BN1 scale, tap-major layout (bf16)
    b1_ref  : (1, CmidP)         folded BN1 shift (f32)
    w2_ref  : (9*CmidP, CoutP)   conv2 weights * BN2 scale, tap-major layout (bf16)
    b2_ref  : (1, CoutP)         folded BN2 shift (f32)
    y_ref   : (1, H, W, CoutP)   output tile (f32, lane-dense)
    xpad_ref: (H+2, W+2, CinP)   VMEM scratch, zero-padded input (bf16)
    hpad_ref: (H+2, W+2, CmidP)  VMEM scratch, zero-padded intermediate (bf16)
    """
    _, H, W, CoutP = y_ref.shape
    Cin = x_ref.shape[-1]
    CinP = xpad_ref.shape[-1]
    CmidP = hpad_ref.shape[-1]

    # ---- stage the zero-padded input in VMEM (spatial halo + zero lane padding) ----
    xpad_ref[...] = jnp.zeros(xpad_ref.shape, xpad_ref.dtype)
    xpad_ref[1:H + 1, 1:W + 1, :Cin] = x_ref[0]

    # ---- conv1 (BN1 scale already folded into w1) + shift + ReLU in f32 ----
    acc1 = _conv3x3_taps(xpad_ref[...], w1_ref, H, W, CinP)    # (H*W, CmidP) f32
    h = jnp.maximum(acc1 + b1_ref[...], 0.0)

    # ---- stage the padded intermediate: re-zero ONLY the 1-pixel halo ----
    # (interior, incl. padded lanes which are exact zeros, is fully overwritten)
    zrow = jnp.zeros((1, W + 2, CmidP), hpad_ref.dtype)
    zcol = jnp.zeros((H, 1, CmidP), hpad_ref.dtype)
    hpad_ref[0:1, :, :] = zrow
    hpad_ref[H + 1:H + 2, :, :] = zrow
    hpad_ref[1:H + 1, 0:1, :] = zcol
    hpad_ref[1:H + 1, W + 1:W + 2, :] = zcol
    hpad_ref[1:H + 1, 1:W + 1, :] = h.reshape(H, W, CmidP).astype(hpad_ref.dtype)

    # ---- conv2 (BN2 scale folded into w2) + shift + ReLU, lane-dense store ----
    acc2 = _conv3x3_taps(hpad_ref[...], w2_ref, H, W, CmidP)   # (H*W, CoutP) f32
    y = jnp.maximum(acc2 + b2_ref[...], 0.0)
    y_ref[...] = y.reshape(1, H, W, CoutP).astype(y_ref.dtype)


def _fold_bn(gamma, beta, mean, var, eps=1e-5):
    scale = gamma / jnp.sqrt(var + eps)
    shift = beta - mean * scale
    return scale, shift


@jax.jit
def double_conv(x_nchw, params):
    """x_nchw: (B, Cin, H, W) float32. Returns (B, Cout, H, W) float32."""
    w1, g1, be1, m1, v1, w2, g2, be2, m2, v2 = params
    B, Cin, H, W = x_nchw.shape
    Cmid = w1.shape[0]
    Cout = w2.shape[0]
    CinP = _round_up(Cin, 128)
    CmidP = _round_up(Cmid, 128)
    CoutP = _round_up(Cout, 128)

    # NCHW -> NHWC, cast to bf16 (halves input HBM bytes).  No spatial / channel
    # padding in HBM for the input; both happen in VMEM inside the kernel.
    x = jnp.transpose(x_nchw, (0, 2, 3, 1)).astype(jnp.bfloat16)

    s1, sh1 = _fold_bn(g1, be1, m1, v1)
    s2, sh2 = _fold_bn(g2, be2, m2, v2)

    # PyTorch conv weight (CoutC, CinC, 3, 3) -> tap-major layout (9*CinP, CoutP),
    # with the BN scale folded into the output-channel axis and zero-padded
    # channels; row index = (dy*3 + dx)*CinP + cin (matches the kernel).
    def prep_w(w, scale, cin_p, cout_p):
        co, ci, _, _ = w.shape
        wk = jnp.transpose(w, (2, 3, 1, 0)) * scale[None, None, None, :]  # (3,3,ci,co)
        wk = jnp.pad(wk, ((0, 0), (0, 0), (0, cin_p - ci), (0, cout_p - co)))
        return wk.reshape(9 * cin_p, cout_p).astype(jnp.bfloat16)

    def prep_shift(sh, cp):
        return jnp.pad(sh, (0, cp - sh.shape[0])).reshape(1, cp).astype(jnp.float32)

    w1_k = prep_w(w1, s1, CinP, CmidP)
    w2_k = prep_w(w2, s2, CmidP, CoutP)
    b1_k = prep_shift(sh1, CmidP)
    b2_k = prep_shift(sh2, CoutP)

    y_p = pl.pallas_call(
        _double_conv_kernel,
        out_shape=jax.ShapeDtypeStruct((B, H, W, CoutP), jnp.float32),
        grid_spec=pltpu.PrefetchScalarGridSpec(
            num_scalar_prefetch=0,
            grid=(B,),
            in_specs=[
                pl.BlockSpec((1, H, W, Cin), lambda b: (b, 0, 0, 0)),
                pl.BlockSpec((9 * CinP, CmidP), lambda b: (0, 0)),
                pl.BlockSpec((1, CmidP), lambda b: (0, 0)),
                pl.BlockSpec((9 * CmidP, CoutP), lambda b: (0, 0)),
                pl.BlockSpec((1, CoutP), lambda b: (0, 0)),
            ],
            out_specs=pl.BlockSpec((1, H, W, CoutP), lambda b: (b, 0, 0, 0)),
            scratch_shapes=[
                pltpu.VMEM((H + 2, W + 2, CinP), jnp.bfloat16),
                pltpu.VMEM((H + 2, W + 2, CmidP), jnp.bfloat16),
            ]),
        compiler_params=pltpu.CompilerParams(
            dimension_semantics=("parallel",)),
    )(x, w1_k, b1_k, w2_k, b2_k)

    # drop channel padding, NHWC -> NCHW
    return jnp.transpose(y_p[..., :Cout], (0, 3, 1, 2))


def _reference(x_nchw, params):
    """Pure-JAX f32 reference with the same (eval-mode BN) semantics."""
    w1, g1, be1, m1, v1, w2, g2, be2, m2, v2 = params

    def conv_bn_relu(x, w, g, be, m, v):
        y = lax.conv_general_dilated(
            x, w, window_strides=(1, 1), padding=((1, 1), (1, 1)),
            dimension_numbers=("NCHW", "OIHW", "NCHW"))
        s, sh = _fold_bn(g, be, m, v)
        y = y * s[None, :, None, None] + sh[None, :, None, None]
        return jnp.maximum(y, 0.0)

    h = conv_bn_relu(x_nchw, w1, g1, be1, m1, v1)
    return conv_bn_relu(h, w2, g2, be2, m2, v2)


def _init_params(key, in_channels, out_channels, mid_channels=None):
    if not mid_channels:
        mid_channels = out_channels
    ks = jax.random.split(key, 8)
    w1 = jax.random.normal(ks[0], (mid_channels, in_channels, 3, 3),
                           jnp.float32) * 0.2
    g1 = 1.0 + 0.1 * jax.random.normal(ks[1], (mid_channels,), jnp.float32)
    be1 = 0.1 * jax.random.normal(ks[2], (mid_channels,), jnp.float32)
    m1 = 0.05 * jax.random.normal(ks[3], (mid_channels,), jnp.float32)
    v1 = 0.5 + jax.random.uniform(ks[4], (mid_channels,), jnp.float32)
    w2 = jax.random.normal(ks[5], (out_channels, mid_channels, 3, 3),
                           jnp.float32) * 0.2
    g2 = 1.0 + 0.1 * jax.random.normal(ks[6], (out_channels,), jnp.float32)
    be2 = 0.1 * jax.random.normal(ks[7], (out_channels,), jnp.float32)
    m2 = jnp.zeros((out_channels,), jnp.float32)
    v2 = jnp.ones((out_channels,), jnp.float32)
    return (w1, g1, be1, m1, v1, w2, g2, be2, m2, v2)


if __name__ == "__main__":
    key = jax.random.PRNGKey(0)
    k_x, k_p = jax.random.split(key)

    B, Cin, H, W = 2, 4, 16, 16
    Cout = 8
    x = jax.random.normal(k_x, (B, Cin, H, W), jnp.float32)
    params = _init_params(k_p, Cin, Cout)

    y = double_conv(x, params)
    y = jax.block_until_ready(y)

    y_ref = _reference(x, params)
    assert y.shape == (B, Cout, H, W)
    # Tolerance relaxed because matmul inputs (x, folded weights, intermediate) are bf16.
    max_err = float(jnp.max(jnp.abs(y - y_ref)))
    assert jnp.allclose(y, y_ref, atol=1e-1, rtol=1e-1), max_err

    print("KERNEL_OK")
</pallas_src>

<mosaic_0001>
module attributes {stable_mosaic.version = 11 : i64} {
  func.func @_double_conv_kernel(%arg0: i32, %arg1: memref<1x16x16x4xbf16, #tpu.memory_space<vmem>>, %arg2: memref<1152x128xbf16, #tpu.memory_space<vmem>>, %arg3: memref<1x128xf32, #tpu.memory_space<vmem>>, %arg4: memref<1152x128xbf16, #tpu.memory_space<vmem>>, %arg5: memref<1x128xf32, #tpu.memory_space<vmem>>, %arg6: memref<1x16x16x128xf32, #tpu.memory_space<vmem>>, %arg7: memref<18x18x128xbf16, #tpu.memory_space<vmem>>, %arg8: memref<18x18x128xbf16, #tpu.memory_space<vmem>>) attributes {dimension_semantics = [#tpu.dimension_semantics<parallel>], iteration_bounds = array<i64: 2>, scalar_prefetch = 0 : i64, scratch_operands = 2 : i64, tpu.core_type = #tpu.core_type<tc>, window_params = [{transform_indices = @transform_0, window_bounds = array<i64: 1, 16, 16, 4>}, {pipeline_mode = #tpu.pipeline_mode<synchronous>, transform_indices = @transform_1, window_bounds = array<i64: 1152, 128>}, {pipeline_mode = #tpu.pipeline_mode<synchronous>, transform_indices = @transform_2, window_bounds = array<i64: 1, 128>}, {pipeline_mode = #tpu.pipeline_mode<synchronous>, transform_indices = @transform_3, window_bounds = array<i64: 1152, 128>}, {pipeline_mode = #tpu.pipeline_mode<synchronous>, transform_indices = @transform_4, window_bounds = array<i64: 1, 128>}, {transform_indices = @transform_5, window_bounds = array<i64: 1, 16, 16, 128>}]} {
    %cst = arith.constant 0.000000e+00 : bf16
    %0 = vector.broadcast %cst : bf16 to vector<18x18x128xbf16>
    %c0 = arith.constant 0 : index
    %c0_0 = arith.constant 0 : index
    %c0_1 = arith.constant 0 : index
    %1 = vector.load %arg7[%c0, %c0_0, %c0_1] : memref<18x18x128xbf16, #tpu.memory_space<vmem>>, vector<18x18x128xbf16>
    tpu.vector_store %arg7[%c0, %c0_0, %c0_1], %0 {strides = array<i32>} : memref<18x18x128xbf16, #tpu.memory_space<vmem>>, vector<18x18x128xbf16>,
    %c0_2 = arith.constant 0 : index
    %c0_3 = arith.constant 0 : index
    %c0_4 = arith.constant 0 : index
    %c0_5 = arith.constant 0 : index
    %2 = vector.load %arg1[%c0_2, %c0_3, %c0_4, %c0_5] : memref<1x16x16x4xbf16, #tpu.memory_space<vmem>>, vector<1x16x16x4xbf16>
    %3 = vector.shape_cast %2 : vector<1x16x16x4xbf16> to vector<16x16x4xbf16>
    %c1 = arith.constant 1 : index
    %c1_6 = arith.constant 1 : index
    %c0_7 = arith.constant 0 : index
    %4 = vector.load %arg7[%c1, %c1_6, %c0_7] : memref<18x18x128xbf16, #tpu.memory_space<vmem>>, vector<16x16x4xbf16>
    tpu.vector_store %arg7[%c1, %c1_6, %c0_7], %3 {strides = array<i32>} : memref<18x18x128xbf16, #tpu.memory_space<vmem>>, vector<16x16x4xbf16>,
    %c0_8 = arith.constant 0 : index
    %c0_9 = arith.constant 0 : index
    %c0_10 = arith.constant 0 : index
    %5 = vector.load %arg7[%c0_8, %c0_9, %c0_10] : memref<18x18x128xbf16, #tpu.memory_space<vmem>>, vector<18x18x128xbf16>
    %6 = vector.extract_strided_slice %5 {offsets = [0, 0, 0], sizes = [16, 16, 128], strides = [1, 1, 1]} : vector<18x18x128xbf16> to vector<16x16x128xbf16>
    %7 = vector.shape_cast %6 : vector<16x16x128xbf16> to vector<256x128xbf16>
    %8 = vector.extract_strided_slice %5 {offsets = [0, 1, 0], sizes = [16, 16, 128], strides = [1, 1, 1]} : vector<18x18x128xbf16> to vector<16x16x128xbf16>
    %9 = vector.shape_cast %8 : vector<16x16x128xbf16> to vector<256x128xbf16>
    %10 = vector.extract_strided_slice %5 {offsets = [0, 2, 0], sizes = [16, 16, 128], strides = [1, 1, 1]} : vector<18x18x128xbf16> to vector<16x16x128xbf16>
    %11 = vector.shape_cast %10 : vector<16x16x128xbf16> to vector<256x128xbf16>
    %12 = vector.extract_strided_slice %5 {offsets = [1, 0, 0], sizes = [16, 16, 128], strides = [1, 1, 1]} : vector<18x18x128xbf16> to vector<16x16x128xbf16>
    %13 = vector.shape_cast %12 : vector<16x16x128xbf16> to vector<256x128xbf16>
    %14 = vector.extract_strided_slice %5 {offsets = [1, 1, 0], sizes = [16, 16, 128], strides = [1, 1, 1]} : vector<18x18x128xbf16> to vector<16x16x128xbf16>
    %15 = vector.shape_cast %14 : vector<16x16x128xbf16> to vector<256x128xbf16>
    %16 = vector.extract_strided_slice %5 {offsets = [1, 2, 0], sizes = [16, 16, 128], strides = [1, 1, 1]} : vector<18x18x128xbf16> to vector<16x16x128xbf16>
    %17 = vector.shape_cast %16 : vector<16x16x128xbf16> to vector<256x128xbf16>
    %18 = vector.extract_strided_slice %5 {offsets = [2, 0, 0], sizes = [16, 16, 128], strides = [1, 1, 1]} : vector<18x18x128xbf16> to vector<16x16x128xbf16>
    %19 = vector.shape_cast %18 : vector<16x16x128xbf16> to vector<256x128xbf16>
    %20 = vector.extract_strided_slice %5 {offsets = [2, 1, 0], sizes = [16, 16, 128], strides = [1, 1, 1]} : vector<18x18x128xbf16> to vector<16x16x128xbf16>
    %21 = vector.shape_cast %20 : vector<16x16x128xbf16> to vector<256x128xbf16>
    %22 = vector.extract_strided_slice %5 {offsets = [2, 2, 0], sizes = [16, 16, 128], strides = [1, 1, 1]} : vector<18x18x128xbf16> to vector<16x16x128xbf16>
    %23 = vector.shape_cast %22 : vector<16x16x128xbf16> to vector<256x128xbf16>
    %24 = tpu.concatenate %7, %9 in 1 : vector<256x128xbf16>, vector<256x128xbf16> -> vector<256x256xbf16>
    %c0_11 = arith.constant 0 : index
    %c0_12 = arith.constant 0 : index
    %25 = vector.load %arg2[%c0_11, %c0_12] : memref<1152x128xbf16, #tpu.memory_space<vmem>>, vector<256x128xbf16>
    %cst_13 = arith.constant dense<0.000000e+00> : vector<256x128xf32>
    %26 = tpu.matmul %24, %25, %cst_13 {dimension_numbers = #tpu.dot_dimension_numbers<[1], [0], [0], [1], [0, 0, 1, 1], [], []>} : vector<256x256xbf16>, vector<256x128xbf16>, vector<256x128xf32> -> vector<256x128xf32>
    %27 = tpu.concatenate %11, %13 in 1 : vector<256x128xbf16>, vector<256x128xbf16> -> vector<256x256xbf16>
    %c256 = arith.constant 256 : index
    %c0_14 = arith.constant 0 : index
    %28 = vector.load %arg2[%c256, %c0_14] : memref<1152x128xbf16, #tpu.memory_space<vmem>>, vector<256x128xbf16>
    %cst_15 = arith.constant dense<0.000000e+00> : vector<256x128xf32>
    %29 = tpu.matmul %27, %28, %cst_15 {dimension_numbers = #tpu.dot_dimension_numbers<[1], [0], [0], [1], [0, 0, 1, 1], [], []>} : vector<256x256xbf16>, vector<256x128xbf16>, vector<256x128xf32> -> vector<256x128xf32>
    %30 = arith.addf %26, %29 : vector<256x128xf32>
    %31 = tpu.concatenate %15, %17 in 1 : vector<256x128xbf16>, vector<256x128xbf16> -> vector<256x256xbf16>
    %c512 = arith.constant 512 : index
    %c0_16 = arith.constant 0 : index
    %32 = vector.load %arg2[%c512, %c0_16] : memref<1152x128xbf16, #tpu.memory_space<vmem>>, vector<256x128xbf16>
    %cst_17 = arith.constant dense<0.000000e+00> : vector<256x128xf32>
    %33 = tpu.matmul %31, %32, %cst_17 {dimension_numbers = #tpu.dot_dimension_numbers<[1], [0], [0], [1], [0, 0, 1, 1], [], []>} : vector<256x256xbf16>, vector<256x128xbf16>, vector<256x128xf32> -> vector<256x128xf32>
    %34 = arith.addf %30, %33 : vector<256x128xf32>
    %35 = tpu.concatenate %19, %21 in 1 : vector<256x128xbf16>, vector<256x128xbf16> -> vector<256x256xbf16>
    %c768 = arith.constant 768 : index
    %c0_18 = arith.constant 0 : index
    %36 = vector.load %arg2[%c768, %c0_18] : memref<1152x128xbf16, #tpu.memory_space<vmem>>, vector<256x128xbf16>
    %cst_19 = arith.constant dense<0.000000e+00> : vector<256x128xf32>
    %37 = tpu.matmul %35, %36, %cst_19 {dimension_numbers = #tpu.dot_dimension_numbers<[1], [0], [0], [1], [0, 0, 1, 1], [], []>} : vector<256x256xbf16>, vector<256x128xbf16>, vector<256x128xf32> -> vector<256x128xf32>
    %38 = arith.addf %34, %37 : vector<256x128xf32>
    %c1024 = arith.constant 1024 : index
    %c0_20 = arith.constant 0 : index
    %39 = vector.load %arg2[%c1024, %c0_20] : memref<1152x128xbf16, #tpu.memory_space<vmem>>, vector<128x128xbf16>
    %cst_21 = arith.constant dense<0.000000e+00> : vector<256x128xf32>
    %40 = tpu.matmul %23, %39, %cst_21 {dimension_numbers = #tpu.dot_dimension_numbers<[1], [0], [0], [1], [0, 0, 1, 1], [], []>} : vector<256x128xbf16>, vector<128x128xbf16>, vector<256x128xf32> -> vector<256x128xf32>
    %41 = arith.addf %38, %40 : vector<256x128xf32>
    %c0_22 = arith.constant 0 : index
    %c0_23 = arith.constant 0 : index
    %42 = vector.load %arg3[%c0_22, %c0_23] : memref<1x128xf32, #tpu.memory_space<vmem>>, vector<1x128xf32>
    %43 = vector.broadcast %42 : vector<1x128xf32> to vector<256x128xf32>
    %44 = arith.addf %41, %43 : vector<256x128xf32>
    %cst_24 = arith.constant 0.000000e+00 : f32
    %45 = vector.broadcast %cst_24 : f32 to vector<256x128xf32>
    %46 = arith.maximumf %44, %45 : vector<256x128xf32>
    %cst_25 = arith.constant 0.000000e+00 : bf16
    %47 = vector.broadcast %cst_25 : bf16 to vector<1x18x128xbf16>
    %cst_26 = arith.constant 0.000000e+00 : bf16
    %48 = vector.broadcast %cst_26 : bf16 to vector<16x1x128xbf16>
    %c0_27 = arith.constant 0 : index
    %c0_28 = arith.constant 0 : index
    %c0_29 = arith.constant 0 : index
    %49 = vector.load %arg8[%c0_27, %c0_28, %c0_29] : memref<18x18x128xbf16, #tpu.memory_space<vmem>>, vector<1x18x128xbf16>
    tpu.vector_store %arg8[%c0_27, %c0_28, %c0_29], %47 {strides = array<i32>} : memref<18x18x128xbf16, #tpu.memory_space<vmem>>, vector<1x18x128xbf16>,
    %c17 = arith.constant 17 : index
    %c0_30 = arith.constant 0 : index
    %c0_31 = arith.constant 0 : index
    %50 = vector.load %arg8[%c17, %c0_30, %c0_31] : memref<18x18x128xbf16, #tpu.memory_space<vmem>>, vector<1x18x128xbf16>
    tpu.vector_store %arg8[%c17, %c0_30, %c0_31], %47 {strides = array<i32>} : memref<18x18x128xbf16, #tpu.memory_space<vmem>>, vector<1x18x128xbf16>,
    %c1_32 = arith.constant 1 : index
    %c0_33 = arith.constant 0 : index
    %c0_34 = arith.constant 0 : index
    %51 = vector.load %arg8[%c1_32, %c0_33, %c0_34] : memref<18x18x128xbf16, #tpu.memory_space<vmem>>, vector<16x1x128xbf16>
    tpu.vector_store %arg8[%c1_32, %c0_33, %c0_34], %48 {strides = array<i32>} : memref<18x18x128xbf16, #tpu.memory_space<vmem>>, vector<16x1x128xbf16>,
    %c1_35 = arith.constant 1 : index
    %c17_36 = arith.constant 17 : index
    %c0_37 = arith.constant 0 : index
    %52 = vector.load %arg8[%c1_35, %c17_36, %c0_37] : memref<18x18x128xbf16, #tpu.memory_space<vmem>>, vector<16x1x128xbf16>
    tpu.vector_store %arg8[%c1_35, %c17_36, %c0_37], %48 {strides = array<i32>} : memref<18x18x128xbf16, #tpu.memory_space<vmem>>, vector<16x1x128xbf16>,
    %53 = vector.shape_cast %46 : vector<256x128xf32> to vector<16x16x128xf32>
    %54 = arith.truncf %53 : vector<16x16x128xf32> to vector<16x16x128xbf16>
    %c1_38 = arith.constant 1 : index
    %c1_39 = arith.constant 1 : index
    %c0_40 = arith.constant 0 : index
    %55 = vector.load %arg8[%c1_38, %c1_39, %c0_40] : memref<18x18x128xbf16, #tpu.memory_space<vmem>>, vector<16x16x128xbf16>
    tpu.vector_store %arg8[%c1_38, %c1_39, %c0_40], %54 {strides = array<i32>} : memref<18x18x128xbf16, #tpu.memory_space<vmem>>, vector<16x16x128xbf16>,
    %c0_41 = arith.constant 0 : index
    %c0_42 = arith.constant 0 : index
    %c0_43 = arith.constant 0 : index
    %56 = vector.load %arg8[%c0_41, %c0_42, %c0_43] : memref<18x18x128xbf16, #tpu.memory_space<vmem>>, vector<18x18x128xbf16>
    %57 = vector.extract_strided_slice %56 {offsets = [0, 0, 0], sizes = [16, 16, 128], strides = [1, 1, 1]} : vector<18x18x128xbf16> to vector<16x16x128xbf16>
    %58 = vector.shape_cast %57 : vector<16x16x128xbf16> to vector<256x128xbf16>
    %59 = vector.extract_strided_slice %56 {offsets = [0, 1, 0], sizes = [16, 16, 128], strides = [1, 1, 1]} : vector<18x18x128xbf16> to vector<16x16x128xbf16>
    %60 = vector.shape_cast %59 : vector<16x16x128xbf16> to vector<256x128xbf16>
    %61 = vector.extract_strided_slice %56 {offsets = [0, 2, 0], sizes = [16, 16, 128], strides = [1, 1, 1]} : vector<18x18x128xbf16> to vector<16x16x128xbf16>
    %62 = vector.shape_cast %61 : vector<16x16x128xbf16> to vector<256x128xbf16>
    %63 = vector.extract_strided_slice %56 {offsets = [1, 0, 0], sizes = [16, 16, 128], strides = [1, 1, 1]} : vector<18x18x128xbf16> to vector<16x16x128xbf16>
    %64 = vector.shape_cast %63 : vector<16x16x128xbf16> to vector<256x128xbf16>
    %65 = vector.extract_strided_slice %56 {offsets = [1, 1, 0], sizes = [16, 16, 128], strides = [1, 1, 1]} : vector<18x18x128xbf16> to vector<16x16x128xbf16>
    %66 = vector.shape_cast %65 : vector<16x16x128xbf16> to vector<256x128xbf16>
    %67 = vector.extract_strided_slice %56 {offsets = [1, 2, 0], sizes = [16, 16, 128], strides = [1, 1, 1]} : vector<18x18x128xbf16> to vector<16x16x128xbf16>
    %68 = vector.shape_cast %67 : vector<16x16x128xbf16> to vector<256x128xbf16>
    %69 = vector.extract_strided_slice %56 {offsets = [2, 0, 0], sizes = [16, 16, 128], strides = [1, 1, 1]} : vector<18x18x128xbf16> to vector<16x16x128xbf16>
    %70 = vector.shape_cast %69 : vector<16x16x128xbf16> to vector<256x128xbf16>
    %71 = vector.extract_strided_slice %56 {offsets = [2, 1, 0], sizes = [16, 16, 128], strides = [1, 1, 1]} : vector<18x18x128xbf16> to vector<16x16x128xbf16>
    %72 = vector.shape_cast %71 : vector<16x16x128xbf16> to vector<256x128xbf16>
    %73 = vector.extract_strided_slice %56 {offsets = [2, 2, 0], sizes = [16, 16, 128], strides = [1, 1, 1]} : vector<18x18x128xbf16> to vector<16x16x128xbf16>
    %74 = vector.shape_cast %73 : vector<16x16x128xbf16> to vector<256x128xbf16>
    %75 = tpu.concatenate %58, %60 in 1 : vector<256x128xbf16>, vector<256x128xbf16> -> vector<256x256xbf16>
    %c0_44 = arith.constant 0 : index
    %c0_45 = arith.constant 0 : index
    %76 = vector.load %arg4[%c0_44, %c0_45] : memref<1152x128xbf16, #tpu.memory_space<vmem>>, vector<256x128xbf16>
    %cst_46 = arith.constant dense<0.000000e+00> : vector<256x128xf32>
    %77 = tpu.matmul %75, %76, %cst_46 {dimension_numbers = #tpu.dot_dimension_numbers<[1], [0], [0], [1], [0, 0, 1, 1], [], []>} : vector<256x256xbf16>, vector<256x128xbf16>, vector<256x128xf32> -> vector<256x128xf32>
    %78 = tpu.concatenate %62, %64 in 1 : vector<256x128xbf16>, vector<256x128xbf16> -> vector<256x256xbf16>
    %c256_47 = arith.constant 256 : index
    %c0_48 = arith.constant 0 : index
    %79 = vector.load %arg4[%c256_47, %c0_48] : memref<1152x128xbf16, #tpu.memory_space<vmem>>, vector<256x128xbf16>
    %cst_49 = arith.constant dense<0.000000e+00> : vector<256x128xf32>
    %80 = tpu.matmul %78, %79, %cst_49 {dimension_numbers = #tpu.dot_dimension_numbers<[1], [0], [0], [1], [0, 0, 1, 1], [], []>} : vector<256x256xbf16>, vector<256x128xbf16>, vector<256x128xf32> -> vector<256x128xf32>
    %81 = arith.addf %77, %80 : vector<256x128xf32>
    %82 = tpu.concatenate %66, %68 in 1 : vector<256x128xbf16>, vector<256x128xbf16> -> vector<256x256xbf16>
    %c512_50 = arith.constant 512 : index
    %c0_51 = arith.constant 0 : index
    %83 = vector.load %arg4[%c512_50, %c0_51] : memref<1152x128xbf16, #tpu.memory_space<vmem>>, vector<256x128xbf16>
    %cst_52 = arith.constant dense<0.000000e+00> : vector<256x128xf32>
    %84 = tpu.matmul %82, %83, %cst_52 {dimension_numbers = #tpu.dot_dimension_numbers<[1], [0], [0], [1], [0, 0, 1, 1], [], []>} : vector<256x256xbf16>, vector<256x128xbf16>, vector<256x128xf32> -> vector<256x128xf32>
    %85 = arith.addf %81, %84 : vector<256x128xf32>
    %86 = tpu.concatenate %70, %72 in 1 : vector<256x128xbf16>, vector<256x128xbf16> -> vector<256x256xbf16>
    %c768_53 = arith.constant 768 : index
    %c0_54 = arith.constant 0 : index
    %87 = vector.load %arg4[%c768_53, %c0_54] : memref<1152x128xbf16, #tpu.memory_space<vmem>>, vector<256x128xbf16>
    %cst_55 = arith.constant dense<0.000000e+00> : vector<256x128xf32>
    %88 = tpu.matmul %86, %87, %cst_55 {dimension_numbers = #tpu.dot_dimension_numbers<[1], [0], [0], [1], [0, 0, 1, 1], [], []>} : vector<256x256xbf16>, vector<256x128xbf16>, vector<256x128xf32> -> vector<256x128xf32>
    %89 = arith.addf %85, %88 : vector<256x128xf32>
    %c1024_56 = arith.constant 1024 : index
    %c0_57 = arith.constant 0 : index
    %90 = vector.load %arg4[%c1024_56, %c0_57] : memref<1152x128xbf16, #tpu.memory_space<vmem>>, vector<128x128xbf16>
    %cst_58 = arith.constant dense<0.000000e+00> : vector<256x128xf32>
    %91 = tpu.matmul %74, %90, %cst_58 {dimension_numbers = #tpu.dot_dimension_numbers<[1], [0], [0], [1], [0, 0, 1, 1], [], []>} : vector<256x128xbf16>, vector<128x128xbf16>, vector<256x128xf32> -> vector<256x128xf32>
    %92 = arith.addf %89, %91 : vector<256x128xf32>
    %c0_59 = arith.constant 0 : index
    %c0_60 = arith.constant 0 : index
    %93 = vector.load %arg5[%c0_59, %c0_60] : memref<1x128xf32, #tpu.memory_space<vmem>>, vector<1x128xf32>
    %94 = vector.broadcast %93 : vector<1x128xf32> to vector<256x128xf32>
    %95 = arith.addf %92, %94 : vector<256x128xf32>
    %cst_61 = arith.constant 0.000000e+00 : f32
    %96 = vector.broadcast %cst_61 : f32 to vector<256x128xf32>
    %97 = arith.maximumf %95, %96 : vector<256x128xf32>
    %98 = vector.shape_cast %97 : vector<256x128xf32> to vector<1x16x16x128xf32>
    %c0_62 = arith.constant 0 : index
    %c0_63 = arith.constant 0 : index
    %c0_64 = arith.constant 0 : index
    %c0_65 = arith.constant 0 : index
    %99 = vector.load %arg6[%c0_62, %c0_63, %c0_64, %c0_65] : memref<1x16x16x128xf32, #tpu.memory_space<vmem>>, vector<1x16x16x128xf32>
    tpu.vector_store %arg6[%c0_62, %c0_63, %c0_64, %c0_65], %98 {strides = array<i32>} : memref<1x16x16x128xf32, #tpu.memory_space<vmem>>, vector<1x16x16x128xf32>,
    return
  }
  func.func @transform_0(%arg0: i32) -> (i32, i32, i32, i32) {
    %c0_i32 = arith.constant 0 : i32
    %c0_i32_0 = arith.constant 0 : i32
    %c0_i32_1 = arith.constant 0 : i32
    %c0_i32_2 = arith.constant 0 : i32
    return %arg0, %c0_i32, %c0_i32_0, %c0_i32_1 : i32, i32, i32, i32
  }
  func.func @transform_1(%arg0: i32) -> (i32, i32) {
    %c0_i32 = arith.constant 0 : i32
    %c0_i32_0 = arith.constant 0 : i32
    %c0_i32_1 = arith.constant 0 : i32
    return %c0_i32, %c0_i32_0 : i32, i32
  }
  func.func @transform_2(%arg0: i32) -> (i32, i32) {
    %c0_i32 = arith.constant 0 : i32
    %c0_i32_0 = arith.constant 0 : i32
    %c0_i32_1 = arith.constant 0 : i32
    return %c0_i32, %c0_i32_0 : i32, i32
  }
  func.func @transform_3(%arg0: i32) -> (i32, i32) {
    %c0_i32 = arith.constant 0 : i32
    %c0_i32_0 = arith.constant 0 : i32
    %c0_i32_1 = arith.constant 0 : i32
    return %c0_i32, %c0_i32_0 : i32, i32
  }
  func.func @transform_4(%arg0: i32) -> (i32, i32) {
    %c0_i32 = arith.constant 0 : i32
    %c0_i32_0 = arith.constant 0 : i32
    %c0_i32_1 = arith.constant 0 : i32
    return %c0_i32, %c0_i32_0 : i32, i32
  }
  func.func @transform_5(%arg0: i32) -> (i32, i32, i32, i32) {
    %c0_i32 = arith.constant 0 : i32
    %c0_i32_0 = arith.constant 0 : i32
    %c0_i32_1 = arith.constant 0 : i32
    %c0_i32_2 = arith.constant 0 : i32
    return %arg0, %c0_i32, %c0_i32_0, %c0_i32_1 : i32, i32, i32, i32
  }
}

</mosaic_0001>

<bundles_post_ra>
// kernel: double_conv.1
= control target key start
LH: loop header
LB: loop body
LE: loop exit
PB: predicated region body
PF: predicated region fallthrough
CT: control target
= control target key end

     0   :  { %s7981_s18 = smov 0   ;;  %s11011_s0 = inlined_call_operand.vmem [shape: bf16[2,16,16,4], index: 0, kind: input, shape index: {}]   ;;  %s11012_s1 = inlined_call_operand.vmem [shape: bf16[1152,128], index: 1, kind: input, shape index: {}]   ;;  %s11013_s2 = inlined_call_operand.vmem [shape: f32[1,128], index: 2, kind: input, shape index: {}]   ;;  %s11014_s3 = inlined_call_operand.vmem [shape: bf16[1152,128], index: 3, kind: input, shape index: {}]   ;;  %s11015_s4 = inlined_call_operand.vmem [shape: f32[1,128], index: 4, kind: input, shape index: {}]   ;;  %s11016_s5 = inlined_call_operand.vmem [shape: f32[2,16,16,128], index: 5, kind: output, shape index: {}]  }
   0x1 LB: > { %s6344_s19 = sadd.s32 4294967295, %s7948_s18   ;;  %p6348_p0 = scmp.ge.s32.totalorder %s7948_s18, 1  ;;  %s7948_s18 = sphi %s7981_s18, %s15_s18  }
   0x2   : > { %p187_p1 = scmp.lt.s32.totalorder %s7948_s18, 3 }
   0x4   : > { %p188_p2 = pnand %p6348_p0, %p187_p1 }
   0x6   : > { %191 = sbr.rel (%p188_p2) target bundleno = 1135 (0x46f), region = 40 }
   0xb   : > { %v7760_v0 = vld [vmem:[%s11012_s1 + $0xf8] sm:$0xff]   ;;  %v7950_v3 = vmov 0   ;;  %v7764_v5 = vld [vmem:[%s11012_s1 + $0xf0] sm:$0xff]   ;;  %v7768_v9 = vld [vmem:[%s11012_s1 + $0xe8] sm:$0xff]   ;;  %p215_p3 = scmp.lt.s32.totalorder %s6344_s19, 1  ;;  %vm636_vm0 = vcmask 27648  }
   0xc   : > { %v7995_v1 = vld [vmem:[%s11012_s1 + $0x78] sm:$0xff]   ;;  %6711 = vmatprep.subr.bf16.mxu0 %v7760_v0  ;;  %229 = vst [vmem:[#allocation2 + $0xc] sm:$0xf] %v7950_v3  ;;  %230 = vst [vmem:[#allocation2 + $0x10] sm:$0xf] %v7950_v3  ;;  %v7765_v6 = vld [vmem:[%s11012_s1 + $0x70] sm:$0xff]  }
   0xd   : > { %v8000_v2 = vld [vmem:[%s11012_s1 + $0xb8] sm:$0xff]   ;;  %226 = vst [vmem:[#allocation2] sm:$0xf] %v7950_v3  ;;  %227 = vst [vmem:[#allocation2 + $0x4] sm:$0xf] %v7950_v3  ;;  %6823 = vmatprep.subr.bf16.mxu1 %v7995_v1  ;;  %v7766_v7 = vld [vmem:[%s11012_s1 + $0xb0] sm:$0xff]  }
   0xe   : > { %228 = vst [vmem:[#allocation2 + $0x8] sm:$0x1] %v7950_v3  ;;  %231 = vst [vmem:[#allocation2 + $0x14] sm:$0x1] %v7950_v3  ;;  %v7763_v4 = vld [vmem:[%s11012_s1 + $0x38] sm:$0xff]   ;;  %6712 = vmatpush3.bf16.msra.mxu0 %v8000_v2  ;;  %v7767_v8 = vld [vmem:[%s11012_s1 + $0x30] sm:$0xff]  }
   0xf   : > { %232 = vst [vmem:[#allocation2 + $0x18] sm:$0xf] %v7950_v3  ;;  %233 = vst [vmem:[#allocation2 + $0x1c] sm:$0xf] %v7950_v3  ;;  %6824 = vmatpush3.bf16.msra.mxu1 %v7763_v4  ;;  %6713 = vmatprep.subr.bf16.mxu0 %v7764_v5  ;;  %v7769_v10 = vld [vmem:[%s11012_s1 + $0x68] sm:$0xff]   ;;  %v7772_v13 = vld [vmem:[%s11012_s1 + $0xe0] sm:$0xff]  }
  0x10   : > { %234 = vst [vmem:[#allocation2 + $0x20] sm:$0x1] %v7950_v3  ;;  %235 = vst [vmem:[#allocation2 + $0x24] sm:$0xf] %v7950_v3  ;;  %6825 = vmatprep.subr.bf16.mxu1 %v7765_v6  ;;  %v7770_v11 = vld [vmem:[%s11012_s1 + $0xa8] sm:$0xff]   ;;  %v7773_v14 = vld [vmem:[%s11012_s1 + $0x60] sm:$0xff]  }
  0x11   : > { %236 = vst [vmem:[#allocation2 + $0x28] sm:$0xf] %v7950_v3  ;;  %237 = vst [vmem:[#allocation2 + $0x2c] sm:$0x1] %v7950_v3  ;;  %v7771_v12 = vld [vmem:[%s11012_s1 + $0x28] sm:$0xff]   ;;  %v7774_v15 = vld [vmem:[%s11012_s1 + $0xa0] sm:$0xff]  }
  0x12   : > { %238 = vst [vmem:[#allocation2 + $0x30] sm:$0xf] %v7950_v3  ;;  %239 = vst [vmem:[#allocation2 + $0x34] sm:$0xf] %v7950_v3  ;;  %6714 = vmatpush3.bf16.msra.mxu0 %v7766_v7  ;;  %v7775_v16 = vld [vmem:[%s11012_s1 + $0x20] sm:$0xff]   ;;  %v7776_v17 = vld [vmem:[%s11012_s1 + $0xd8] sm:$0xff]  }
  0x13   : > { %240 = vst [vmem:[#allocation2 + $0x38] sm:$0x1] %v7950_v3  ;;  %241 = vst [vmem:[#allocation2 + $0x3c] sm:$0xf] %v7950_v3  ;;  %6826 = vmatpush3.bf16.msra.mxu1 %v7767_v8  ;;  %6715 = vmatprep.subr.bf16.mxu0 %v7768_v9  ;;  %v7777_v18 = vld [vmem:[%s11012_s1 + $0x58] sm:$0xff]   ;;  %v7780_v21 = vld [vmem:[%s11012_s1 + $0xd0] sm:$0xff]  }
  0x14   : > { %242 = vst [vmem:[#allocation2 + $0x40] sm:$0xf] %v7950_v3  ;;  %243 = vst [vmem:[#allocation2 + $0x44] sm:$0x1] %v7950_v3  ;;  %6827 = vmatprep.subr.bf16.mxu1 %v7769_v10  ;;  %v7778_v19 = vld [vmem:[%s11012_s1 + $0x98] sm:$0xff]   ;;  %v7781_v22 = vld [vmem:[%s11012_s1 + $0x50] sm:$0xff]  }
  0x15   : > { %244 = vst [vmem:[#allocation2 + $0x48] sm:$0xf] %v7950_v3  ;;  %245 = vst [vmem:[#allocation2 + $0x4c] sm:$0xf] %v7950_v3  ;;  %v7779_v20 = vld [vmem:[%s11012_s1 + $0x18] sm:$0xff]   ;;  %v7782_v23 = vld [vmem:[%s11012_s1 + $0x90] sm:$0xff]  }
  0x16   : > { %246 = vst [vmem:[#allocation2 + $0x50] sm:$0x1] %v7950_v3  ;;  %247 = vst [vmem:[#allocation2 + $0x54] sm:$0xf] %v7950_v3  ;;  %6716 = vmatpush3.bf16.msra.mxu0 %v7770_v11  ;;  %s11279_s19 = smov (!%p215_p3, %s6344_s19), 1  ;;  %v7783_v24 = vld [vmem:[%s11012_s1 + $0x10] sm:$0xff]  }
  0x17   : > { %248 = vst [vmem:[#allocation2 + $0x58] sm:$0xf] %v7950_v3  ;;  %249 = vst [vmem:[#allocation2 + $0x5c] sm:$0x1] %v7950_v3  ;;  %6828 = vmatpush3.bf16.msra.mxu1 %v7771_v12  ;;  %6717 = vmatprep.subr.bf16.mxu0 %v7772_v13  ;;  %v7784_v25 = vld [vmem:[%s11012_s1 + $0xc8] sm:$0xff]   ;;  %s6677_s28 = sshll.u32 %s11279_s19, 7 }
  0x18   : > { %250 = vst [vmem:[#allocation2 + $0x60] sm:$0xf] %v7950_v3  ;;  %251 = vst [vmem:[#allocation2 + $0x64] sm:$0xf] %v7950_v3  ;;  %6829 = vmatprep.subr.bf16.mxu1 %v7773_v14  ;;  %v7785_v26 = vld [vmem:[%s11012_s1 + $0x48] sm:$0xff]   ;;  %v7788_v29 = vld [vmem:[%s11012_s1 + $0xc0] sm:$0xff]   ;;  %s8095_s12 = scalar_lea.vmem %s11011_s0, %s6677_s28 }
  0x19   : > { %252 = vst [vmem:[#allocation2 + $0x68] sm:$0x1] %v7950_v3  ;;  %253 = vst [vmem:[#allocation2 + $0x6c] sm:$0xf] %v7950_v3  ;;  %v7786_v27 = vld [vmem:[%s11012_s1 + $0x88] sm:$0xff]   ;;  %v7789_v30 = vld [vmem:[%s11012_s1 + $0x40] sm:$0xff]  }
  0x1a   : > { %254 = vst [vmem:[#allocation2 + $0x70] sm:$0xf] %v7950_v3  ;;  %255 = vst [vmem:[#allocation2 + $0x74] sm:$0x1] %v7950_v3  ;;  %6718 = vmatpush3.bf16.msra.mxu0 %v7774_v15  ;;  %v7787_v28 = vld [vmem:[%s11012_s1 + $0x8] sm:$0xff]   ;;  %v7790_v31 = vld [vmem:[%s11012_s1 + $0x80] sm:$0xff]  }
  0x1b   : > { %256 = vst [vmem:[#allocation2 + $0x78] sm:$0xf] %v7950_v3  ;;  %257 = vst [vmem:[#allocation2 + $0x7c] sm:$0xf] %v7950_v3  ;;  %6830 = vmatpush3.bf16.msra.mxu1 %v7775_v16  ;;  %6719 = vmatprep.subr.bf16.mxu0 %v7776_v17  ;;  %vm1243_vm1 = vcmask 1042432   ;;  %v7791_v32 = vld [vmem:[%s11012_s1] sm:$0xff]  }
  0x1c   : > { %258 = vst [vmem:[#allocation2 + $0x80] sm:$0x1] %v7950_v3  ;;  %259 = vst [vmem:[#allocation2 + $0x84] sm:$0xf] %v7950_v3  ;;  %6831 = vmatprep.subr.bf16.mxu1 %v7777_v18  ;;  %vm1244_vm2 = vcmask 1046532   ;;  %v7794_v38 = vld [vmem:[%s11012_s1 + $0x178] sm:$0xff]  }
  0x1d   : > { %260 = vst [vmem:[#allocation2 + $0x88] sm:$0xf] %v7950_v3  ;;  %261 = vst [vmem:[#allocation2 + $0x8c] sm:$0x1] %v7950_v3  ;;  %v280_v33 = vld [vmem:[%s8095_s12] sm:$0xf] }
  0x1e   : > { %262 = vst [vmem:[#allocation2 + $0x90] sm:$0xf] %v7950_v3  ;;  %263 = vst [vmem:[#allocation2 + $0x94] sm:$0xf] %v7950_v3  ;;  %6720 = vmatpush3.bf16.msra.mxu0 %v7778_v19  ;;  %v281_v34 = vld [vmem:[%s8095_s12 + $0x4] sm:$0xf] }
  0x1f   : > { %264 = vst [vmem:[#allocation2 + $0x98] sm:$0x1] %v7950_v3  ;;  %265 = vst [vmem:[#allocation2 + $0x9c] sm:$0xf] %v7950_v3  ;;  %6832 = vmatpush3.bf16.msra.mxu1 %v7779_v20  ;;  %6721 = vmatprep.subr.bf16.mxu0 %v7780_v21  ;;  %vm312_vm3 = vsmask.f32 256 }
  0x20   : > { %266 = vst [vmem:[#allocation2 + $0xa0] sm:$0xf] %v7950_v3  ;;  %267 = vst [vmem:[#allocation2 + $0xa4] sm:$0x1] %v7950_v3  ;;  %6833 = vmatprep.subr.bf16.mxu1 %v7781_v22  ;;  %vm313_vm4 = vsmask.f32 4368 }
  0x21   : > { %268 = vst [vmem:[#allocation2 + $0xa8] sm:$0xf] %v7950_v3  ;;  %269 = vst [vmem:[#allocation2 + $0xac] sm:$0xf] %v7950_v3  ;;  %v316_v35 = vshrl.u32 %v280_v33, 16  ;;  %v319_v36 = vshll.u32 %v280_v33, 16 }
  0x22   : > { %270 = vst [vmem:[#allocation2 + $0xb0] sm:$0x1] %v7950_v3  ;;  %271 = vst [vmem:[#allocation2 + $0xb4] sm:$0xf] %v7950_v3  ;;  %6722 = vmatpush3.bf16.msra.mxu0 %v7782_v23  ;;  %v324_v37 = vshrl.u32 %v281_v34, 16  ;;  %v327_v39 = vshll.u32 %v281_v34, 16 }
  0x23   : > { %272 = vst [vmem:[#allocation2 + $0xb8] sm:$0xf] %v7950_v3  ;;  %273 = vst [vmem:[#allocation2 + $0xbc] sm:$0x1] %v7950_v3  ;;  %6834 = vmatpush3.bf16.msra.mxu1 %v7783_v24  ;;  %6723 = vmatprep.subr.bf16.mxu0 %v7784_v25  ;;  %vm637_vm5 = vsmask.f32 7938 }
  0x24   : > { %274 = vst [vmem:[#allocation2 + $0xc0] sm:$0xf] %v7950_v3  ;;  %275 = vst [vmem:[#allocation2 + $0xc4] sm:$0xf] %v7950_v3  ;;  %6835 = vmatprep.subr.bf16.mxu1 %v7785_v26  ;;  %v639_v40 = vld [vmem:[#allocation2 + $0xc] sm:$0xf] }
  0x25   : > { %276 = vst [vmem:[#allocation2 + $0xc8] sm:$0x1] %v7950_v3  ;;  %277 = vst [vmem:[#allocation2 + $0xcc] sm:$0xf] %v7950_v3  ;;  %vm644_vm6 = vcmask 24576   ;;  %v11066_v41 = vmov 0 }
  0x26   : > { %278 = vst [vmem:[#allocation2 + $0xd0] sm:$0xf] %v7950_v3  ;;  %279 = vst [vmem:[#allocation2 + $0xd4] sm:$0x1] %v7950_v3  ;;  %6724 = vmatpush3.bf16.msra.mxu0 %v7786_v27  ;;  %v318_v42 = vrot.slane %v316_v35, 7  ;;  %v326_v43 = vrot.slane %v324_v37, 7 }
  0x27   : > { %3190 = vst [vmem:[#allocation3] sm:$0xf] %v7950_v3  ;;  %3191 = vst [vmem:[#allocation3 + $0x4] sm:$0xf] %v7950_v3  ;;  %6836 = vmatpush3.bf16.msra.mxu1 %v7787_v28  ;;  %6725 = vmatprep.subr.bf16.mxu0 %v7788_v29  ;;  %v8113_v44 = vld [vmem:[#allocation2] sm:$0xf] }
  0x28   : > { %3192 = vst [vmem:[#allocation3 + $0x8] sm:$0x1] %v7950_v3  ;;  %3194 = vst [vmem:[#allocation3 + $0xcc] sm:$0xf] %v7950_v3  ;;  %6837 = vmatprep.subr.bf16.mxu1 %v7789_v30  ;;  %v8115_v45 = vld [vmem:[#allocation2 + $0x4] sm:$0xf]  ;;  %v321_v49 = vor.u32 %v319_v36, %v318_v42  ;;  %v329_v51 = vor.u32 %v327_v39, %v326_v43 }
  0x29   : > { %3195 = vst [vmem:[#allocation3 + $0xd0] sm:$0xf] %v7950_v3  ;;  %3196 = vst [vmem:[#allocation3 + $0xd4] sm:$0x1] %v7950_v3  ;;  %v756_v47 = vld [vmem:[#allocation2 + $0x8] sm:$0x1]  ;;  %v6371_v48 = vcombine.low %v8113_v44, %v8115_v45 }
  0x2a   : > { %6726 = vmatpush3.bf16.msra.mxu0 %v7790_v31  ;;  %vm8109_vm7 = vmor %vm312_vm3, %vm313_vm4  ;;  %vm808_vm9 = vsmask.f32 3328  ;;  %vm809_vm10 = vsmask.f32 7440  ;;  %v322_v50 = vrot.slane %v318_v42, 4  ;;  %v331_v52 = vrot.slane %v326_v43, 4 }
  0x2b   : > { %6838 = vmatpush3.bf16.msra.mxu1 %v7791_v32  ;;  %v11067_v41 = vsel %vm8109_vm7, 4294967295, %v11066_v41  ;;  %6935 = vmatprep.subr.bf16.mxu0 %v7794_v38  ;;  %vm8119_vm8 = vmand %vm636_vm0, %vm637_vm5  ;;  %v812_v53 = vshrl.u32 %v8113_v44, 16  ;;  %v815_v54 = vshll.u32 %v8113_v44, 16  ;;  %v821_v55 = vshll.u32 %v8115_v45, 16  ;;  %v282_v61 = vld [vmem:[%s8095_s12 + $0x8] sm:$0xf] }
  0x2c   : > { %11068 = vst [vmem:[#allocation4_spill] sm:$0xff] %v11067_v41  ;;  %v825_v56 = vshrl.u32 %v8115_v45, 16  ;;  %v330_v57 = vsel %vm8109_vm7, %v322_v50, %v329_v51  ;;  %v640_v58 = vsel %vm8119_vm8, %v321_v49, %v639_v40  ;;  %v831_v59 = vshll.u32 %v756_v47, 16  ;;  %vm8137_vm11 = vmor %vm1243_vm1, %vm1244_vm2  ;;  %v283_v3 = vld [vmem:[%s8095_s12 + $0xc] sm:$0xf]  ;;  %v7795_v49 = vld [vmem:[%s11012_s1 + $0x138] sm:$0xff]  }
  0x2d   : > { %v1251_v60 = vrot.slane %v756_v47, 5  ;;  %641 = vst [vmem:[#allocation2 + $0xc] sm:$0xf] %v640_v58  ;;  %643 = vst.msk [vmem:[#allocation2 + $0x10] sm:$0xf] %vm636_vm0, %v330_v57  ;;  %v814_v62 = vrot.slane %v812_v53, 4 }
  0x2e   : > { %v817_v63 = vrot.slane %v815_v54, 5  ;;  %v823_v0 = vrot.slane %v821_v55, 5  ;;  %v827_v1 = vrot.slane %v825_v56, 4  ;;  %v11071_v2 = vmov 0  ;;  %vm8146_vm12 = vmand %vm644_vm6, %vm312_vm3  ;;  %v646_v13 = vld [vmem:[#allocation2 + $0x14] sm:$0x1] }
  0x2f   : > { %v11072_v2 = vsel %vm8137_vm11, 4294967295, %v11071_v2  ;;  %v833_v4 = vrot.slane %v831_v59, 5  ;;  %v6353_v5 = vrot.slane %v8113_v44, 9  ;;  %v1248_v6 = vrot.slane %v8115_v45, 5  ;;  %v284_v14 = vld [vmem:[%s8095_s12 + $0x10] sm:$0xf]  ;;  %vm8153_vm13 = vmor %vm808_vm9, %vm809_vm10 }
  0x30   : > { %11073 = vst [vmem:[#allocation5_spill] sm:$0xff] %v11072_v2  ;;  %v333_v7 = vshrl.u32 %v282_v61, 16  ;;  %v818_v9 = vor.u32 %v817_v63, %v814_v62  ;;  %v828_v10 = vor.u32 %v827_v1, %v823_v0  ;;  %v336_v11 = vshll.u32 %v282_v61, 16  ;;  %v649_v23 = vld [vmem:[#allocation2 + $0x18] sm:$0xf]  ;;  %v7798_v54 = vld [vmem:[%s11012_s1 + $0x170] sm:$0xff]  }
  0x31   : > { %v341_v12 = vshrl.u32 %v283_v3, 16  ;;  %v11076_v15 = vmov 0  ;;  %v1249_v16 = vsel %vm8137_vm11, %v6353_v5, %v1248_v6  ;;  %v1250_v17 = vrot.slane %v1248_v6, 4  ;;  %v285_v53 = vld [vmem:[%s8095_s12 + $0x14] sm:$0xf]  ;;  %v7880_v41 = vld [vmem:[%s11014_s3 + $0x40] sm:$0xff]  }
  0x32   : > { %v11077_v15 = vsel %vm8153_vm13, 4294967295, %v11076_v15  ;;  %v335_v18 = vrot.slane %v333_v7, 7  ;;  %v344_v19 = vshll.u32 %v283_v3, 16  ;;  %v819_v20 = vrot.slane %v818_v9, 4  ;;  %v656_v59 = vld [vmem:[#allocation2 + $0x24] sm:$0xf] }
  0x33   : > { %11078 = vst [vmem:[#allocation6_spill] sm:$0xff] %v11077_v15  ;;  %v829_v21 = vrot.slane %v828_v10, 4  ;;  %v8159_v22 = vrot.slane %v341_v12, 7  ;;  %v647_v24 = vsel %vm8146_vm12, %v331_v52, %v646_v13  ;;  %v1252_v25 = vsel %vm8137_vm11, %v1250_v17, %v1251_v60  ;;  %v7799_v10 = vld [vmem:[%s11012_s1 + $0x130] sm:$0xff]   ;;  %v3273_v15 = vld [vmem:[#allocation3 + $0x74] sm:$0x1] }
  0x34   : > { %v338_v26 = vor.u32 %v336_v11, %v335_v18  ;;  %v339_v27 = vrot.slane %v335_v18, 4  ;;  %648 = vst [vmem:[#allocation2 + $0x14] sm:$0x1] %v647_v24  ;;  %v350_v28 = vshrl.u32 %v284_v14, 16  ;;  %v824_v29 = vsel %vm8153_vm13, %v819_v20, %v823_v0  ;;  %v757_v33 = vld [vmem:[#allocation2 + $0xc] sm:$0xf] }
  0x35   : > { %v834_v30 = vsel %vm8153_vm13, %v829_v21, %v833_v4  ;;  %v6403_v31 = vcombine.low %v1249_v16, %v1252_v25  ;;  %v346_v32 = vor.u32 %v344_v19, %v8159_v22  ;;  %v758_v34 = vld [vmem:[#allocation2 + $0x10] sm:$0xf]  ;;  %v353_v38 = vshll.u32 %v284_v14, 16  ;;  %v286_v0 = vld [vmem:[%s8095_s12 + $0x18] sm:$0xf]  ;;  %v7802_v11 = vld [vmem:[%s11012_s1 + $0x168] sm:$0xff]  }
  0x36   : > { %v6387_v35 = vcombine.low %v824_v29, %v834_v30  ;;  %v650_v36 = vsel %vm8119_vm8, %v338_v26, %v649_v23  ;;  %v8172_v37 = vrot.slane %v350_v28, 7  ;;  %v836_v39 = vshrl.u32 %v757_v33, 16  ;;  %v653_v4 = vld [vmem:[#allocation2 + $0x20] sm:$0x1]  ;;  %v287_v30 = vld [vmem:[%s8095_s12 + $0x1c] sm:$0xf] }
  0x37   : > { %v839_v40 = vshll.u32 %v757_v33, 16  ;;  %v845_v42 = vshll.u32 %v758_v34, 16  ;;  %v849_v43 = vshrl.u32 %v758_v34, 16  ;;  %651 = vst [vmem:[#allocation2 + $0x18] sm:$0xf] %v650_v36  ;;  %v8174_v47 = vcombine.low %v757_v33, %v758_v34  ;;  %v7803_v36 = vld [vmem:[%s11012_s1 + $0x128] sm:$0xff]  }
  0x38   : > { %2071 = vmatprep.mubr.bf16.mxu1 %v6387_v35  ;;  %v347_v50 = vsel %vm8109_vm7, %v339_v27, %v346_v32  ;;  %v6354_v51 = vrot.slane %v757_v33, 9  ;;  %v1255_v52 = vrot.slane %v758_v34, 5  ;;  %v838_v55 = vrot.slane %v836_v39, 4  ;;  %v3233_v2 = vld [vmem:[#allocation3 + $0x90] sm:$0x1]  ;;  %s6678_s23 = sshll.u32 %s11279_s19, 8 }
  0x39   : > { %v841_v56 = vrot.slane %v839_v40, 5  ;;  %v851_v57 = vrot.slane %v849_v43, 4  ;;  %2072 = vmatmul.mubr.bf16.vlgmr.msra.gmra.mxu1 %v6371_v48  ;;  %652 = vst.msk [vmem:[#allocation2 + $0x1c] sm:$0xf] %vm636_vm0, %v347_v50  ;;  %v847_v58 = vrot.slane %v845_v42, 5  ;;  %1814 = vmatprep.mubr.bf16.mxu0 %v8174_v47  ;;  %v355_v62 = vor.u32 %v353_v38, %v8172_v37  ;;  %v7806_v42 = vld [vmem:[%s11012_s1 + $0x160] sm:$0xff]   ;;  %s10846_s19 = scalar_lea.vmem %s11016_s5, %s6678_s23 }
  0x3a   : > { %v1256_v60 = vsel %vm8137_vm11, %v6354_v51, %v1255_v52  ;;  %v1257_v61 = vrot.slane %v1255_v52, 4  ;;  %v356_v63 = vrot.slane %v8172_v37, 4  ;;  %1815 = vmatmul.mubr.bf16.vlgmr.msra.gmra.mxu0 %v6403_v31  ;;  %v358_v45 = vshrl.u32 %v285_v53, 16  ;;  %v663_v52 = vld [vmem:[#allocation2 + $0x30] sm:$0xf] }
  0x3b   : > { %v759_v1 = vld [vmem:[#allocation2 + $0x14] sm:$0x1]  ;;  %v842_v3 = vor.u32 %v841_v56, %v838_v55  ;;  %v852_v44 = vor.u32 %v851_v57, %v847_v58  ;;  %v361_v48 = vshll.u32 %v285_v53, 16  ;;  %6936 = vmatpush3.bf16.msra.mxu0 %v7795_v49  ;;  %v657_v7 = vsel %vm8119_vm8, %v355_v62, %v656_v59 }
  0x3c   : > { %v855_v5 = vshll.u32 %v759_v1, 16  ;;  %v1258_v6 = vrot.slane %v759_v1, 5  ;;  %v348_v9 = vrot.slane %v8159_v22, 4  ;;  %v8204_v14 = vrot.slane %v358_v45, 7  ;;  %658 = vst [vmem:[#allocation2 + $0x24] sm:$0xf] %v657_v7  ;;  %6937 = vmatprep.subr.bf16.mxu0 %v7798_v54 }
  0x3d   : > { %v843_v12 = vrot.slane %v842_v3, 4  ;;  %v853_v13 = vrot.slane %v852_v44, 4  ;;  %v367_v16 = vshrl.u32 %v286_v0, 16  ;;  %v370_v21 = vshll.u32 %v286_v0, 16  ;;  %v7810_v45 = vld [vmem:[%s11012_s1 + $0x158] sm:$0xff]  }
  0x3e   : > { %v760_v17 = vld [vmem:[#allocation2 + $0x18] sm:$0xf]  ;;  %v857_v18 = vrot.slane %v855_v5, 5  ;;  %v1259_v19 = vsel %vm8137_vm11, %v1257_v61, %v1258_v6  ;;  %v654_v20 = vsel %vm8146_vm12, %v348_v9, %v653_v4  ;;  %v363_v28 = vor.u32 %v361_v48, %v8204_v14  ;;  %v288_v7 = vld [vmem:[%s8095_s12 + $0x20] sm:$0xf] }
  0x3f   : > { %v860_v22 = vshrl.u32 %v760_v17, 16  ;;  %v863_v23 = vshll.u32 %v760_v17, 16  ;;  %v848_v24 = vsel %vm8153_vm13, %v843_v12, %v847_v58  ;;  %v8212_v25 = vcombine.low %v1256_v60, %v1259_v19  ;;  %655 = vst [vmem:[#allocation2 + $0x20] sm:$0x1] %v654_v20  ;;  %6938 = vmatpush3.bf16.msra.mxu0 %v7799_v10  ;;  %v660_v58 = vld [vmem:[#allocation2 + $0x2c] sm:$0x1] }
  0x40   : > { %v761_v26 = vld [vmem:[#allocation2 + $0x1c] sm:$0xf]  ;;  %v858_v27 = vsel %vm8153_vm13, %v853_v13, %v857_v18  ;;  %v6355_v29 = vrot.slane %v760_v17, 9  ;;  %v369_v31 = vrot.slane %v367_v16, 7  ;;  %6939 = vmatprep.subr.bf16.mxu0 %v7802_v11  ;;  %v364_v37 = vsel %vm8109_vm7, %v356_v63, %v363_v28 }
  0x41   : > { %v873_v32 = vshrl.u32 %v761_v26, 16  ;;  %v8218_v33 = vcombine.low %v760_v17, %v761_v26  ;;  %v8220_v34 = vcombine.low %v848_v24, %v858_v27  ;;  %v862_v35 = vrot.slane %v860_v22, 4  ;;  %659 = vst.msk [vmem:[#allocation2 + $0x28] sm:$0xf] %vm636_vm0, %v364_v37  ;;  %v7811_v9 = vld [vmem:[%s11012_s1 + $0x118] sm:$0xff]  }
  0x42   : > { %v865_v38 = vrot.slane %v863_v23, 5  ;;  %v869_v39 = vshll.u32 %v761_v26, 16  ;;  %v1262_v40 = vrot.slane %v761_v26, 5  ;;  %v372_v49 = vor.u32 %v370_v21, %v369_v31  ;;  %v289_v22 = vld [vmem:[%s8095_s12 + $0x24] sm:$0xf] }
  0x43   : > { %1822 = vmatprep.mubr.bf16.mxu0 %v8218_v33  ;;  %2079 = vmatprep.mubr.bf16.mxu1 %v8220_v34  ;;  %v875_v43 = vrot.slane %v873_v32, 4  ;;  %v373_v50 = vrot.slane %v369_v31, 4  ;;  %v375_v51 = vshrl.u32 %v287_v30, 16  ;;  %v8235_v53 = vld [vmem:[#allocation2 + $0x24] sm:$0xf]  ;;  %v378_v62 = vshll.u32 %v287_v30, 16 }
  0x44   : > { %1823 = vmatmul.mubr.bf16.gmra.mxu0 %v8212_v25  ;;  %2080 = vmatmul.mubr.bf16.gmra.mxu1 %v8174_v47  ;;  %v866_v54 = vor.u32 %v865_v38, %v862_v35  ;;  %v871_v55 = vrot.slane %v869_v39, 5  ;;  %v1263_v56 = vsel %vm8137_vm11, %v6355_v29, %v1262_v40  ;;  %v1264_v57 = vrot.slane %v1262_v40, 4  ;;  %v7807_v47 = vld [vmem:[%s11012_s1 + $0x120] sm:$0xff]  }
  0x45   : > { %v884_v59 = vshrl.u32 %v8235_v53, 16  ;;  %v887_v60 = vshll.u32 %v8235_v53, 16  ;;  %v8241_v61 = vrot.slane %v375_v51, 7  ;;  %6940 = vmatpush3.bf16.msra.mxu0 %v7803_v36  ;;  %v664_v3 = vsel %vm8119_vm8, %v372_v49, %v663_v52  ;;  %v7814_v36 = vld [vmem:[%s11012_s1 + $0x150] sm:$0xff]  }
  0x46   : > { %v762_v63 = vld [vmem:[#allocation2 + $0x20] sm:$0x1]  ;;  %v867_v0 = vrot.slane %v866_v54, 4  ;;  %v876_v1 = vor.u32 %v875_v43, %v871_v55  ;;  %v365_v44 = vrot.slane %v8204_v14, 4  ;;  %6941 = vmatprep.subr.bf16.mxu0 %v7806_v42  ;;  %665 = vst [vmem:[#allocation2 + $0x30] sm:$0xf] %v664_v3 }
  0x47   : > { %v879_v48 = vshll.u32 %v762_v63, 16  ;;  %v1265_v4 = vrot.slane %v762_v63, 5  ;;  %v380_v5 = vor.u32 %v378_v62, %v8241_v61  ;;  %v886_v6 = vrot.slane %v884_v59, 4  ;;  %v670_v42 = vld [vmem:[#allocation2 + $0x3c] sm:$0xf] }
  0x48   : > { %v872_v10 = vsel %vm8153_vm13, %v867_v0, %v871_v55  ;;  %v877_v11 = vrot.slane %v876_v1, 4  ;;  %v661_v12 = vsel %vm8146_vm12, %v365_v44, %v660_v58  ;;  %v889_v13 = vrot.slane %v887_v60, 5  ;;  %v764_v19 = vld [vmem:[#allocation2 + $0x28] sm:$0xf]  ;;  %v7815_v0 = vld [vmem:[%s11012_s1 + $0x110] sm:$0xff]  }
  0x49   : > { %v881_v14 = vrot.slane %v879_v48, 5  ;;  %v1266_v16 = vsel %vm8137_vm11, %v1264_v57, %v1265_v4  ;;  %v381_v17 = vsel %vm8109_vm7, %v373_v50, %v380_v5  ;;  %662 = vst [vmem:[#allocation2 + $0x2c] sm:$0x1] %v661_v12  ;;  %v6356_v18 = vrot.slane %v8235_v53, 9  ;;  %6942 = vmatpush3.bf16.msra.mxu0 %v7807_v47  ;;  %v667_v57 = vld [vmem:[#allocation2 + $0x38] sm:$0x1] }
  0x4a   : > { %v8266_v20 = vcombine.low %v1263_v56, %v1266_v16  ;;  %666 = vst.msk [vmem:[#allocation2 + $0x34] sm:$0xf] %vm636_vm0, %v381_v17  ;;  %v890_v21 = vor.u32 %v889_v13, %v886_v6  ;;  %v384_v23 = vshrl.u32 %v288_v7, 16  ;;  %v387_v24 = vshll.u32 %v288_v7, 16  ;;  %6943 = vmatprep.subr.bf16.mxu0 %v7810_v45  ;;  %v290_v63 = vld [vmem:[%s8095_s12 + $0x28] sm:$0xf] }
  0x4b   : > { %v897_v26 = vshrl.u32 %v764_v19, 16  ;;  %v8271_v27 = vcombine.low %v8235_v53, %v764_v19  ;;  %v882_v28 = vsel %vm8153_vm13, %v877_v11, %v881_v14  ;;  %v893_v29 = vshll.u32 %v764_v19, 16  ;;  %v7818_v7 = vld [vmem:[%s11012_s1 + $0x148] sm:$0xff]  }
  0x4c   : > { %v8275_v30 = vcombine.low %v872_v10, %v882_v28  ;;  %v8277_v31 = vrot.slane %v890_v21, 4  ;;  %v1269_v32 = vrot.slane %v764_v19, 5  ;;  %v386_v35 = vrot.slane %v384_v23, 7  ;;  %v7819_v13 = vld [vmem:[%s11012_s1 + $0x108] sm:$0xff]  }
  0x4d   : > { %1830 = vmatprep.mubr.bf16.mxu0 %v8271_v27  ;;  %v895_v37 = vrot.slane %v893_v29, 5  ;;  %v899_v38 = vrot.slane %v897_v26, 4  ;;  %v392_v39 = vshrl.u32 %v289_v22, 16  ;;  %v395_v40 = vshll.u32 %v289_v22, 16  ;;  %6944 = vmatpush3.bf16.msra.mxu0 %v7811_v9  ;;  %v766_v43 = vld [vmem:[#allocation2 + $0x30] sm:$0xf] }
  0x4e   : > { %2087 = vmatprep.mubr.bf16.mxu1 %v8275_v30  ;;  %1831 = vmatmul.mubr.bf16.gmra.mxu0 %v8266_v20  ;;  %v1270_v49 = vsel %vm8137_vm11, %v6356_v18, %v1269_v32  ;;  %v1271_v50 = vrot.slane %v1269_v32, 4  ;;  %v389_v51 = vor.u32 %v387_v24, %v386_v35  ;;  %v390_v52 = vrot.slane %v386_v35, 4  ;;  %v291_v19 = vld [vmem:[%s8095_s12 + $0x2c] sm:$0xf]  ;;  %v292_v26 = vld [vmem:[%s8095_s12 + $0x30] sm:$0xf] }
  0x4f   : > { %2088 = vmatmul.mubr.bf16.gmra.mxu1 %v8218_v33  ;;  %v908_v53 = vshrl.u32 %v766_v43, 16  ;;  %v911_v54 = vshll.u32 %v766_v43, 16  ;;  %v896_v55 = vsel %vm8153_vm13, %v8277_v31, %v895_v37  ;;  %v900_v56 = vor.u32 %v899_v38, %v895_v37  ;;  %6945 = vmatprep.subr.bf16.mxu0 %v7814_v36 }
  0x50   : > { %v765_v58 = vld [vmem:[#allocation2 + $0x2c] sm:$0x1]  ;;  %v8291_v59 = vrot.slane %v392_v39, 7  ;;  %v671_v60 = vsel %vm8119_vm8, %v389_v51, %v670_v42  ;;  %v382_v62 = vrot.slane %v8241_v61, 4  ;;  %v6357_v47 = vrot.slane %v766_v43, 9 }
  0x51   : > { %v767_v1 = vld [vmem:[#allocation2 + $0x34] sm:$0xf]  ;;  %v901_v3 = vrot.slane %v900_v56, 4  ;;  %v903_v44 = vshll.u32 %v765_v58, 16  ;;  %v1272_v45 = vrot.slane %v765_v58, 5  ;;  %v910_v48 = vrot.slane %v908_v53, 4  ;;  %6946 = vmatpush3.bf16.msra.mxu0 %v7815_v0 }
  0x52   : > { %672 = vst [vmem:[#allocation2 + $0x3c] sm:$0xf] %v671_v60  ;;  %v921_v4 = vshrl.u32 %v767_v1, 16  ;;  %v8300_v5 = vcombine.low %v766_v43, %v767_v1  ;;  %v397_v6 = vor.u32 %v395_v40, %v8291_v59  ;;  %v668_v61 = vsel %vm8146_vm12, %v382_v62, %v667_v57  ;;  %6947 = vmatprep.subr.bf16.mxu0 %v7818_v7  ;;  %v674_v39 = vld [vmem:[#allocation2 + $0x44] sm:$0x1]  ;;  %v7820_v40 = vld [vmem:[%s11012_s1 + $0x1f8] sm:$0xff]  }
  0x53   : > { %v905_v9 = vrot.slane %v903_v44, 5  ;;  %v1273_v10 = vsel %vm8137_vm11, %v1271_v50, %v1272_v45  ;;  %669 = vst [vmem:[#allocation2 + $0x38] sm:$0x1] %v668_v61  ;;  %v913_v11 = vrot.slane %v911_v54, 5  ;;  %v917_v12 = vshll.u32 %v767_v1, 16  ;;  %7047 = vmatprep.subr.bf16.mxu1 %v7820_v40  ;;  %v7821_v57 = vld [vmem:[%s11012_s1 + $0x1b8] sm:$0xff]  }
  0x54   : > { %1838 = vmatprep.mubr.bf16.mxu0 %v8300_v5  ;;  %v8314_v14 = vcombine.low %v1270_v49, %v1273_v10  ;;  %v398_v16 = vsel %vm8109_vm7, %v390_v52, %v397_v6  ;;  %v923_v17 = vrot.slane %v921_v4, 4  ;;  %v1276_v18 = vrot.slane %v767_v1, 5  ;;  %v677_v56 = vld [vmem:[#allocation2 + $0x48] sm:$0xf]  ;;  %7048 = vmatpush3.bf16.msra.mxu1 %v7821_v57 }
  0x55   : > { %v906_v21 = vsel %vm8153_vm13, %v901_v3, %v905_v9  ;;  %673 = vst.msk [vmem:[#allocation2 + $0x40] sm:$0xf] %vm636_vm0, %v398_v16  ;;  %v914_v22 = vor.u32 %v913_v11, %v910_v48  ;;  %v8322_v23 = vrot.slane %v917_v12, 5  ;;  %v401_v24 = vshrl.u32 %v290_v63, 16  ;;  %6948 = vmatpush3.bf16.msra.mxu0 %v7819_v13 }
  0x56   : > { %v8325_v28 = vcombine.low %v896_v55, %v906_v21  ;;  %1839 = vmatmul.mubr.bf16.gmra.mxu0 %v8314_v14  ;;  %v1277_v29 = vsel %vm8137_vm11, %v6357_v47, %v1276_v18  ;;  %v1278_v31 = vrot.slane %v1276_v18, 4  ;;  %v404_v32 = vshll.u32 %v290_v63, 16  ;;  %v7822_v18 = vld [vmem:[%s11012_s1 + $0x1f0] sm:$0xff]  }
  0x57   : > { %v915_v35 = vrot.slane %v914_v22, 4  ;;  %v924_v36 = vor.u32 %v923_v17, %v8322_v23  ;;  %v403_v37 = vrot.slane %v401_v24, 7  ;;  %v409_v38 = vshrl.u32 %v291_v19, 16  ;;  %v293_v17 = vld [vmem:[%s8095_s12 + $0x34] sm:$0xf]  ;;  %7049 = vmatprep.subr.bf16.mxu1 %v7822_v18 }
  0x58   : > { %2095 = vmatprep.mubr.bf16.mxu1 %v8325_v28  ;;  %v412_v43 = vshll.u32 %v291_v19, 16  ;;  %v399_v49 = vrot.slane %v8291_v59, 4  ;;  %v418_v50 = vshrl.u32 %v292_v26, 16  ;;  %v421_v51 = vshll.u32 %v292_v26, 16  ;;  %v684_v24 = vld [vmem:[#allocation2 + $0x54] sm:$0xf] }
  0x59   : > { %v769_v42 = vld [vmem:[#allocation2 + $0x3c] sm:$0xf]  ;;  %2096 = vmatmul.mubr.bf16.gmra.mxu1 %v8271_v27  ;;  %v920_v54 = vsel %vm8153_vm13, %v915_v35, %v8322_v23  ;;  %v925_v55 = vrot.slane %v924_v36, 4  ;;  %v406_v60 = vor.u32 %v404_v32, %v403_v37  ;;  %v407_v59 = vrot.slane %v403_v37, 4  ;;  %v681_v26 = vld [vmem:[#allocation2 + $0x50] sm:$0x1] }
  0x5a   : > { %v932_v52 = vshrl.u32 %v769_v42, 16  ;;  %v935_v53 = vshll.u32 %v769_v42, 16  ;;  %v768_v58 = vld [vmem:[#allocation2 + $0x38] sm:$0x1]  ;;  %v8343_v62 = vrot.slane %v409_v38, 7  ;;  %v675_v47 = vsel %vm8146_vm12, %v399_v49, %v674_v39  ;;  %v7824_v37 = vld [vmem:[%s11012_s1 + $0x1b0] sm:$0xff]  }
  0x5b   : > { %v927_v63 = vshll.u32 %v768_v58, 16  ;;  %v1279_v0 = vrot.slane %v768_v58, 5  ;;  %676 = vst [vmem:[#allocation2 + $0x44] sm:$0x1] %v675_v47  ;;  %v678_v48 = vsel %vm8119_vm8, %v406_v60, %v677_v56  ;;  %v6358_v4 = vrot.slane %v769_v42, 9  ;;  %v7825_v49 = vld [vmem:[%s11012_s1 + $0x1e8] sm:$0xff]   ;;  %7050 = vmatpush3.bf16.msra.mxu1 %v7824_v37 }
  0x5c   : > { %v934_v1 = vrot.slane %v932_v52, 4  ;;  %v937_v3 = vrot.slane %v935_v53, 5  ;;  %v770_v44 = vld [vmem:[#allocation2 + $0x40] sm:$0xf]  ;;  %v414_v45 = vor.u32 %v412_v43, %v8343_v62  ;;  %v8350_v6 = vrot.slane %v418_v50, 7  ;;  %7051 = vmatprep.subr.bf16.mxu1 %v7825_v49 }
  0x5d   : > { %v945_v61 = vshrl.u32 %v770_v44, 16  ;;  %v8352_v7 = vcombine.low %v769_v42, %v770_v44  ;;  %v929_v9 = vrot.slane %v927_v63, 5  ;;  %v1280_v10 = vsel %vm8137_vm11, %v1278_v31, %v1279_v0  ;;  %679 = vst [vmem:[#allocation2 + $0x48] sm:$0xf] %v678_v48  ;;  %v294_v36 = vld [vmem:[%s8095_s12 + $0x38] sm:$0xf] }
  0x5e   : > { %v8356_v11 = vcombine.low %v1277_v29, %v1280_v10  ;;  %v415_v12 = vsel %vm8109_vm7, %v407_v59, %v414_v45  ;;  %v938_v13 = vor.u32 %v937_v3, %v934_v1  ;;  %v941_v16 = vshll.u32 %v770_v44, 16  ;;  %v8380_v43 = vld [vmem:[%s8095_s12 + $0x3c] sm:$0xf]  ;;  %v7827_v1 = vld [vmem:[%s11012_s1 + $0x1e0] sm:$0xff]  }
  0x5f   : > { %1846 = vmatprep.mubr.bf16.mxu0 %v8352_v7  ;;  %v930_v19 = vsel %vm8153_vm13, %v925_v55, %v929_v9  ;;  %680 = vst.msk [vmem:[#allocation2 + $0x4c] sm:$0xf] %vm636_vm0, %v415_v12  ;;  %v947_v21 = vrot.slane %v945_v61, 4  ;;  %v1283_v22 = vrot.slane %v770_v44, 5  ;;  %v423_v23 = vor.u32 %v421_v51, %v8350_v6  ;;  %v7826_v55 = vld [vmem:[%s11012_s1 + $0x1a8] sm:$0xff]   ;;  %v7829_v12 = vld [vmem:[%s11012_s1 + $0x1a0] sm:$0xff]  }
  0x60   : > { %v8369_v29 = vcombine.low %v920_v54, %v930_v19  ;;  %1847 = vmatmul.mubr.bf16.gmra.mxu0 %v8356_v11  ;;  %v939_v31 = vrot.slane %v938_v13, 4  ;;  %v943_v32 = vrot.slane %v941_v16, 5  ;;  %v424_v35 = vrot.slane %v8350_v6, 4  ;;  %7052 = vmatpush3.bf16.msra.mxu1 %v7826_v55  ;;  %v691_v19 = vld [vmem:[#allocation2 + $0x60] sm:$0xf] }
  0x61   : > { %v1284_v38 = vsel %vm8137_vm11, %v6358_v4, %v1283_v22  ;;  %v1285_v39 = vrot.slane %v1283_v22, 4  ;;  %v426_v40 = vshrl.u32 %v293_v17, 16  ;;  %v429_v42 = vshll.u32 %v293_v17, 16  ;;  %7053 = vmatprep.subr.bf16.mxu1 %v7827_v1  ;;  %v7830_v37 = vld [vmem:[%s11012_s1 + $0x140] sm:$0xff]   ;;  %v688_v49 = vld [vmem:[#allocation2 + $0x5c] sm:$0x1] }
  0x62   : > { %2103 = vmatprep.mubr.bf16.mxu1 %v8369_v29  ;;  %v771_v50 = vld [vmem:[#allocation2 + $0x44] sm:$0x1]  ;;  %v944_v51 = vsel %vm8153_vm13, %v939_v31, %v943_v32  ;;  %v948_v52 = vor.u32 %v947_v21, %v943_v32  ;;  %v685_v53 = vsel %vm8119_vm8, %v423_v23, %v684_v24  ;;  %v416_v54 = vrot.slane %v8343_v62, 4  ;;  %v296_v55 = vld [vmem:[%s8095_s12 + $0x40] sm:$0xf]  ;;  %6949 = vmatprep.subr.bf16.mxu0 %v7830_v37 }
  0x63   : > { %2104 = vmatmul.mubr.bf16.gmra.mxu1 %v8300_v5  ;;  %v951_v56 = vshll.u32 %v771_v50, 16  ;;  %v1286_v57 = vrot.slane %v771_v50, 5  ;;  %v8395_v58 = vrot.slane %v426_v40, 7  ;;  %686 = vst [vmem:[#allocation2 + $0x54] sm:$0xf] %v685_v53  ;;  %v435_v60 = vshrl.u32 %v294_v36, 16 }
  0x64   : > { %v772_v59 = vld [vmem:[#allocation2 + $0x48] sm:$0xf]  ;;  %v949_v47 = vrot.slane %v948_v52, 4  ;;  %v682_v63 = vsel %vm8146_vm12, %v416_v54, %v681_v26  ;;  %v438_v62 = vshll.u32 %v294_v36, 16  ;;  %v443_v0 = vshrl.u32 %v8380_v43, 16  ;;  %v7831_v50 = vld [vmem:[%s11012_s1 + $0x100] sm:$0xff]   ;;  %7054 = vmatpush3.bf16.msra.mxu1 %v7829_v12 }
  0x65   : > { %v956_v3 = vshrl.u32 %v772_v59, 16  ;;  %v959_v44 = vshll.u32 %v772_v59, 16  ;;  %v953_v45 = vrot.slane %v951_v56, 5  ;;  %v1287_v48 = vsel %vm8137_vm11, %v1285_v39, %v1286_v57  ;;  %683 = vst [vmem:[#allocation2 + $0x50] sm:$0x1] %v682_v63  ;;  %6950 = vmatpush3.bf16.msra.mxu0 %v7831_v50  ;;  %v7833_v63 = vld [vmem:[%s11012_s1 + $0x198] sm:$0xff]  }
  0x66   : > { %v773_v4 = vld [vmem:[#allocation2 + $0x4c] sm:$0xf]  ;;  %v8405_v6 = vcombine.low %v1284_v38, %v1287_v48  ;;  %v431_v61 = vor.u32 %v429_v42, %v8395_v58  ;;  %v6359_v9 = vrot.slane %v772_v59, 9  ;;  %v437_v10 = vrot.slane %v435_v60, 7  ;;  %v297_v12 = vld [vmem:[%s8095_s12 + $0x44] sm:$0xf] }
  0x67   : > { %v969_v13 = vshrl.u32 %v773_v4, 16  ;;  %v8411_v16 = vcombine.low %v772_v59, %v773_v4  ;;  %v954_v17 = vsel %vm8153_vm13, %v949_v47, %v953_v45  ;;  %v958_v18 = vrot.slane %v956_v3, 4 }
  0x68   : > { %v8415_v21 = vcombine.low %v944_v51, %v954_v17  ;;  %v432_v22 = vsel %vm8109_vm7, %v424_v35, %v431_v61  ;;  %v961_v23 = vrot.slane %v959_v44, 5  ;;  %v965_v24 = vshll.u32 %v773_v4, 16 }
  0x69   : > { %1854 = vmatprep.mubr.bf16.mxu0 %v8411_v16  ;;  %687 = vst.msk [vmem:[#allocation2 + $0x58] sm:$0xf] %vm636_vm0, %v432_v22  ;;  %v971_v26 = vrot.slane %v969_v13, 4  ;;  %v1290_v31 = vrot.slane %v773_v4, 5  ;;  %v440_v32 = vor.u32 %v438_v62, %v437_v10  ;;  %v441_v36 = vrot.slane %v437_v10, 4 }
  0x6a   : > { %2111 = vmatprep.mubr.bf16.mxu1 %v8415_v21  ;;  %1855 = vmatmul.mubr.bf16.gmra.mxu0 %v8405_v6  ;;  %v8426_v35 = vld [vmem:[#allocation2 + $0x54] sm:$0xf]  ;;  %v962_v38 = vor.u32 %v961_v23, %v958_v18  ;;  %v967_v39 = vrot.slane %v965_v24, 5  ;;  %v8428_v40 = vrot.slane %v443_v0, 7  ;;  %v446_v42 = vshll.u32 %v8380_v43, 16  ;;  %v7832_v43 = vld [vmem:[%s11012_s1 + $0x1d8] sm:$0xff]  }
  0x6b   : > { %2112 = vmatmul.mubr.bf16.gmra.mxu1 %v8352_v7  ;;  %v980_v51 = vshrl.u32 %v8426_v35, 16  ;;  %v983_v52 = vshll.u32 %v8426_v35, 16  ;;  %v1291_v53 = vsel %vm8137_vm11, %v6359_v9, %v1290_v31  ;;  %v1292_v54 = vrot.slane %v1290_v31, 4  ;;  %7055 = vmatprep.subr.bf16.mxu1 %v7832_v43 }
  0x6c   : > { %v774_v56 = vld [vmem:[#allocation2 + $0x50] sm:$0x1]  ;;  %v963_v57 = vrot.slane %v962_v38, 4  ;;  %v972_v60 = vor.u32 %v971_v26, %v967_v39  ;;  %v448_v59 = vor.u32 %v446_v42, %v8428_v40  ;;  %v692_v47 = vsel %vm8119_vm8, %v440_v32, %v691_v19  ;;  %7056 = vmatpush3.bf16.msra.mxu1 %v7833_v63  ;;  %v698_v32 = vld [vmem:[#allocation2 + $0x6c] sm:$0xf] }
  0x6d   : > { %v975_v62 = vshll.u32 %v774_v56, 16  ;;  %v1293_v0 = vrot.slane %v774_v56, 5  ;;  %693 = vst [vmem:[#allocation2 + $0x60] sm:$0xf] %v692_v47  ;;  %v433_v1 = vrot.slane %v8395_v58, 4  ;;  %v982_v3 = vrot.slane %v980_v51, 4 }
  0x6e   : > { %v968_v44 = vsel %vm8153_vm13, %v963_v57, %v967_v39  ;;  %v973_v45 = vrot.slane %v972_v60, 4  ;;  %v449_v48 = vsel %vm8109_vm7, %v441_v36, %v448_v59  ;;  %v985_v4 = vrot.slane %v983_v52, 5  ;;  %v7834_v42 = vld [vmem:[%s11012_s1 + $0x1d0] sm:$0xff]   ;;  %v695_v52 = vld [vmem:[#allocation2 + $0x68] sm:$0x1] }
  0x6f   : > { %v977_v61 = vrot.slane %v975_v62, 5  ;;  %v1294_v9 = vsel %vm8137_vm11, %v1292_v54, %v1293_v0  ;;  %694 = vst.msk [vmem:[#allocation2 + $0x64] sm:$0xf] %vm636_vm0, %v449_v48  ;;  %v689_v10 = vsel %vm8146_vm12, %v433_v1, %v688_v49  ;;  %v6360_v58 = vrot.slane %v8426_v35, 9  ;;  %v298_v63 = vld [vmem:[%s8095_s12 + $0x48] sm:$0xf]  ;;  %7057 = vmatprep.subr.bf16.mxu1 %v7834_v42 }
  0x70   : > { %v776_v13 = vld [vmem:[#allocation2 + $0x58] sm:$0xf]  ;;  %v8461_v17 = vcombine.low %v1291_v53, %v1294_v9  ;;  %690 = vst [vmem:[#allocation2 + $0x5c] sm:$0x1] %v689_v10  ;;  %v986_v18 = vor.u32 %v985_v4, %v982_v3  ;;  %v452_v19 = vshrl.u32 %v296_v55, 16  ;;  %v455_v22 = vshll.u32 %v296_v55, 16 }
  0x71   : > { %v993_v23 = vshrl.u32 %v776_v13, 16  ;;  %v8464_v24 = vcombine.low %v8426_v35, %v776_v13  ;;  %v978_v26 = vsel %vm8153_vm13, %v973_v45, %v977_v61  ;;  %v989_v31 = vshll.u32 %v776_v13, 16  ;;  %v7836_v45 = vld [vmem:[%s11012_s1 + $0x190] sm:$0xff]  }
  0x72   : > { %v8468_v36 = vcombine.low %v968_v44, %v978_v26  ;;  %v8470_v37 = vrot.slane %v986_v18, 4  ;;  %v1297_v38 = vrot.slane %v776_v13, 5  ;;  %v454_v39 = vrot.slane %v452_v19, 7  ;;  %7058 = vmatpush3.bf16.msra.mxu1 %v7836_v45 }
  0x73   : > { %1862 = vmatprep.mubr.bf16.mxu0 %v8464_v24  ;;  %v8476_v49 = vrot.slane %v989_v31, 5  ;;  %v995_v35 = vrot.slane %v993_v23, 4  ;;  %v460_v50 = vshrl.u32 %v297_v12, 16  ;;  %v463_v51 = vshll.u32 %v297_v12, 16 }
  0x74   : > { %2119 = vmatprep.mubr.bf16.mxu1 %v8468_v36  ;;  %1863 = vmatmul.mubr.bf16.gmra.mxu0 %v8461_v17  ;;  %v778_v53 = vld [vmem:[#allocation2 + $0x60] sm:$0xf]  ;;  %v1298_v54 = vsel %vm8137_vm11, %v6360_v58, %v1297_v38  ;;  %v1299_v55 = vrot.slane %v1297_v38, 4  ;;  %v457_v43 = vor.u32 %v455_v22, %v454_v39  ;;  %v458_v56 = vrot.slane %v454_v39, 4  ;;  %v7837_v58 = vld [vmem:[%s11012_s1 + $0x1c8] sm:$0xff]  }
  0x75   : > { %2120 = vmatmul.mubr.bf16.gmra.mxu1 %v8411_v16  ;;  %v1004_v57 = vshrl.u32 %v778_v53, 16  ;;  %v1007_v60 = vshll.u32 %v778_v53, 16  ;;  %v992_v59 = vsel %vm8153_vm13, %v8470_v37, %v8476_v49  ;;  %v996_v47 = vor.u32 %v995_v35, %v8476_v49  ;;  %7059 = vmatprep.subr.bf16.mxu1 %v7837_v58  ;;  %v299_v38 = vld [vmem:[%s8095_s12 + $0x4c] sm:$0xf] }
  0x76   : > { %v779_v62 = vld [vmem:[#allocation2 + $0x64] sm:$0xf]  ;;  %v8489_v0 = vrot.slane %v460_v50, 7  ;;  %v699_v1 = vsel %vm8119_vm8, %v457_v43, %v698_v32  ;;  %v450_v3 = vrot.slane %v8428_v40, 4  ;;  %v6361_v44 = vrot.slane %v778_v53, 9 }
  0x77   : > { %v1017_v48 = vshrl.u32 %v779_v62, 16  ;;  %v8497_v4 = vcombine.low %v778_v53, %v779_v62  ;;  %v777_v61 = vld [vmem:[#allocation2 + $0x5c] sm:$0x1]  ;;  %v997_v9 = vrot.slane %v996_v47, 4  ;;  %700 = vst [vmem:[#allocation2 + $0x6c] sm:$0xf] %v699_v1 }
  0x78   : > { %v1006_v10 = vrot.slane %v1004_v57, 4  ;;  %v999_v12 = vshll.u32 %v777_v61, 16  ;;  %v1300_v13 = vrot.slane %v777_v61, 5  ;;  %v465_v40 = vor.u32 %v463_v51, %v8489_v0  ;;  %v705_v51 = vld [vmem:[#allocation2 + $0x78] sm:$0xf]  ;;  %v7838_v53 = vld [vmem:[%s11012_s1 + $0x188] sm:$0xff]  }
  0x79   : > { %v696_v18 = vsel %vm8146_vm12, %v450_v3, %v695_v52  ;;  %1870 = vmatprep.mubr.bf16.mxu0 %v8497_v4  ;;  %v1009_v19 = vrot.slane %v1007_v60, 5  ;;  %v1013_v22 = vshll.u32 %v779_v62, 16  ;;  %v1019_v23 = vrot.slane %v1017_v48, 4  ;;  %v702_v52 = vld [vmem:[#allocation2 + $0x74] sm:$0x1]  ;;  %v7839_v57 = vld [vmem:[%s11012_s1 + $0x1c0] sm:$0xff]   ;;  %7060 = vmatpush3.bf16.msra.mxu1 %v7838_v53 }
  0x7a   : > { %697 = vst [vmem:[#allocation2 + $0x68] sm:$0x1] %v696_v18  ;;  %v1304_v26 = vrot.slane %v779_v62, 5  ;;  %v1001_v31 = vrot.slane %v999_v12, 5  ;;  %v1301_v32 = vsel %vm8137_vm11, %v1299_v55, %v1300_v13  ;;  %v466_v37 = vsel %vm8109_vm7, %v458_v56, %v465_v40  ;;  %v300_v3 = vld [vmem:[%s8095_s12 + $0x50] sm:$0xf]  ;;  %7061 = vmatprep.subr.bf16.mxu1 %v7839_v57 }
  0x7b   : > { %v469_v39 = vshrl.u32 %v298_v63, 16  ;;  %v8511_v42 = vcombine.low %v1298_v54, %v1301_v32  ;;  %701 = vst.msk [vmem:[#allocation2 + $0x70] sm:$0xf] %vm636_vm0, %v466_v37  ;;  %v1010_v49 = vor.u32 %v1009_v19, %v1006_v10  ;;  %v8514_v35 = vrot.slane %v1013_v22, 5  ;;  %v8545_v40 = vld [vmem:[%s11012_s1 + $0x238] sm:$0xff]  }
  0x7c   : > { %v1305_v50 = vsel %vm8137_vm11, %v6361_v44, %v1304_v26  ;;  %v1002_v54 = vsel %vm8153_vm13, %v997_v9, %v1001_v31  ;;  %v1306_v55 = vrot.slane %v1304_v26, 4  ;;  %v472_v56 = vshll.u32 %v298_v63, 16  ;;  %v8532_v44 = vld [vmem:[%s8095_s12 + $0x54] sm:$0xf]  ;;  %7655 = vmatprep.subr.bf16.mxu0 %v8545_v40 }
  0x7d   : > { %v471_v43 = vrot.slane %v469_v39, 7  ;;  %v8526_v60 = vcombine.low %v992_v59, %v1002_v54  ;;  %1871 = vmatmul.mubr.bf16.gmra.mxu0 %v8511_v42  ;;  %v1011_v47 = vrot.slane %v1010_v49, 4  ;;  %v1020_v62 = vor.u32 %v1019_v23, %v8514_v35  ;;  %v7840_v59 = vld [vmem:[%s11012_s1 + $0x180] sm:$0xff]  }
  0x7e   : > { %v477_v1 = vshrl.u32 %v299_v38, 16  ;;  %v781_v45 = vld [vmem:[#allocation2 + $0x6c] sm:$0xf]  ;;  %v480_v63 = vshll.u32 %v299_v38, 16  ;;  %v467_v9 = vrot.slane %v8489_v0, 4  ;;  %7062 = vmatpush3.bf16.msra.mxu1 %v7840_v59  ;;  %v486_v49 = vshrl.u32 %v300_v3, 16 }
  0x7f   : > { %v474_v48 = vor.u32 %v472_v56, %v471_v43  ;;  %v475_v61 = vrot.slane %v471_v43, 4  ;;  %2127 = vmatprep.mubr.bf16.mxu1 %v8526_v60  ;;  %v1028_v10 = vshrl.u32 %v781_v45, 16  ;;  %v1031_v58 = vshll.u32 %v781_v45, 16  ;;  %v709_v59 = vld [vmem:[#allocation2 + $0x80] sm:$0x1] }
  0x80   : > { %v1016_v12 = vsel %vm8153_vm13, %v1011_v47, %v8514_v35  ;;  %v1021_v13 = vrot.slane %v1020_v62, 4  ;;  %2128 = vmatmul.mubr.bf16.gmra.mxu1 %v8464_v24  ;;  %v479_v18 = vrot.slane %v477_v1, 7  ;;  %v703_v22 = vsel %vm8146_vm12, %v467_v9, %v702_v52 }
  0x81   : > { %v780_v0 = vld [vmem:[#allocation2 + $0x68] sm:$0x1]  ;;  %v706_v19 = vsel %vm8119_vm8, %v474_v48, %v705_v51  ;;  %v6362_v23 = vrot.slane %v781_v45, 9  ;;  %704 = vst [vmem:[#allocation2 + $0x74] sm:$0x1] %v703_v22  ;;  %v1030_v32 = vrot.slane %v1028_v10, 4 }
  0x82   : > { %v1023_v26 = vshll.u32 %v780_v0, 16  ;;  %v1307_v31 = vrot.slane %v780_v0, 5  ;;  %707 = vst [vmem:[#allocation2 + $0x78] sm:$0xf] %v706_v19  ;;  %v1033_v37 = vrot.slane %v1031_v58, 5  ;;  %v482_v39 = vor.u32 %v480_v63, %v479_v18 }
  0x83   : > { %v782_v38 = vld [vmem:[#allocation2 + $0x70] sm:$0xf]  ;;  %v489_v35 = vshll.u32 %v300_v3, 16  ;;  %v494_v53 = vshrl.u32 %v8532_v44, 16  ;;  %v488_v48 = vrot.slane %v486_v49, 7  ;;  %vm3198_vm14 = vcmask 1040384  }
  0x84   : > { %v1041_v51 = vshrl.u32 %v782_v38, 16  ;;  %v8554_v54 = vcombine.low %v781_v45, %v782_v38  ;;  %v1025_v52 = vrot.slane %v1023_v26, 5  ;;  %v1308_v43 = vsel %vm8137_vm11, %v1306_v55, %v1307_v31  ;;  %v712_v63 = vld [vmem:[#allocation2 + $0x84] sm:$0xf]  ;;  %v302_v19 = vld [vmem:[%s8095_s12 + $0x58] sm:$0xf]  ;;  %vm9031_vm15 = vmand %vm3198_vm14, %vm312_vm3 }
  0x85   : > { %v8558_v56 = vcombine.low %v1305_v50, %v1308_v43  ;;  %v483_v57 = vsel %vm8109_vm7, %v475_v61, %v482_v39  ;;  %v1034_v47 = vor.u32 %v1033_v37, %v1030_v32  ;;  %v1037_v62 = vshll.u32 %v782_v38, 16  ;;  %v303_v43 = vld [vmem:[%s8095_s12 + $0x5c] sm:$0xf] }
  0x86   : > { %11079 = vst [vmem:[#allocation7_spill] sm:$0xff] %v8554_v54  ;;  %1878 = vmatprep.mubr.bf16.mxu0 %v8554_v54  ;;  %v1026_v1 = vsel %vm8153_vm13, %v1021_v13, %v1025_v52  ;;  %708 = vst.msk [vmem:[#allocation2 + $0x7c] sm:$0xf] %vm636_vm0, %v483_v57  ;;  %v1043_v3 = vrot.slane %v1041_v51, 4  ;;  %v1311_v45 = vrot.slane %v782_v38, 5  ;;  %v8569_v9 = vrot.slane %v494_v53, 7 }
  0x87   : > { %v8566_v55 = vcombine.low %v1016_v12, %v1026_v1  ;;  %1879 = vmatmul.mubr.bf16.gmra.mxu0 %v8558_v56  ;;  %v1035_v50 = vrot.slane %v1034_v47, 4  ;;  %v1039_v61 = vrot.slane %v1037_v62, 5  ;;  %v491_v13 = vor.u32 %v489_v35, %v488_v48 }
  0x88   : > { %v1312_v10 = vsel %vm8137_vm11, %v6362_v23, %v1311_v45  ;;  %v1313_v58 = vrot.slane %v1311_v45, 4  ;;  %v492_v0 = vrot.slane %v488_v48, 4  ;;  %v783_v12 = vld [vmem:[#allocation2 + $0x74] sm:$0x1]  ;;  %v497_v32 = vshll.u32 %v8532_v44, 16 }
  0x89   : > { %2135 = vmatprep.mubr.bf16.mxu1 %v8566_v55  ;;  %v784_v22 = vld [vmem:[#allocation2 + $0x78] sm:$0xf]  ;;  %v1040_v26 = vsel %vm8153_vm13, %v1035_v50, %v1039_v61  ;;  %v1044_v31 = vor.u32 %v1043_v3, %v1039_v61  ;;  %v484_v37 = vrot.slane %v479_v18, 4  ;;  %v1047_v39 = vshll.u32 %v783_v12, 16 }
  0x8a   : > { %2136 = vmatmul.mubr.bf16.gmra.mxu1 %v8497_v4  ;;  %v1052_v38 = vshrl.u32 %v784_v22, 16  ;;  %v1055_v23 = vshll.u32 %v784_v22, 16  ;;  %v1314_v49 = vrot.slane %v783_v12, 5  ;;  %v499_v53 = vor.u32 %v497_v32, %v8569_v9 }
  0x8b   : > { %v1045_v35 = vrot.slane %v1044_v31, 4  ;;  %v713_v51 = vsel %vm8119_vm8, %v491_v13, %v712_v63  ;;  %v710_v52 = vsel %vm8146_vm12, %v484_v37, %v709_v59  ;;  %v1049_v57 = vrot.slane %v1047_v39, 5 }
  0x8c   : > { %v1315_v44 = vsel %vm8137_vm11, %v1313_v58, %v1314_v49  ;;  %714 = vst [vmem:[#allocation2 + $0x84] sm:$0xf] %v713_v51  ;;  %711 = vst [vmem:[#allocation2 + $0x80] sm:$0x1] %v710_v52  ;;  %v1054_v18 = vrot.slane %v1052_v38, 4  ;;  %v1057_v47 = vrot.slane %v1055_v23, 5  ;;  %v500_v3 = vsel %vm8109_vm7, %v492_v0, %v499_v53 }
  0x8d   : > { %v785_v62 = vld [vmem:[#allocation2 + $0x7c] sm:$0xf]  ;;  %v8587_v1 = vcombine.low %v1312_v10, %v1315_v44  ;;  %v6363_v45 = vrot.slane %v784_v22, 9  ;;  %v503_v48 = vshrl.u32 %v302_v19, 16  ;;  %v1050_v61 = vsel %vm8153_vm13, %v1045_v35, %v1049_v57  ;;  %715 = vst.msk [vmem:[#allocation2 + $0x88] sm:$0xf] %vm636_vm0, %v500_v3 }
  0x8e   : > { %v1065_v63 = vshrl.u32 %v785_v62, 16  ;;  %v8591_v50 = vcombine.low %v784_v22, %v785_v62  ;;  %v1058_v59 = vor.u32 %v1057_v47, %v1054_v18  ;;  %v8597_v58 = vld [vmem:[%s8095_s12 + $0x60] sm:$0xf]  ;;  %v8599_v13 = vcombine.low %v1040_v26, %v1050_v61  ;;  %v719_v38 = vld [vmem:[#allocation2 + $0x90] sm:$0xf] }
  0x8f   : > { %11080 = vst [vmem:[#allocation8_spill] sm:$0xff] %v8587_v1  ;;  %v1061_v10 = vshll.u32 %v785_v62, 16  ;;  %v1318_v12 = vrot.slane %v785_v62, 5  ;;  %v505_v31 = vrot.slane %v503_v48, 7  ;;  %v506_v37 = vshll.u32 %v302_v19, 16 }
  0x90   : > { %11081 = vst [vmem:[#allocation9_spill] sm:$0xff] %v8591_v50  ;;  %1886 = vmatprep.mubr.bf16.mxu0 %v8591_v50  ;;  %v1059_v0 = vrot.slane %v1058_v59, 4  ;;  %v1067_v32 = vrot.slane %v1065_v63, 4  ;;  %v511_v22 = vshrl.u32 %v303_v43, 16  ;;  %v716_v23 = vld [vmem:[#allocation2 + $0x8c] sm:$0x1]  ;;  %2143 = vmatprep.mubr.bf16.mxu1 %v8599_v13 }
  0x91   : > { %1887 = vmatmul.mubr.bf16.gmra.mxu0 %v8587_v1  ;;  %v1063_v39 = vrot.slane %v1061_v10, 5  ;;  %v1319_v26 = vsel %vm8137_vm11, %v6363_v45, %v1318_v12  ;;  %v1320_v49 = vrot.slane %v1318_v12, 4  ;;  %v509_v35 = vrot.slane %v505_v31, 4  ;;  %v744_v1 = vld [vmem:[#allocation2 + $0xbc] sm:$0x1] }
  0x92   : > { %2144 = vmatmul.mubr.bf16.gmra.mxu1 %v8554_v54  ;;  %v508_v53 = vor.u32 %v506_v37, %v505_v31  ;;  %v513_v51 = vrot.slane %v511_v22, 7  ;;  %v514_v52 = vshll.u32 %v303_v43, 16  ;;  %v501_v19 = vrot.slane %v8569_v9, 4  ;;  %v305_v31 = vld [vmem:[%s8095_s12 + $0x64] sm:$0xf] }
  0x93   : > { %v787_v57 = vld [vmem:[#allocation2 + $0x84] sm:$0xf]  ;;  %v786_v44 = vld [vmem:[#allocation2 + $0x80] sm:$0x1]  ;;  %v1064_v18 = vsel %vm8153_vm13, %v1059_v0, %v1063_v39  ;;  %v1068_v47 = vor.u32 %v1067_v32, %v1063_v39  ;;  %v520_v62 = vshrl.u32 %v8597_v58, 16  ;;  %v523_v3 = vshll.u32 %v8597_v58, 16 }
  0x94   : > { %v1076_v45 = vshrl.u32 %v787_v57, 16  ;;  %v1079_v48 = vshll.u32 %v787_v57, 16  ;;  %v1071_v63 = vshll.u32 %v786_v44, 16  ;;  %v1321_v61 = vrot.slane %v786_v44, 5  ;;  %v788_v59 = vld [vmem:[#allocation2 + $0x88] sm:$0xf] }
  0x95   : > { %v1069_v10 = vrot.slane %v1068_v47, 4  ;;  %v516_v43 = vor.u32 %v514_v52, %v513_v51  ;;  %v720_v9 = vsel %vm8119_vm8, %v508_v53, %v719_v38  ;;  %v717_v12 = vsel %vm8146_vm12, %v501_v19, %v716_v23  ;;  %v723_v52 = vld [vmem:[#allocation2 + $0x98] sm:$0x1]  ;;  %v726_v47 = vld [vmem:[#allocation2 + $0x9c] sm:$0xf] }
  0x96   : > { %v1089_v0 = vshrl.u32 %v788_v59, 16  ;;  %v8617_v32 = vcombine.low %v787_v57, %v788_v59  ;;  %v1073_v37 = vrot.slane %v1071_v63, 5  ;;  %v1322_v58 = vsel %vm8137_vm11, %v1320_v49, %v1321_v61  ;;  %721 = vst [vmem:[#allocation2 + $0x90] sm:$0xf] %v720_v9  ;;  %718 = vst [vmem:[#allocation2 + $0x8c] sm:$0x1] %v717_v12 }
  0x97   : > { %v8621_v22 = vcombine.low %v1319_v26, %v1322_v58  ;;  %v517_v39 = vsel %vm8109_vm7, %v509_v35, %v516_v43  ;;  %v1078_v38 = vrot.slane %v1076_v45, 4  ;;  %v1081_v53 = vrot.slane %v1079_v48, 5  ;;  %v306_v63 = vld [vmem:[%s8095_s12 + $0x68] sm:$0xf] }
  0x98   : > { %11082 = vst [vmem:[#allocation10_spill] sm:$0xff] %v8617_v32  ;;  %1894 = vmatprep.mubr.bf16.mxu0 %v8617_v32  ;;  %v1074_v23 = vsel %vm8153_vm13, %v1069_v10, %v1073_v37  ;;  %722 = vst.msk [vmem:[#allocation2 + $0x94] sm:$0xf] %vm636_vm0, %v517_v39  ;;  %v1085_v19 = vshll.u32 %v788_v59, 16  ;;  %v1091_v44 = vrot.slane %v1089_v0, 4  ;;  %v6364_v49 = vrot.slane %v787_v57, 9 }
  0x99   : > { %11083 = vst [vmem:[#allocation11_spill] sm:$0xff] %v8621_v22  ;;  %v8630_v26 = vcombine.low %v1064_v18, %v1074_v23  ;;  %1895 = vmatmul.mubr.bf16.gmra.mxu0 %v8621_v22  ;;  %v1082_v35 = vor.u32 %v1081_v53, %v1078_v38  ;;  %v1325_v45 = vrot.slane %v788_v59, 5  ;;  %v522_v48 = vrot.slane %v520_v62, 7 }
  0x9a   : > { %v1087_v61 = vrot.slane %v1085_v19, 5  ;;  %v528_v43 = vshrl.u32 %v305_v31, 16  ;;  %v531_v9 = vshll.u32 %v305_v31, 16  ;;  %v518_v12 = vrot.slane %v513_v51, 4 }
  0x9b   : > { %11084 = vst [vmem:[#allocation12_spill] sm:$0xff] %v8630_v26  ;;  %2151 = vmatprep.mubr.bf16.mxu1 %v8630_v26  ;;  %v1083_v10 = vrot.slane %v1082_v35, 4  ;;  %v1326_v0 = vsel %vm8137_vm11, %v6364_v49, %v1325_v45  ;;  %v1327_v57 = vrot.slane %v1325_v45, 4  ;;  %v525_v37 = vor.u32 %v523_v3, %v522_v48 }
  0x9c   : > { %2152 = vmatmul.mubr.bf16.gmra.mxu1 %v8591_v50  ;;  %v1092_v18 = vor.u32 %v1091_v44, %v1087_v61  ;;  %v526_v58 = vrot.slane %v522_v48, 4  ;;  %v8637_v39 = vrot.slane %v528_v43, 7  ;;  %v724_v62 = vsel %vm8146_vm12, %v518_v12, %v723_v52  ;;  %v307_v43 = vld [vmem:[%s8095_s12 + $0x6c] sm:$0xf] }
  0x9d   : > { %v790_v59 = vld [vmem:[#allocation2 + $0x90] sm:$0xf]  ;;  %v789_v51 = vld [vmem:[#allocation2 + $0x8c] sm:$0x1]  ;;  %v1088_v31 = vsel %vm8153_vm13, %v1083_v10, %v1087_v61  ;;  %v727_v38 = vsel %vm8119_vm8, %v525_v37, %v726_v47  ;;  %725 = vst [vmem:[#allocation2 + $0x98] sm:$0x1] %v724_v62 }
  0x9e   : > { %v537_v3 = vshrl.u32 %v306_v63, 16  ;;  %v540_v53 = vshll.u32 %v306_v63, 16  ;;  %v1100_v23 = vshrl.u32 %v790_v59, 16  ;;  %v1103_v19 = vshll.u32 %v790_v59, 16  ;;  %728 = vst [vmem:[#allocation2 + $0x9c] sm:$0xf] %v727_v38 }
  0x9f   : > { %v1093_v44 = vrot.slane %v1092_v18, 4  ;;  %v1095_v49 = vshll.u32 %v789_v51, 16  ;;  %v791_v35 = vld [vmem:[#allocation2 + $0x94] sm:$0xf]  ;;  %v1328_v45 = vrot.slane %v789_v51, 5  ;;  %v533_v52 = vor.u32 %v531_v9, %v8637_v39 }
  0xa0   : > { %v6365_v48 = vrot.slane %v790_v59, 9  ;;  %v539_v12 = vrot.slane %v537_v3, 7  ;;  %v1113_v50 = vshrl.u32 %v791_v35, 16  ;;  %v8647_v61 = vcombine.low %v790_v59, %v791_v35 }
  0xa1   : > { %v1097_v10 = vrot.slane %v1095_v49, 5  ;;  %v1102_v47 = vrot.slane %v1100_v23, 4  ;;  %v1329_v63 = vsel %vm8137_vm11, %v1327_v57, %v1328_v45  ;;  %v534_v37 = vsel %vm8109_vm7, %v526_v58, %v533_v52  ;;  %v733_v45 = vld [vmem:[#allocation2 + $0xa8] sm:$0xf] }
  0xa2   : > { %11085 = vst [vmem:[#allocation13_spill] sm:$0xff] %v8647_v61  ;;  %v1105_v18 = vrot.slane %v1103_v19, 5  ;;  %v1109_v62 = vshll.u32 %v791_v35, 16  ;;  %1902 = vmatprep.mubr.bf16.mxu0 %v8647_v61  ;;  %v8656_v51 = vcombine.low %v1326_v0, %v1329_v63  ;;  %729 = vst.msk [vmem:[#allocation2 + $0xa0] sm:$0xf] %vm636_vm0, %v534_v37  ;;  %v1115_v59 = vrot.slane %v1113_v50, 4 }
  0xa3   : > { %v1098_v9 = vsel %vm8153_vm13, %v1093_v44, %v1097_v10  ;;  %v1332_v38 = vrot.slane %v791_v35, 5  ;;  %v542_v49 = vor.u32 %v540_v53, %v539_v12  ;;  %v543_v44 = vrot.slane %v539_v12, 4 }
  0xa4   : > { %11086 = vst [vmem:[#allocation14_spill] sm:$0xff] %v8656_v51  ;;  %v8659_v3 = vcombine.low %v1088_v31, %v1098_v9  ;;  %v1106_v23 = vor.u32 %v1105_v18, %v1102_v47  ;;  %v1111_v57 = vrot.slane %v1109_v62, 5  ;;  %1903 = vmatmul.mubr.bf16.gmra.mxu0 %v8656_v51  ;;  %v792_v58 = vld [vmem:[#allocation2 + $0x98] sm:$0x1]  ;;  %v545_v0 = vshrl.u32 %v307_v43, 16 }
  0xa5   : > { %v1333_v19 = vsel %vm8137_vm11, %v6365_v48, %v1332_v38  ;;  %v1334_v52 = vrot.slane %v1332_v38, 4  ;;  %v793_v50 = vld [vmem:[#allocation2 + $0x9c] sm:$0xf]  ;;  %v1119_v10 = vshll.u32 %v792_v58, 16  ;;  %v1335_v47 = vrot.slane %v792_v58, 5 }
  0xa6   : > { %11087 = vst [vmem:[#allocation15_spill] sm:$0xff] %v8659_v3  ;;  %2159 = vmatprep.mubr.bf16.mxu1 %v8659_v3  ;;  %v1107_v31 = vrot.slane %v1106_v23, 4  ;;  %v1116_v35 = vor.u32 %v1115_v59, %v1111_v57  ;;  %v1124_v53 = vshrl.u32 %v793_v50, 16  ;;  %v1127_v63 = vshll.u32 %v793_v50, 16  ;;  %v730_v62 = vld [vmem:[#allocation2 + $0xa4] sm:$0x1] }
  0xa7   : > { %2160 = vmatmul.mubr.bf16.gmra.mxu1 %v8617_v32  ;;  %v547_v37 = vrot.slane %v545_v0, 7  ;;  %v548_v18 = vshll.u32 %v307_v43, 16  ;;  %v1121_v9 = vrot.slane %v1119_v10, 5  ;;  %v1336_v38 = vsel %vm8137_vm11, %v1334_v52, %v1335_v47  ;;  %v308_v51 = vld [vmem:[%s8095_s12 + $0x70] sm:$0xf] }
  0xa8   : > { %v1112_v48 = vsel %vm8153_vm13, %v1107_v31, %v1111_v57  ;;  %v1117_v12 = vrot.slane %v1116_v35, 4  ;;  %v309_v59 = vld [vmem:[%s8095_s12 + $0x74] sm:$0xf]  ;;  %v8672_v23 = vcombine.low %v1333_v19, %v1336_v38  ;;  %v734_v32 = vsel %vm8119_vm8, %v542_v49, %v733_v45 }
  0xa9   : > { %v550_v58 = vor.u32 %v548_v18, %v547_v37  ;;  %v535_v43 = vrot.slane %v8637_v39, 4  ;;  %v794_v0 = vld [vmem:[#allocation2 + $0xa0] sm:$0xf]  ;;  %735 = vst [vmem:[#allocation2 + $0xa8] sm:$0xf] %v734_v32  ;;  %v1126_v31 = vrot.slane %v1124_v53, 4 }
  0xaa   : > { %11088 = vst [vmem:[#allocation16_spill] sm:$0xff] %v8672_v23  ;;  %v1122_v57 = vsel %vm8153_vm13, %v1117_v12, %v1121_v9  ;;  %v1129_v35 = vrot.slane %v1127_v63, 5  ;;  %v6366_v10 = vrot.slane %v793_v50, 9  ;;  %v1137_v52 = vshrl.u32 %v794_v0, 16  ;;  %v310_v18 = vld [vmem:[%s8095_s12 + $0x78] sm:$0xf] }
  0xab   : > { %v8679_v47 = vcombine.low %v793_v50, %v794_v0  ;;  %v8681_v3 = vcombine.low %v1112_v48, %v1122_v57  ;;  %v551_v19 = vsel %vm8109_vm7, %v543_v44, %v550_v58  ;;  %v731_v39 = vsel %vm8146_vm12, %v535_v43, %v730_v62  ;;  %v737_v53 = vld [vmem:[#allocation2 + $0xb0] sm:$0x1]  ;;  %v740_v62 = vld [vmem:[#allocation2 + $0xb4] sm:$0xf]  ;;  %v8693_v58 = vld [vmem:[%s8095_s12 + $0x7c] sm:$0xf] }
  0xac   : > { %736 = vst.msk [vmem:[#allocation2 + $0xac] sm:$0xf] %vm636_vm0, %v551_v19  ;;  %v1130_v49 = vor.u32 %v1129_v35, %v1126_v31  ;;  %v1133_v32 = vshll.u32 %v794_v0, 16  ;;  %v1339_v45 = vrot.slane %v794_v0, 5  ;;  %732 = vst [vmem:[#allocation2 + $0xa4] sm:$0x1] %v731_v39 }
  0xad   : > { %11089 = vst [vmem:[#allocation17_spill] sm:$0xff] %v8681_v3  ;;  %1910 = vmatprep.mubr.bf16.mxu0 %v8679_v47  ;;  %2167 = vmatprep.mubr.bf16.mxu1 %v8681_v3  ;;  %v1139_v50 = vrot.slane %v1137_v52, 4  ;;  %v554_v63 = vshrl.u32 %v308_v51, 16  ;;  %v557_v48 = vshll.u32 %v308_v51, 16  ;;  %v562_v44 = vshrl.u32 %v309_v59, 16 }
  0xae   : > { %1911 = vmatmul.mubr.bf16.gmra.mxu0 %v8672_v23  ;;  %v1131_v12 = vrot.slane %v1130_v49, 4  ;;  %v1135_v9 = vrot.slane %v1133_v32, 5  ;;  %v1341_v38 = vrot.slane %v1339_v45, 4  ;;  %v565_v57 = vshll.u32 %v309_v59, 16 }
  0xaf   : > { %2168 = vmatmul.mubr.bf16.gmra.mxu1 %v8647_v61  ;;  %v556_v43 = vrot.slane %v554_v63, 7  ;;  %v8696_v0 = vrot.slane %v562_v44, 7  ;;  %v552_v31 = vrot.slane %v547_v37, 4  ;;  %v1340_v51 = vsel %vm8137_vm11, %v6366_v10, %v1339_v45 }
  0xb0   : > { %v1140_v35 = vor.u32 %v1139_v50, %v1135_v9  ;;  %v571_v52 = vshrl.u32 %v310_v18, 16  ;;  %v574_v19 = vshll.u32 %v310_v18, 16  ;;  %v796_v39 = vld [vmem:[#allocation2 + $0xa8] sm:$0xf]  ;;  %v579_v45 = vshrl.u32 %v8693_v58, 16 }
  0xb1   : > { %v559_v49 = vor.u32 %v557_v48, %v556_v43  ;;  %v560_v32 = vrot.slane %v556_v43, 4  ;;  %v567_v23 = vor.u32 %v565_v57, %v8696_v0  ;;  %v738_v3 = vsel %vm8146_vm12, %v552_v31, %v737_v53 }
  0xb2   : > { %v1148_v61 = vshrl.u32 %v796_v39, 16  ;;  %v1151_v63 = vshll.u32 %v796_v39, 16  ;;  %v1141_v44 = vrot.slane %v1140_v35, 4  ;;  %739 = vst [vmem:[#allocation2 + $0xb0] sm:$0x1] %v738_v3  ;;  %v6367_v59 = vrot.slane %v796_v39, 9 }
  0xb3   : > { %v797_v37 = vld [vmem:[#allocation2 + $0xac] sm:$0xf]  ;;  %v568_v50 = vsel %vm8109_vm7, %v560_v32, %v567_v23  ;;  %v741_v10 = vsel %vm8119_vm8, %v559_v49, %v740_v62  ;;  %v573_v18 = vrot.slane %v571_v52, 7  ;;  %v795_v57 = vld [vmem:[#allocation2 + $0xa4] sm:$0x1]  ;;  %v569_v46 = vrot.slane %v8696_v0, 4 }
  0xb4   : > { %v1161_v48 = vshrl.u32 %v797_v37, 16  ;;  %v8708_v43 = vcombine.low %v796_v39, %v797_v37  ;;  %742 = vst [vmem:[#allocation2 + $0xb4] sm:$0xf] %v741_v10  ;;  %743 = vst.msk [vmem:[#allocation2 + $0xb8] sm:$0xf] %vm636_vm0, %v568_v50  ;;  %v1150_v53 = vrot.slane %v1148_v61, 4  ;;  %v1136_v39 = vsel %vm8153_vm13, %v1131_v12, %v1135_v9 }
  0xb5   : > { %v1153_v3 = vrot.slane %v1151_v63, 5  ;;  %v1143_v31 = vshll.u32 %v795_v57, 16  ;;  %v1342_v35 = vrot.slane %v795_v57, 5  ;;  %v1157_v22 = vshll.u32 %v797_v37, 16  ;;  %v747_v32 = vld [vmem:[#allocation2 + $0xc0] sm:$0xf] }
  0xb6   : > { %v1346_v26 = vrot.slane %v797_v37, 5  ;;  %1918 = vmatprep.mubr.bf16.mxu0 %v8708_v43  ;;  %v1163_v62 = vrot.slane %v1161_v48, 4  ;;  %v576_v52 = vor.u32 %v574_v19, %v573_v18  ;;  %v577_v49 = vrot.slane %v573_v18, 4 }
  0xb7   : > { %v1154_v23 = vor.u32 %v1153_v3, %v1150_v53  ;;  %v1145_v54 = vrot.slane %v1143_v31, 5  ;;  %v1343_v50 = vsel %vm8137_vm11, %v1341_v38, %v1342_v35  ;;  %v1159_v61 = vrot.slane %v1157_v22, 5 }
  0xb8   : > { %v8716_v63 = vcombine.low %v1340_v51, %v1343_v50  ;;  %v1348_v57 = vrot.slane %v1346_v26, 4  ;;  %v581_v37 = vrot.slane %v579_v45, 7  ;;  %v582_v53 = vshll.u32 %v8693_v58, 16 }
  0xb9   : > { %v1155_v10 = vrot.slane %v1154_v23, 4  ;;  %v1146_v48 = vsel %vm8153_vm13, %v1141_v44, %v1145_v54  ;;  %v798_v19 = vld [vmem:[#allocation2 + $0xb0] sm:$0x1]  ;;  %v1164_v18 = vor.u32 %v1163_v62, %v1159_v61  ;;  %v748_v12 = vsel %vm8119_vm8, %v576_v52, %v747_v32 }
  0xba   : > { %v8723_v9 = vcombine.low %v1136_v39, %v1146_v48  ;;  %1919 = vmatmul.mubr.bf16.gmra.mxu0 %v8716_v63  ;;  %v1167_v22 = vshll.u32 %v798_v19, 16  ;;  %v1347_v38 = vsel %vm8137_vm11, %v6367_v59, %v1346_v26  ;;  %v1349_v51 = vrot.slane %v798_v19, 5  ;;  %749 = vst [vmem:[#allocation2 + $0xc0] sm:$0xf] %v748_v12  ;;  %v751_v19 = vld [vmem:[#allocation2 + $0xc8] sm:$0x1] }
  0xbb   : > { %v799_v45 = vld [vmem:[#allocation2 + $0xb4] sm:$0xf]  ;;  %v800_v3 = vld [vmem:[#allocation2 + $0xb8] sm:$0xf]  ;;  %v1160_v54 = vsel %vm8153_vm13, %v1155_v10, %v1159_v61  ;;  %v1165_v44 = vrot.slane %v1164_v18, 4  ;;  %v584_v58 = vor.u32 %v582_v53, %v581_v37  ;;  %v745_v32 = vsel %vm8146_vm12, %v569_v46, %v744_v1 }
  0xbc   : > { %2175 = vmatprep.mubr.bf16.mxu1 %v8723_v9  ;;  %v1172_v31 = vshrl.u32 %v799_v45, 16  ;;  %v1175_v35 = vshll.u32 %v799_v45, 16  ;;  %v1185_v23 = vshrl.u32 %v800_v3, 16  ;;  %v8732_v62 = vcombine.low %v799_v45, %v800_v3  ;;  %746 = vst [vmem:[#allocation2 + $0xbc] sm:$0x1] %v745_v32 }
  0xbd   : > { %2176 = vmatmul.mubr.bf16.gmra.mxu1 %v8679_v47  ;;  %v1169_v26 = vrot.slane %v1167_v22, 5  ;;  %v1350_v59 = vsel %vm8137_vm11, %v1348_v57, %v1349_v51  ;;  %v585_v52 = vsel %vm8109_vm7, %v577_v49, %v584_v58  ;;  %v1181_v61 = vshll.u32 %v800_v3, 16 }
  0xbe   : > { %1926 = vmatprep.mubr.bf16.mxu0 %v8732_v62  ;;  %v8742_v0 = vcombine.low %v1347_v38, %v1350_v59  ;;  %750 = vst.msk [vmem:[#allocation2 + $0xc4] sm:$0xf] %vm636_vm0, %v585_v52  ;;  %v1174_v39 = vrot.slane %v1172_v31, 4  ;;  %v1177_v50 = vrot.slane %v1175_v35, 5  ;;  %v1187_v57 = vrot.slane %v1185_v23, 4  ;;  %vm9062_vm0 = vmand %vm3198_vm14, %vm637_vm5 }
  0xbf   : > { %v1170_v10 = vsel %vm8153_vm13, %v1165_v44, %v1169_v26  ;;  %v1353_v48 = vrot.slane %v800_v3, 5  ;;  %v1183_v1 = vrot.slane %v1181_v61, 5  ;;  %v586_v53 = vrot.slane %v581_v37, 4 }
  0xc0   : > { %v8747_v49 = vcombine.low %v1160_v54, %v1170_v10  ;;  %v1178_v18 = vor.u32 %v1177_v50, %v1174_v39  ;;  %v6368_v22 = vrot.slane %v799_v45, 9  ;;  %vm3713_vm1 = vcmask 1043456  }
  0xc1   : > { %v802_v12 = vld [vmem:[#allocation2 + $0xc0] sm:$0xf]  ;;  %v1188_v58 = vor.u32 %v1187_v57, %v1183_v1  ;;  %v752_v44 = vsel %vm8146_vm12, %v586_v53, %v751_v19  ;;  %v1355_v3 = vrot.slane %v1353_v48, 4  ;;  %vm9559_vm2 = vmand %vm3713_vm1, %vm637_vm5 }
  0xc2   : > { %2183 = vmatprep.mubr.bf16.mxu1 %v8747_v49  ;;  %1927 = vmatmul.mubr.bf16.gmra.mxu0 %v8742_v0  ;;  %v1359_v38 = vshrl.u32 %v802_v12, 16  ;;  %v1362_v51 = vshll.u32 %v802_v12, 16  ;;  %v1179_v46 = vrot.slane %v1178_v18, 4  ;;  %753 = vst [vmem:[#allocation2 + $0xc8] sm:$0x1] %v752_v44  ;;  %v1354_v23 = vsel %vm8137_vm11, %v6368_v22, %v1353_v48 }
  0xc3   : > { %v801_v35 = vld [vmem:[#allocation2 + $0xbc] sm:$0x1]  ;;  %v1189_v45 = vrot.slane %v1188_v58, 4  ;;  %v6369_v50 = vrot.slane %v802_v12, 9 }
  0xc4   : > { %v1361_v54 = vrot.slane %v1359_v38, 4  ;;  %v1364_v31 = vrot.slane %v1362_v51, 5  ;;  %v1191_v52 = vshll.u32 %v801_v35, 16  ;;  %v1356_v32 = vrot.slane %v801_v35, 5 }
  0xc5   : > { %2184 = vmatmul.mubr.bf16.gmra.mxu1 %v8708_v43  ;;  %v803_v37 = vld [vmem:[#allocation2 + $0xc4] sm:$0xf]  ;;  %v1184_v10 = vsel %vm8153_vm13, %v1179_v46, %v1183_v1 }
  0xc6   : > { %v1372_v26 = vshrl.u32 %v803_v37, 16  ;;  %v8756_v59 = vcombine.low %v802_v12, %v803_v37  ;;  %v1365_v8 = vor.u32 %v1364_v31, %v1361_v54  ;;  %v1368_v39 = vshll.u32 %v803_v37, 16 }
  0xc7   : > { %v1387_v61 = vrot.slane %v803_v37, 5  ;;  %v1193_v57 = vrot.slane %v1191_v52, 5  ;;  %v1357_v19 = vsel %vm8137_vm11, %v1355_v3, %v1356_v32  ;;  %v7843_v52 = vld [vmem:[%s11012_s1 + $0x228] sm:$0xff]   ;;  %v7844_v32 = vld [vmem:[%s11012_s1 + $0x220] sm:$0xff]  }
  0xc8   : > { %1934 = vmatprep.mubr.bf16.mxu0 %v8756_v59  ;;  %v1374_v18 = vrot.slane %v1372_v26, 4  ;;  %v8763_v48 = vcombine.low %v1354_v23, %v1357_v19  ;;  %v1366_v53 = vrot.slane %v1365_v8, 4  ;;  %v1370_v22 = vrot.slane %v1368_v39, 5 }
  0xc9   : > { %v1388_v38 = vsel %vm8137_vm11, %v6369_v50, %v1387_v61  ;;  %v1194_v12 = vsel %vm8153_vm13, %v1189_v45, %v1193_v57  ;;  %v1389_v51 = vrot.slane %v1387_v61, 4  ;;  %v804_v1 = vld [vmem:[#allocation2 + $0xc8] sm:$0x1] }
  0xca   : > { %v8769_v58 = vcombine.low %v1184_v10, %v1194_v12  ;;  %1935 = vmatmul.mubr.bf16.gmra.mxu0 %v8763_v48  ;;  %v1371_v44 = vsel %vm8153_vm13, %v1366_v53, %v1370_v22  ;;  %v1375_v46 = vor.u32 %v1374_v18, %v1370_v22  ;;  %v1378_v3 = vshll.u32 %v804_v1, 16  ;;  %v8839_v18 = vld [vmem:[#allocation2 + $0xd0] sm:$0xf]  ;;  %v8841_v53 = vld [vmem:[#allocation2 + $0xd4] sm:$0x1] }
  0xcb   : > { %2368 = vmatprep.mubr.bf16.mxu0 %v8212_v25  ;;  %v1390_v54 = vrot.slane %v804_v1, 5  ;;  %v7842_v25 = vld [vmem:[%s11012_s1 + $0x230] sm:$0xff]   ;;  %v1424_v22 = vrot.slane %v8841_v53, 5 }
  0xcc   : > { %2191 = vmatprep.mubr.bf16.mxu1 %v8769_v58  ;;  %v1376_v31 = vrot.slane %v1375_v46, 4  ;;  %v1380_v37 = vrot.slane %v1378_v3, 5 }
  0xcd   : > { %2192 = vmatmul.mubr.bf16.gmra.mxu1 %v8732_v62  ;;  %v1391_v35 = vsel %vm8137_vm11, %v1389_v51, %v1390_v54  ;;  %v8846_v51 = vld [vmem:[#allocation2 + $0xcc] sm:$0xf] }
  0xce   : > { %2697 = vmatprep.mubr.bf16.mxu1 %v8275_v30  ;;  %v8780_v45 = vcombine.low %v1388_v38, %v1391_v35  ;;  %v1381_v23 = vsel %vm8153_vm13, %v1376_v31, %v1380_v37 }
  0xcf   : > { %v8787_v26 = vcombine.low %v1371_v44, %v1381_v23  ;;  %v6370_v44 = vrot.slane %v8846_v51, 9  ;;  %v11090_v23 = vld [vmem:[#allocation8_spill] sm:$0xff] }
  0xd2   : > { %2369 = vmatmul.mubr.bf16.vlgmr.msra.gmra.mxu0 %v8220_v34  ;;  %v7845_v34 = vld [vmem:[%s11012_s1 + $0x218] sm:$0xff]  }
  0xd3   : > { %7656 = vmatpush3.bf16.msra.mxu0 %v8545_v40  ;;  %2376 = vmatprep.mubr.bf16.mxu0 %v8266_v20 }
  0xd4   : > { %7657 = vmatprep.subr.bf16.mxu0 %v7842_v25 }
  0xd5   : > { %2698 = vmatmul.mubr.bf16.vlgmr.msra.gmra.mxu1 %v8218_v33  ;;  %v7846_v33 = vld [vmem:[%s11012_s1 + $0x210] sm:$0xff]  }
  0xd6   : > { %2705 = vmatprep.mubr.bf16.mxu1 %v8325_v28 }
  0xd7   : > { %7658 = vmatpush3.bf16.msra.mxu0 %v7842_v25 }
  0xd8   : > { %7659 = vmatprep.subr.bf16.mxu0 %v7843_v52 }
  0xda   : > { %2377 = vmatmul.mubr.bf16.gmra.mxu0 %v8275_v30  ;;  %v7847_v30 = vld [vmem:[%s11012_s1 + $0x208] sm:$0xff]  }
  0xdb   : > { %2384 = vmatprep.mubr.bf16.mxu0 %v8314_v14  ;;  %7660 = vmatpush3.bf16.msra.mxu0 %v7843_v52 }
  0xdc   : > { %7661 = vmatprep.subr.bf16.mxu0 %v7844_v32 }
  0xdd   : > { %2706 = vmatmul.mubr.bf16.gmra.mxu1 %v8271_v27  ;;  %v7848_v27 = vld [vmem:[%s11012_s1 + $0x200] sm:$0xff]  }
  0xde   : > { %2713 = vmatprep.mubr.bf16.mxu1 %v8369_v29 }
  0xdf   : > { %7662 = vmatpush3.bf16.msra.mxu0 %v7844_v32 }
  0xe0   : > { %7663 = vmatprep.subr.bf16.mxu0 %v7845_v34 }
  0xe2   : > { %2385 = vmatmul.mubr.bf16.gmra.mxu0 %v8325_v28 }
  0xe3   : > { %2392 = vmatprep.mubr.bf16.mxu0 %v8356_v11  ;;  %7664 = vmatpush3.bf16.msra.mxu0 %v7845_v34 }
  0xe4   : > { %7665 = vmatprep.subr.bf16.mxu0 %v7846_v33 }
  0xe5   : > { %2714 = vmatmul.mubr.bf16.gmra.mxu1 %v8300_v5 }
  0xe6   : > { %2721 = vmatprep.mubr.bf16.mxu1 %v8415_v21 }
  0xe7   : > { %7666 = vmatpush3.bf16.msra.mxu0 %v7846_v33 }
  0xe8   : > { %7667 = vmatprep.subr.bf16.mxu0 %v7847_v30 }
  0xea   : > { %2393 = vmatmul.mubr.bf16.gmra.mxu0 %v8369_v29 }
  0xeb   : > { %2400 = vmatprep.mubr.bf16.mxu0 %v8405_v6  ;;  %7668 = vmatpush3.bf16.msra.mxu0 %v7847_v30  ;;  %v11092_v30 = vld [vmem:[#allocation12_spill] sm:$0xff] }
  0xec   : > { %7669 = vmatprep.subr.bf16.mxu0 %v7848_v27 }
  0xed   : > { %2722 = vmatmul.mubr.bf16.gmra.mxu1 %v8352_v7 }
  0xee   : > { %2729 = vmatprep.mubr.bf16.mxu1 %v8468_v36 }
  0xef   : > { %7670 = vmatpush3.bf16.msra.mxu0 %v7848_v27 }
  0xf2   : > { %2401 = vmatmul.mubr.bf16.gmra.mxu0 %v8415_v21 }
  0xf3   : > { %2408 = vmatprep.mubr.bf16.mxu0 %v8461_v17 }
  0xf5   : > { %2730 = vmatmul.mubr.bf16.gmra.mxu1 %v8411_v16 }
  0xf6   : > { %2737 = vmatprep.mubr.bf16.mxu1 %v8526_v60 }
  0xf9   : > { %v6839_v5 = vpop.f32.mrf.mxu1 }
  0xfa   : > { %2409 = vmatmul.mubr.bf16.gmra.mxu0 %v8468_v36  ;;  %v6727_v28 = vpop.f32.mrf.mxu0 }
  0xfb   : > { %2416 = vmatprep.mubr.bf16.mxu0 %v8511_v42  ;;  %v6840_v29 = vpop.f32.mrf.mxu1 }
  0xfc   : > { %v6841_v7 = vadd.f32 %v6840_v29, %v6839_v5  ;;  %v6728_v40 = vpop.f32.mrf.mxu0 }
  0xfd   : > { %2738 = vmatmul.mubr.bf16.gmra.mxu1 %v8464_v24  ;;  %v6842_v21 = vpop.f32.mrf.mxu1  ;;  %v6729_v8 = vadd.f32 %v6728_v40, %v6727_v28 }
  0xfe   : > { %2745 = vmatprep.mubr.bf16.mxu1 %v8566_v55  ;;  %v6730_v39 = vpop.f32.mrf.mxu0 }
  0xff   : > { %v6843_v50 = vpop.f32.mrf.mxu1  ;;  %v8832_v16 = vadd.f32 %v6841_v7, %v6729_v8 }
 0x100   : > { %v6844_v61 = vadd.f32 %v6843_v50, %v6842_v21  ;;  %v6731_v36 = vpop.f32.mrf.mxu0  ;;  %v11093_v21 = vld [vmem:[#allocation11_spill] sm:$0xff] }
 0x101   : > { %v6732_v10 = vadd.f32 %v6731_v36, %v6730_v39 }
 0x102   : > { %2417 = vmatmul.mubr.bf16.gmra.mxu0 %v8526_v60  ;;  %v1421_v60 = vrot.slane %v8839_v18, 5 }
 0x103   : > { %2424 = vmatprep.mubr.bf16.mxu0 %v8558_v56  ;;  %v8837_v24 = vadd.f32 %v6844_v61, %v6732_v10  ;;  %v11094_v61 = vld [vmem:[#allocation9_spill] sm:$0xff] }
 0x104   : > { %v6733_v57 = vpop.f32.mrf.mxu0  ;;  %v6845_v19 = vpop.f32.mrf.mxu1  ;;  %v1423_v46 = vrot.slane %v1421_v60, 4  ;;  %v8854_v37 = vsel %vm8137_vm11, %v6370_v44, %v1421_v60  ;;  %v11096_v44 = vld [vmem:[#allocation14_spill] sm:$0xff] }
 0x105   : > { %2746 = vmatmul.mubr.bf16.gmra.mxu1 %v8497_v4 }
 0x106   : > { %2753 = vmatprep.mubr.bf16.mxu1 %v8599_v13  ;;  %v6734_v38 = vpop.f32.mrf.mxu0  ;;  %v6846_v12 = vpop.f32.mrf.mxu1  ;;  %v8858_v35 = vsel %vm8137_vm11, %v1423_v46, %v1424_v22 }
 0x107   : > { %v6735_v1 = vadd.f32 %v6734_v38, %v6733_v57  ;;  %v6847_v4 = vadd.f32 %v6846_v12, %v6845_v19  ;;  %v6488_v32 = vcombine.low %v8854_v37, %v8858_v35  ;;  %v11095_v57 = vld [vmem:[#allocation15_spill] sm:$0xff]  ;;  %v7863_v37 = vld [vmem:[%s11014_s3 + $0x78] sm:$0xff]  }
 0x108   : > { %v6736_v3 = vpop.f32.mrf.mxu0  ;;  %v6848_v54 = vpop.f32.mrf.mxu1  ;;  %7295 = vmatprep.subr.bf16.mxu0 %v7863_v37 }
 0x109   : > { %v8850_v31 = vadd.f32 %v6847_v4, %v6735_v1 }
 0x10a   : > { %2425 = vmatmul.mubr.bf16.gmra.mxu0 %v8566_v55  ;;  %v6737_v25 = vpop.f32.mrf.mxu0  ;;  %v6849_v52 = vpop.f32.mrf.mxu1  ;;  %v11091_v55 = vld [vmem:[#allocation7_spill] sm:$0xff] }
 0x10b   : > { %2432 = vmatprep.mubr.bf16.mxu0 %v11090_v23  ;;  %v6738_v34 = vadd.f32 %v6737_v25, %v6736_v3  ;;  %v6850_v33 = vadd.f32 %v6849_v52, %v6848_v54  ;;  %v11097_v54 = vld [vmem:[#allocation10_spill] sm:$0xff] }
 0x10d   : > { %2754 = vmatmul.mubr.bf16.gmra.mxu1 %v11091_v55  ;;  %v8865_v27 = vadd.f32 %v6850_v33, %v6738_v34  ;;  %v11098_v34 = vld [vmem:[#allocation17_spill] sm:$0xff] }
 0x10e   : > { %2761 = vmatprep.mubr.bf16.mxu1 %v11092_v30  ;;  %v6739_v5 = vpop.f32.mrf.mxu0 }
 0x10f   : > { %v6851_v28 = vpop.f32.mrf.mxu1 }
 0x110   : > { %v6740_v29 = vpop.f32.mrf.mxu0 }
 0x111   : > { %v6741_v7 = vadd.f32 %v6740_v29, %v6739_v5  ;;  %v6852_v40 = vpop.f32.mrf.mxu1 }
 0x112   : > { %2433 = vmatmul.mubr.bf16.gmra.mxu0 %v8599_v13  ;;  %v6853_v8 = vadd.f32 %v6852_v40, %v6851_v28  ;;  %v6742_v39 = vpop.f32.mrf.mxu0 }
 0x113   : > { %2440 = vmatprep.mubr.bf16.mxu0 %v11093_v21  ;;  %v6854_v50 = vpop.f32.mrf.mxu1 }
 0x114   : > { %v8870_v36 = vadd.f32 %v6853_v8, %v6741_v7  ;;  %v6743_v10 = vpop.f32.mrf.mxu0 }
 0x115   : > { %2762 = vmatmul.mubr.bf16.gmra.mxu1 %v11094_v61  ;;  %v6744_v19 = vadd.f32 %v6743_v10, %v6742_v39  ;;  %v6855_v22 = vpop.f32.mrf.mxu1  ;;  %v11100_v61 = vld [vmem:[#allocation13_spill] sm:$0xff] }
 0x116   : > { %2769 = vmatprep.mubr.bf16.mxu1 %v11095_v57  ;;  %v6856_v60 = vadd.f32 %v6855_v22, %v6854_v50  ;;  %v6745_v38 = vpop.f32.mrf.mxu0 }
 0x118   : > { %v8873_v12 = vadd.f32 %v6856_v60, %v6744_v19  ;;  %v6746_v13 = vpop.f32.mrf.mxu0 }
 0x119   : > { %v6857_v1 = vpop.f32.mrf.mxu1  ;;  %v6747_v4 = vadd.f32 %v6746_v13, %v6745_v38 }
 0x11a   : > { %2441 = vmatmul.mubr.bf16.gmra.mxu0 %v11092_v30  ;;  %v6748_v46 = vpop.f32.mrf.mxu0  ;;  %v11099_v30 = vld [vmem:[#allocation16_spill] sm:$0xff] }
 0x11b   : > { %2448 = vmatprep.mubr.bf16.mxu0 %v11096_v44  ;;  %v6858_v3 = vpop.f32.mrf.mxu1 }
 0x11c   : > { %v6859_v25 = vadd.f32 %v6858_v3, %v6857_v1  ;;  %v6749_v52 = vpop.f32.mrf.mxu0 }
 0x11d   : > { %2770 = vmatmul.mubr.bf16.gmra.mxu1 %v11097_v54  ;;  %v6860_v33 = vpop.f32.mrf.mxu1  ;;  %v6750_v55 = vadd.f32 %v6749_v52, %v6748_v46 }
 0x11e   : > { %2777 = vmatprep.mubr.bf16.mxu1 %v11098_v34  ;;  %v8879_v5 = vadd.f32 %v6859_v25, %v6747_v4 }
 0x11f   : > { %v6861_v28 = vpop.f32.mrf.mxu1 }
 0x120   : > { %v6862_v29 = vadd.f32 %v6861_v28, %v6860_v33  ;;  %v6751_v7 = vpop.f32.mrf.mxu0 }
 0x122   : > { %2449 = vmatmul.mubr.bf16.gmra.mxu0 %v11095_v57  ;;  %v8883_v40 = vadd.f32 %v6862_v29, %v6750_v55  ;;  %v6752_v8 = vpop.f32.mrf.mxu0  ;;  %v1393_v55 = vshrl.u32 %v8846_v51, 16 }
 0x123   : > { %2456 = vmatprep.mubr.bf16.mxu0 %v11099_v30  ;;  %v6863_v39 = vpop.f32.mrf.mxu1  ;;  %v6753_v50 = vadd.f32 %v6752_v8, %v6751_v7  ;;  %v1402_v7 = vshll.u32 %v8839_v18, 16  ;;  %v1406_v8 = vshrl.u32 %v8839_v18, 16 }
 0x124   : > { %v6754_v10 = vpop.f32.mrf.mxu0 }
 0x125   : > { %2778 = vmatmul.mubr.bf16.gmra.mxu1 %v11100_v61  ;;  %v6864_v19 = vpop.f32.mrf.mxu1 }
 0x126   : > { %2785 = vmatprep.mubr.bf16.mxu1 %v8723_v9  ;;  %v6865_v22 = vadd.f32 %v6864_v19, %v6863_v39  ;;  %v6755_v60 = vpop.f32.mrf.mxu0  ;;  %v1395_v19 = vrot.slane %v1393_v55, 4  ;;  %v7851_v55 = vld [vmem:[%s11014_s3 + $0xb8] sm:$0xff]  }
 0x127   : > { %v6866_v38 = vpop.f32.mrf.mxu1  ;;  %v6756_v13 = vadd.f32 %v6755_v60, %v6754_v10 }
 0x128   : > { %v8887_v1 = vadd.f32 %v6865_v22, %v6753_v50 }
 0x129   : > { %v6867_v57 = vpop.f32.mrf.mxu1 }
 0x12a   : > { %2457 = vmatmul.mubr.bf16.gmra.mxu0 %v11098_v34  ;;  %v6868_v4 = vadd.f32 %v6867_v57, %v6866_v38  ;;  %v6757_v46 = vpop.f32.mrf.mxu0  ;;  %v1396_v34 = vshll.u32 %v8846_v51, 16  ;;  %v1404_v38 = vrot.slane %v1402_v7, 5  ;;  %v7850_v57 = vld [vmem:[%s11014_s3 + $0xf8] sm:$0xff]  }
 0x12b   : > { %2464 = vmatprep.mubr.bf16.mxu0 %v8716_v63  ;;  %v6869_v3 = vpop.f32.mrf.mxu1  ;;  %7183 = vmatprep.subr.bf16.mxu1 %v7850_v57 }
 0x12c   : > { %v8892_v54 = vadd.f32 %v6868_v4, %v6756_v13  ;;  %v6758_v25 = vpop.f32.mrf.mxu0  ;;  %v1398_v60 = vrot.slane %v1396_v34, 5  ;;  %v1408_v13 = vrot.slane %v1406_v8, 4  ;;  %7184 = vmatpush3.bf16.msra.mxu1 %v7851_v55 }
 0x12d   : > { %2786 = vmatmul.mubr.bf16.gmra.mxu1 %v8679_v47  ;;  %v6759_v52 = vadd.f32 %v6758_v25, %v6757_v46  ;;  %v6870_v33 = vpop.f32.mrf.mxu1 }
 0x12e   : > { %2793 = vmatprep.mubr.bf16.mxu1 %v8747_v49  ;;  %v6871_v28 = vadd.f32 %v6870_v33, %v6869_v3  ;;  %v6760_v29 = vpop.f32.mrf.mxu0  ;;  %v1399_v25 = vor.u32 %v1398_v60, %v1395_v19  ;;  %v1412_v33 = vshll.u32 %v8841_v53, 16 }
 0x12f   : > { %v6872_v39 = vpop.f32.mrf.mxu1 }
 0x130   : > { %v8899_v50 = vadd.f32 %v6871_v28, %v6759_v52  ;;  %v6761_v47 = vpop.f32.mrf.mxu0  ;;  %v1409_v52 = vor.u32 %v1408_v13, %v1404_v38  ;;  %v1414_v53 = vrot.slane %v1412_v33, 5 }
 0x131   : > { %v6762_v61 = vadd.f32 %v6761_v47, %v6760_v29  ;;  %v6873_v10 = vpop.f32.mrf.mxu1  ;;  %v1400_v47 = vrot.slane %v1399_v25, 4 }
 0x132   : > { %2465 = vmatmul.mubr.bf16.gmra.mxu0 %v8723_v9  ;;  %v6874_v22 = vadd.f32 %v6873_v10, %v6872_v39 }
 0x133   : > { %2472 = vmatprep.mubr.bf16.mxu0 %v8742_v0 }
 0x134   : > { %v8907_v4 = vadd.f32 %v6874_v22, %v6762_v61  ;;  %v6763_v46 = vpop.f32.mrf.mxu0  ;;  %v1410_v61 = vrot.slane %v1409_v52, 4 }
 0x135   : > { %2794 = vmatmul.mubr.bf16.gmra.mxu1 %v8708_v43  ;;  %v6875_v9 = vpop.f32.mrf.mxu1 }
 0x136   : > { %2801 = vmatprep.mubr.bf16.mxu1 %v8769_v58  ;;  %v6764_v3 = vpop.f32.mrf.mxu0  ;;  %v1415_v57 = vsel %vm8153_vm13, %v1410_v61, %v1414_v53 }
 0x137   : > { %v6765_v28 = vadd.f32 %v6764_v3, %v6763_v46  ;;  %v6876_v29 = vpop.f32.mrf.mxu1 }
 0x138   : > { %v6877_v34 = vadd.f32 %v6876_v29, %v6875_v9  ;;  %v6766_v43 = vpop.f32.mrf.mxu0 }
 0x139   : > { %v6878_v7 = vpop.f32.mrf.mxu1 }
 0x13a   : > { %2473 = vmatmul.mubr.bf16.gmra.mxu0 %v8747_v49  ;;  %v8916_v8 = vadd.f32 %v6877_v34, %v6765_v28  ;;  %v6767_v39 = vpop.f32.mrf.mxu0  ;;  %v1405_v49 = vsel %vm8153_vm13, %v1400_v47, %v1404_v38  ;;  %v7852_v28 = vld [vmem:[%s11014_s3 + $0xf0] sm:$0xff]   ;;  %v6470_v47 = vcombine.low %v8846_v51, %v8839_v18 }
 0x13b   : > { %2480 = vmatprep.mubr.bf16.mxu0 %v8763_v48  ;;  %v6768_v10 = vadd.f32 %v6767_v39, %v6766_v43  ;;  %v6879_v19 = vpop.f32.mrf.mxu1  ;;  %v6471_v25 = vcombine.low %v1405_v49, %v1415_v57  ;;  %7185 = vmatprep.subr.bf16.mxu1 %v7852_v28 }
 0x13c   : > { %v6880_v22 = vadd.f32 %v6879_v19, %v6878_v7  ;;  %v7853_v7 = vld [vmem:[%s11014_s3 + $0xb0] sm:$0xff]  }
 0x13d   : > { %2802 = vmatmul.mubr.bf16.gmra.mxu1 %v8732_v62  ;;  %v6769_v60 = vpop.f32.mrf.mxu0 }
 0x13e   : > { %2809 = vmatprep.mubr.bf16.mxu1 %v8787_v26  ;;  %v8920_v13 = vadd.f32 %v6880_v22, %v6768_v10  ;;  %7186 = vmatpush3.bf16.msra.mxu1 %v7853_v7 }
 0x13f   : > { %v6770_v46 = vpop.f32.mrf.mxu0 }
 0x140   : > { %v6881_v9 = vpop.f32.mrf.mxu1  ;;  %v6771_v3 = vadd.f32 %v6770_v46, %v6769_v60 }
 0x141   : > { %v6772_v52 = vpop.f32.mrf.mxu0 }
 0x142   : > { %2481 = vmatmul.mubr.bf16.gmra.mxu0 %v8769_v58  ;;  %v6882_v62 = vpop.f32.mrf.mxu1 }
 0x143   : > { %2488 = vmatprep.mubr.bf16.mxu0 %v8780_v45  ;;  %v6883_v33 = vadd.f32 %v6882_v62, %v6881_v9  ;;  %v6773_v55 = vpop.f32.mrf.mxu0 }
 0x144   : > { %v6884_v38 = vpop.f32.mrf.mxu1  ;;  %v6774_v29 = vadd.f32 %v6773_v55, %v6772_v52 }
 0x145   : > { %2810 = vmatmul.mubr.bf16.gmra.mxu1 %v8756_v59  ;;  %v8932_v34 = vadd.f32 %v6883_v33, %v6771_v3  ;;  %v7854_v33 = vld [vmem:[%s11014_s3 + $0xe8] sm:$0xff]  }
 0x146   : > { %2817 = vmatprep.mubr.bf16.mxu1 %v6471_v25  ;;  %v6885_v58 = vpop.f32.mrf.mxu1  ;;  %7187 = vmatprep.subr.bf16.mxu1 %v7854_v33  ;;  %v7857_v33 = vld [vmem:[%s11014_s3 + $0xa0] sm:$0xff]  }
 0x147   : > { %v6775_v43 = vpop.f32.mrf.mxu0  ;;  %v6886_v39 = vadd.f32 %v6885_v58, %v6884_v38 }
 0x149   : > { %v6776_v61 = vpop.f32.mrf.mxu0  ;;  %v8940_v59 = vadd.f32 %v6886_v39, %v6774_v29 }
 0x14a   : > { %2489 = vmatmul.mubr.bf16.gmra.mxu0 %v8787_v26  ;;  %v6887_v53 = vpop.f32.mrf.mxu1  ;;  %v6777_v10 = vadd.f32 %v6776_v61, %v6775_v43 }
 0x14b   : > { %7671 = vmatprep.mubr.bf16.mxu0 %v8266_v20  ;;  %v6778_v19 = vpop.f32.mrf.mxu0 }
 0x14c   : > { %v6888_v22 = vpop.f32.mrf.mxu1 }
 0x14d   : > { %2818 = vmatmul.mubr.bf16.gmra.mxu1 %v6470_v47  ;;  %v6889_v60 = vadd.f32 %v6888_v22, %v6887_v53  ;;  %v6779_v49 = vpop.f32.mrf.mxu0 }
 0x14e   : > { %v6890_v57 = vpop.f32.mrf.mxu1  ;;  %v6780_v46 = vadd.f32 %v6779_v49, %v6778_v19 }
 0x14f   : > { %v8943_v9 = vadd.f32 %v6889_v60, %v6777_v10 }
 0x150   : > { %v6891_v18 = vpop.f32.mrf.mxu1 }
 0x151   : > { %v6892_v51 = vadd.f32 %v6891_v18, %v6890_v57  ;;  %v6781_v3 = vpop.f32.mrf.mxu0 }
 0x152   : > { %7672 = vmatmul.mubr.bf16.vlgmr.msra.gmra.mxu0 %v8314_v14  ;;  %v6893_v26 = vpop.f32.mrf.mxu1  ;;  %v7855_v14 = vld [vmem:[%s11014_s3 + $0xa8] sm:$0xff]  }
 0x153   : > { %v8946_v25 = vadd.f32 %v6892_v51, %v6780_v46  ;;  %7675 = vmatprep.mubr.bf16.mxu0 %v8356_v11  ;;  %v6782_v20 = vpop.f32.mrf.mxu0  ;;  %7188 = vmatpush3.bf16.msra.mxu1 %v7855_v14 }
 0x154   : > { %v6783_v52 = vadd.f32 %v6782_v20, %v6781_v3  ;;  %v6894_v62 = vpop.f32.mrf.mxu1 }
 0x155   : > { %v6895_v55 = vadd.f32 %v6894_v62, %v6893_v26  ;;  %v6784_v28 = vpop.f32.mrf.mxu0 }
 0x156   : > { %v6896_v38 = vpop.f32.mrf.mxu1 }
 0x157   : > { %v8952_v29 = vadd.f32 %v6895_v55, %v6783_v52  ;;  %v6785_v58 = vpop.f32.mrf.mxu0 }
 0x158   : > { %v6786_v43 = vadd.f32 %v6785_v58, %v6784_v28  ;;  %v6897_v11 = vpop.f32.mrf.mxu1 }
 0x159   : > { %v6898_v7 = vadd.f32 %v6897_v11, %v6896_v38  ;;  %v6787_v39 = vpop.f32.mrf.mxu0 }
 0x15a   : > { %7676 = vmatmul.mubr.bf16.gmra.mxu0 %v8405_v6 }
 0x15b   : > { %v8958_v47 = vadd.f32 %v6898_v7, %v6786_v43  ;;  %7679 = vmatprep.mubr.bf16.mxu0 %v8461_v17  ;;  %v6788_v61 = vpop.f32.mrf.mxu0  ;;  %v7856_v17 = vld [vmem:[%s11014_s3 + $0xe0] sm:$0xff]  }
 0x15c   : > { %v6899_v53 = vpop.f32.mrf.mxu1  ;;  %v6789_v10 = vadd.f32 %v6788_v61, %v6787_v39  ;;  %7189 = vmatprep.subr.bf16.mxu1 %v7856_v17 }
 0x15d   : > { %v6790_v19 = vpop.f32.mrf.mxu0  ;;  %7190 = vmatpush3.bf16.msra.mxu1 %v7857_v33 }
 0x15e   : > { %v6900_v22 = vpop.f32.mrf.mxu1 }
 0x15f   : > { %v6901_v60 = vadd.f32 %v6900_v22, %v6899_v53  ;;  %v6791_v49 = vpop.f32.mrf.mxu0 }
 0x160   : > { %v6902_v57 = vpop.f32.mrf.mxu1  ;;  %v6792_v46 = vadd.f32 %v6791_v49, %v6790_v19 }
 0x161   : > { %v8961_v18 = vadd.f32 %v6901_v60, %v6789_v10 }
 0x162   : > { %7680 = vmatmul.mubr.bf16.gmra.mxu0 %v8511_v42  ;;  %v6903_v51 = vpop.f32.mrf.mxu1 }
 0x163   : > { %v6904_v3 = vadd.f32 %v6903_v51, %v6902_v57  ;;  %7683 = vmatprep.mubr.bf16.mxu0 %v8558_v56  ;;  %v7858_v51 = vld [vmem:[%s11014_s3 + $0xd8] sm:$0xff]  }
 0x164   : > { %v6793_v6 = vpop.f32.mrf.mxu0  ;;  %7191 = vmatprep.subr.bf16.mxu1 %v7858_v51 }
 0x165   : > { %v8968_v26 = vadd.f32 %v6904_v3, %v6792_v46 }
 0x166   : > { %v6794_v52 = vpop.f32.mrf.mxu0 }
 0x167   : > { %v6905_v20 = vpop.f32.mrf.mxu1  ;;  %v6795_v62 = vadd.f32 %v6794_v52, %v6793_v6 }
 0x168   : > { %v6796_v55 = vpop.f32.mrf.mxu0 }
 0x169   : > { %v6906_v42 = vpop.f32.mrf.mxu1 }
 0x16a   : > { %v6907_v28 = vadd.f32 %v6906_v42, %v6905_v20  ;;  %7684 = vmatmul.mubr.bf16.gmra.mxu0 %v11090_v23  ;;  %v6797_v38 = vpop.f32.mrf.mxu0 }
 0x16b   : > { %v6908_v56 = vpop.f32.mrf.mxu1  ;;  %v6798_v14 = vadd.f32 %v6797_v38, %v6796_v55  ;;  %7687 = vmatprep.mubr.bf16.mxu0 %v11093_v21 }
 0x16c   : > { %v8974_v58 = vadd.f32 %v6907_v28, %v6795_v62 }
 0x16d   : > { %v6909_v43 = vpop.f32.mrf.mxu1 }
 0x16e   : > { %v6910_v11 = vadd.f32 %v6909_v43, %v6908_v56  ;;  %v6799_v7 = vpop.f32.mrf.mxu0 }
 0x16f   : > { %v6911_v39 = vpop.f32.mrf.mxu1 }
 0x170   : > { %v8977_v61 = vadd.f32 %v6910_v11, %v6798_v14  ;;  %v6800_v53 = vpop.f32.mrf.mxu0 }
 0x171   : > { %v6801_v10 = vadd.f32 %v6800_v53, %v6799_v7  ;;  %v6912_v19 = vpop.f32.mrf.mxu1 }
 0x172   : > { %v6913_v22 = vadd.f32 %v6912_v19, %v6911_v39  ;;  %v6802_v60 = vpop.f32.mrf.mxu0  ;;  %7688 = vmatmul.mubr.bf16.gmra.mxu0 %v11096_v44  ;;  %v7859_v44 = vld [vmem:[%s11014_s3 + $0x98] sm:$0xff]   ;;  %v7860_v39 = vld [vmem:[%s11014_s3 + $0xd0] sm:$0xff]  }
 0x173   : > { %v6914_v23 = vpop.f32.mrf.mxu1  ;;  %7691 = vmatprep.mubr.bf16.mxu0 %v11099_v30  ;;  %7192 = vmatpush3.bf16.msra.mxu1 %v7859_v44 }
 0x174   : > { %v8980_v49 = vadd.f32 %v6913_v22, %v6801_v10  ;;  %v6803_v57 = vpop.f32.mrf.mxu0  ;;  %7193 = vmatprep.subr.bf16.mxu1 %v7860_v39 }
 0x175   : > { %v6804_v21 = vadd.f32 %v6803_v57, %v6802_v60  ;;  %v6915_v46 = vpop.f32.mrf.mxu1 }
 0x176   : > { %v6916_v3 = vadd.f32 %v6915_v46, %v6914_v23 }
 0x178   : > { %v8986_v6 = vadd.f32 %v6916_v3, %v6804_v21 }
 0x17a   : > { %v6805_v17 = vpop.f32.mrf.mxu0  ;;  %7692 = vmatmul.mubr.bf16.gmra.mxu0 %v8716_v63 }
 0x17b   : > { %7695 = vmatprep.mubr.bf16.mxu0 %v8742_v0 }
 0x17c   : > { %v6806_v20 = vpop.f32.mrf.mxu0 }
 0x17d   : > { %v6917_v30 = vpop.f32.mrf.mxu1  ;;  %v6807_v52 = vadd.f32 %v6806_v20, %v6805_v17 }
 0x17e   : > { %v6808_v62 = vpop.f32.mrf.mxu0 }
 0x17f   : > { %v6918_v33 = vpop.f32.mrf.mxu1 }
 0x180   : > { %v6919_v42 = vadd.f32 %v6918_v33, %v6917_v30  ;;  %v6809_v55 = vpop.f32.mrf.mxu0 }
 0x181   : > { %v6920_v28 = vpop.f32.mrf.mxu1  ;;  %v6810_v38 = vadd.f32 %v6809_v55, %v6808_v62 }
 0x182   : > { %v8993_v56 = vadd.f32 %v6919_v42, %v6807_v52  ;;  %v6811_v14 = vpop.f32.mrf.mxu0  ;;  %7696 = vmatmul.mubr.bf16.gmra.mxu0 %v8763_v48  ;;  %v7861_v48 = vld [vmem:[%s11014_s3 + $0x90] sm:$0xff]  }
 0x183   : > { %v6921_v43 = vpop.f32.mrf.mxu1  ;;  %7699 = vmatprep.mubr.bf16.mxu0 %v8780_v45  ;;  %7194 = vmatpush3.bf16.msra.mxu1 %v7861_v48  ;;  %v7866_v48 = vld [vmem:[%s11014_s3 + $0x70] sm:$0xff]  }
 0x184   : > { %v6922_v11 = vadd.f32 %v6921_v43, %v6920_v28  ;;  %v6812_v7 = vpop.f32.mrf.mxu0 }
 0x185   : > { %v6923_v63 = vpop.f32.mrf.mxu1  ;;  %v6813_v0 = vadd.f32 %v6812_v7, %v6811_v14  ;;  %v7865_v7 = vld [vmem:[%s11014_s3 + $0x38] sm:$0xff]  }
 0x186   : > { %v9000_v53 = vadd.f32 %v6922_v11, %v6810_v38  ;;  %v6814_v10 = vpop.f32.mrf.mxu0  ;;  %7296 = vmatpush3.bf16.msra.mxu0 %v7865_v7 }
 0x187   : > { %v6924_v19 = vpop.f32.mrf.mxu1  ;;  %7297 = vmatprep.subr.bf16.mxu0 %v7866_v48  ;;  %v7862_v48 = vld [vmem:[%s11014_s3 + $0xc8] sm:$0xff]  }
 0x188   : > { %v6925_v22 = vadd.f32 %v6924_v19, %v6923_v63  ;;  %v6815_v60 = vpop.f32.mrf.mxu0  ;;  %v3203_v19 = vld [vmem:[#allocation3 + $0x18] sm:$0x1]  ;;  %7195 = vmatprep.subr.bf16.mxu1 %v7862_v48 }
 0x189   : > { %v6926_v23 = vpop.f32.mrf.mxu1  ;;  %v6816_v45 = vadd.f32 %v6815_v60, %v6814_v10  ;;  %v11104_v60 = vmov 0 }
 0x18a   : > { %v9005_v57 = vadd.f32 %v6925_v22, %v6813_v0  ;;  %v6817_v46 = vpop.f32.mrf.mxu0  ;;  %7700 = vmatmul.mubr.bf16.gmra.mxu0 %v6488_v32  ;;  %v11105_v60 = vsel %vm9031_vm15, 4294967295, %v11104_v60 }
 0x18b   : > { %v6927_v21 = vpop.f32.mrf.mxu1  ;;  %11106 = vst [vmem:[#allocation11_spill] sm:$0xff] %v11105_v60 }
 0x18c   : > { %v6928_v51 = vadd.f32 %v6927_v21, %v6926_v23  ;;  %v6818_v3 = vpop.f32.mrf.mxu0  ;;  %v7867_v21 = vld [vmem:[%s11014_s3 + $0x30] sm:$0xff]  }
 0x18d   : > { %v6929_v17 = vpop.f32.mrf.mxu1  ;;  %v6819_v20 = vadd.f32 %v6818_v3, %v6817_v46  ;;  %7298 = vmatpush3.bf16.msra.mxu0 %v7867_v21 }
 0x18e   : > { %v9010_v44 = vadd.f32 %v6928_v51, %v6816_v45  ;;  %v6820_v30 = vpop.f32.mrf.mxu0 }
 0x18f   : > { %v6930_v52 = vpop.f32.mrf.mxu1 }
 0x190   : > { %11101 = vst [vmem:[#allocation8_spill] sm:$0xff] %v9010_v44  ;;  %v6931_v62 = vadd.f32 %v6930_v52, %v6929_v17  ;;  %v6821_v33 = vpop.f32.mrf.mxu0 }
 0x191   : > { %v6932_v42 = vpop.f32.mrf.mxu1  ;;  %v6822_v28 = vadd.f32 %v6821_v33, %v6820_v30  ;;  %v7868_v30 = vld [vmem:[%s11014_s3 + $0x68] sm:$0xff]  }
 0x192   : > { %v9012_v55 = vadd.f32 %v6931_v62, %v6819_v20  ;;  %v6951_v38 = vpop.f32.mrf.mxu0  ;;  %v3200_v20 = vld [vmem:[#allocation3 + $0xc] sm:$0x1]  ;;  %7299 = vmatprep.subr.bf16.mxu0 %v7868_v30  ;;  %v7864_v30 = vld [vmem:[%s11014_s3 + $0x88] sm:$0xff]  }
 0x193   : > { %v6933_v14 = vpop.f32.mrf.mxu1  ;;  %v3201_v33 = vsel %vm9031_vm15, 0, %v3200_v20  ;;  %7196 = vmatpush3.bf16.msra.mxu1 %v7864_v30  ;;  %v7876_v30 = vld [vmem:[%s11014_s3 + $0x50] sm:$0xff]  }
 0x194   : > { %11102 = vst [vmem:[#allocation7_spill] sm:$0xff] %v9012_v55  ;;  %v6934_v43 = vadd.f32 %v6933_v14, %v6932_v42  ;;  %v6952_v11 = vpop.f32.mrf.mxu0  ;;  %3202 = vst [vmem:[#allocation3 + $0xc] sm:$0x1] %v3201_v33  ;;  %v3221_v55 = vld [vmem:[#allocation3 + $0x60] sm:$0x1] }
 0x195   : > { %v6953_v35 = vadd.f32 %v6952_v11, %v6951_v38  ;;  %v9017_v32 = vpop.f32.mrf.mxu1  ;;  %v3252_v38 = vld [vmem:[#allocation3 + $0x20] sm:$0x1] }
 0x196   : > { %v9022_v63 = vadd.f32 %v6934_v43, %v6822_v28  ;;  %v6954_v0 = vpop.f32.mrf.mxu0  ;;  %v3253_v11 = vsel %vm9062_vm0, 0, %v3252_v38  ;;  %v7873_v38 = vld [vmem:[%s11014_s3 + $0x58] sm:$0xff]  }
 0x197   : > { %v9025_v39 = vadd.f32 %v6953_v35, %v8832_v16  ;;  %v9027_v10 = vpop.f32.mrf.mxu1  ;;  %v3204_v16 = vsel %vm9031_vm15, 0, %v3203_v19  ;;  %3254 = vst [vmem:[#allocation3 + $0x20] sm:$0x1] %v3253_v11  ;;  %v3249_v35 = vld [vmem:[#allocation3 + $0x14] sm:$0x1] }
 0x198   : > { %11103 = vst [vmem:[#allocation12_spill] sm:$0xff] %v9022_v63  ;;  %v6955_v22 = vpop.f32.mrf.mxu0  ;;  %3205 = vst [vmem:[#allocation3 + $0x18] sm:$0x1] %v3204_v16  ;;  %v3250_v19 = vsel %vm9062_vm0, 0, %v3249_v35  ;;  %v3258_v35 = vld [vmem:[#allocation3 + $0x38] sm:$0x1] }
 0x199   : > { %v6956_v23 = vadd.f32 %v6955_v22, %v6954_v0  ;;  %v9038_v45 = vpop.f32.mrf.mxu1  ;;  %3251 = vst [vmem:[#allocation3 + $0x14] sm:$0x1] %v3250_v19  ;;  %v3259_v19 = vsel %vm9062_vm0, 0, %v3258_v35 }
 0x19a   : > { %v6957_v46 = vpop.f32.mrf.mxu0  ;;  %3260 = vst [vmem:[#allocation3 + $0x38] sm:$0x1] %v3259_v19 }
 0x19b   : > { %v9046_v51 = vadd.f32 %v6956_v23, %v8837_v24  ;;  %v9048_v3 = vpop.f32.mrf.mxu1  ;;  %v7869_v24 = vld [vmem:[%s11014_s3 + $0x28] sm:$0xff]  }
 0x19c   : > { %v6958_v17 = vpop.f32.mrf.mxu0  ;;  %7300 = vmatpush3.bf16.msra.mxu0 %v7869_v24  ;;  %v3209_v23 = vld [vmem:[#allocation3 + $0x30] sm:$0x1] }
 0x19d   : > { %v6959_v52 = vadd.f32 %v6958_v17, %v6957_v46  ;;  %v9053_v62 = vpop.f32.mrf.mxu1  ;;  %v3210_v46 = vsel %vm9031_vm15, 0, %v3209_v23  ;;  %v7871_v17 = vld [vmem:[%s11014_s3 + $0x20] sm:$0xff]  }
 0x19e   : > { %v6960_v42 = vpop.f32.mrf.mxu0  ;;  %3211 = vst [vmem:[#allocation3 + $0x30] sm:$0x1] %v3210_v46  ;;  %v3255_v23 = vld [vmem:[#allocation3 + $0x2c] sm:$0x1] }
 0x19f   : > { %v9067_v14 = vadd.f32 %v6959_v52, %v8850_v31  ;;  %v9069_v43 = vpop.f32.mrf.mxu1  ;;  %v7870_v31 = vld [vmem:[%s11014_s3 + $0x60] sm:$0xff]   ;;  %v3206_v52 = vld [vmem:[#allocation3 + $0x24] sm:$0x1] }
 0x1a0   : > { %v6961_v37 = vpop.f32.mrf.mxu0  ;;  %7301 = vmatprep.subr.bf16.mxu0 %v7870_v31  ;;  %v3207_v24 = vsel %vm9031_vm15, 0, %v3206_v52  ;;  %v7875_v31 = vld [vmem:[%s11014_s3 + $0x18] sm:$0xff]  }
 0x1a1   : > { %11109 = vst [vmem:[#allocation9_spill] sm:$0xff] %v9067_v14  ;;  %v6962_v7 = vadd.f32 %v6961_v37, %v6960_v42  ;;  %v9073_v0 = vpop.f32.mrf.mxu1  ;;  %7302 = vmatpush3.bf16.msra.mxu0 %v7871_v17  ;;  %3208 = vst [vmem:[#allocation3 + $0x24] sm:$0x1] %v3207_v24  ;;  %v7877_v24 = vld [vmem:[%s11014_s3 + $0x10] sm:$0xff]  }
 0x1a2   : > { %v6963_v22 = vpop.f32.mrf.mxu0  ;;  %7303 = vmatprep.subr.bf16.mxu0 %v7873_v38 }
 0x1a3   : > { %v9084_v16 = vadd.f32 %v6962_v7, %v8865_v27  ;;  %v9086_v21 = vpop.f32.mrf.mxu1 }
 0x1a4   : > { %v6964_v20 = vpop.f32.mrf.mxu0 }
 0x1a5   : > { %11110 = vst [vmem:[#allocation15_spill] sm:$0xff] %v9084_v16  ;;  %v6965_v27 = vadd.f32 %v6964_v20, %v6963_v22  ;;  %v9096_v33 = vpop.f32.mrf.mxu1  ;;  %7304 = vmatpush3.bf16.msra.mxu0 %v7875_v31 }
 0x1a6   : > { %v6966_v42 = vpop.f32.mrf.mxu0  ;;  %7305 = vmatprep.subr.bf16.mxu0 %v7876_v30  ;;  %v7872_v30 = vld [vmem:[%s11014_s3 + $0xc0] sm:$0xff]  }
 0x1a7   : > { %v9104_v11 = vadd.f32 %v6965_v27, %v8870_v36  ;;  %v9106_v37 = vpop.f32.mrf.mxu1  ;;  %v3256_v36 = vsel %vm9062_vm0, 0, %v3255_v23  ;;  %v3215_v27 = vld [vmem:[#allocation3 + $0x48] sm:$0x1]  ;;  %7197 = vmatprep.subr.bf16.mxu1 %v7872_v30 }
 0x1a8   : > { %v6967_v7 = vpop.f32.mrf.mxu0  ;;  %3257 = vst [vmem:[#allocation3 + $0x2c] sm:$0x1] %v3256_v36 }
 0x1a9   : > { %11111 = vst [vmem:[#allocation14_spill] sm:$0xff] %v9104_v11  ;;  %v6968_v22 = vadd.f32 %v6967_v7, %v6966_v42  ;;  %v9113_v48 = vpop.f32.mrf.mxu1  ;;  %v3212_v7 = vld [vmem:[#allocation3 + $0x3c] sm:$0x1]  ;;  %7306 = vmatpush3.bf16.msra.mxu0 %v7877_v24  ;;  %v7878_v24 = vld [vmem:[%s11014_s3 + $0x48] sm:$0xff]  }
 0x1aa   : > { %v6969_v46 = vpop.f32.mrf.mxu0  ;;  %7307 = vmatprep.subr.bf16.mxu0 %v7878_v24  ;;  %v9175_v24 = vld [vmem:[#allocation3] sm:$0xf] }
 0x1ab   : > { %v9118_v17 = vadd.f32 %v6968_v22, %v8873_v12  ;;  %v9120_v20 = vpop.f32.mrf.mxu1  ;;  %v3216_v12 = vsel %vm9031_vm15, 0, %v3215_v27  ;;  %v3213_v22 = vsel %vm9031_vm15, 0, %v3212_v7  ;;  %v7879_v7 = vld [vmem:[%s11014_s3 + $0x8] sm:$0xff]  }
 0x1ac   : > { %v6970_v52 = vpop.f32.mrf.mxu0  ;;  %3217 = vst [vmem:[#allocation3 + $0x48] sm:$0x1] %v3216_v12  ;;  %3214 = vst [vmem:[#allocation3 + $0x3c] sm:$0x1] %v3213_v22 }
 0x1ad   : > { %11112 = vst [vmem:[#allocation10_spill] sm:$0xff] %v9118_v17  ;;  %v6971_v42 = vadd.f32 %v6970_v52, %v6969_v46  ;;  %v9128_v38 = vpop.f32.mrf.mxu1  ;;  %v3264_v52 = vld [vmem:[#allocation3 + $0x50] sm:$0x1]  ;;  %7308 = vmatpush3.bf16.msra.mxu0 %v7879_v7 }
 0x1ae   : > { %v6972_v35 = vpop.f32.mrf.mxu0  ;;  %7309 = vmatprep.subr.bf16.mxu0 %v7880_v41  ;;  %v3218_v41 = vld [vmem:[#allocation3 + $0x54] sm:$0x1] }
 0x1af   : > { %v9133_v19 = vadd.f32 %v6971_v42, %v8879_v5  ;;  %v9135_v31 = vpop.f32.mrf.mxu1  ;;  %v3265_v5 = vsel %vm9062_vm0, 0, %v3264_v52 }
 0x1b0   : > { %v6973_v23 = vpop.f32.mrf.mxu0  ;;  %3266 = vst [vmem:[#allocation3 + $0x50] sm:$0x1] %v3265_v5 }
 0x1b1   : > { %11113 = vst [vmem:[#allocation17_spill] sm:$0xff] %v9133_v19  ;;  %v6974_v46 = vadd.f32 %v6973_v23, %v6972_v35  ;;  %v9139_v36 = vpop.f32.mrf.mxu1  ;;  %v3261_v35 = vld [vmem:[#allocation3 + $0x44] sm:$0x1]  ;;  %v7874_v23 = vld [vmem:[%s11014_s3 + $0x80] sm:$0xff]  }
 0x1b2   : > { %v6975_v27 = vpop.f32.mrf.mxu0  ;;  %v3262_v52 = vsel %vm9062_vm0, 0, %v3261_v35  ;;  %7198 = vmatpush3.bf16.msra.mxu1 %v7874_v23  ;;  %v9181_v23 = vld [vmem:[#allocation3 + $0x4] sm:$0xf] }
 0x1b3   : > { %v9150_v42 = vadd.f32 %v6974_v46, %v8883_v40  ;;  %v9152_v12 = vpop.f32.mrf.mxu1  ;;  %3263 = vst [vmem:[#allocation3 + $0x44] sm:$0x1] %v3262_v52  ;;  %v3885_v52 = vshll.u32 %v9175_v24, 16  ;;  %v3895_v19 = vshrl.u32 %v9181_v23, 16 }
 0x1b4   : > { %v6976_v22 = vpop.f32.mrf.mxu0 }
 0x1b5   : > { %11114 = vst [vmem:[#allocation16_spill] sm:$0xff] %v9150_v42  ;;  %v6977_v40 = vadd.f32 %v6976_v22, %v6975_v27  ;;  %v9162_v46 = vpop.f32.mrf.mxu1  ;;  %v7881_v27 = vld [vmem:[%s11014_s3] sm:$0xff]   ;;  %v3222_v22 = vsel %vm9031_vm15, 0, %v3221_v55  ;;  %v3219_v55 = vsel %vm9031_vm15, 0, %v3218_v41  ;;  %v3887_v11 = vrot.slane %v3885_v52, 5 }
 0x1b6   : > { %11115 = vst [vmem:[#allocation13_spill] sm:$0xff] %v9162_v46  ;;  %v6978_v5 = vpop.f32.mrf.mxu0  ;;  %3223 = vst [vmem:[#allocation3 + $0x60] sm:$0x1] %v3222_v22  ;;  %7310 = vmatpush3.bf16.msra.mxu0 %v7881_v27  ;;  %v3829_v22 = vld [vmem:[#allocation3 + $0x8] sm:$0x1]  ;;  %v4315_v41 = vrot.slane %v9181_v23, 5 }
 0x1b7   : > { %v9168_v30 = vadd.f32 %v6977_v40, %v8887_v1  ;;  %v9170_v63 = vpop.f32.mrf.mxu1  ;;  %v3882_v1 = vshrl.u32 %v9175_v24, 16  ;;  %3220 = vst [vmem:[#allocation3 + $0x54] sm:$0x1] %v3219_v55  ;;  %v3267_v55 = vld [vmem:[#allocation3 + $0x5c] sm:$0x1] }
 0x1b8   : > { %11117 = vst [vmem:[#allocation19_spill] sm:$0xff] %v9170_v63  ;;  %v6979_v42 = vpop.f32.mrf.mxu0  ;;  %v3270_v63 = vld [vmem:[#allocation3 + $0x68] sm:$0x1]  ;;  %v4317_v44 = vrot.slane %v4315_v41, 4 }
 0x1b9   : > { %11116 = vst [vmem:[#allocation18_spill] sm:$0xff] %v9168_v30  ;;  %v6980_v35 = vadd.f32 %v6979_v42, %v6978_v5  ;;  %v9177_v7 = vpop.f32.mrf.mxu1  ;;  %v3891_v30 = vshll.u32 %v9181_v23, 16  ;;  %v3884_v17 = vrot.slane %v3882_v1, 4  ;;  %v3271_v16 = vsel %vm9062_vm0, 0, %v3270_v63 }
 0x1ba   : > { %11118 = vst [vmem:[#allocation20_spill] sm:$0xff] %v9177_v7  ;;  %v6981_v40 = vpop.f32.mrf.mxu0  ;;  %3272 = vst [vmem:[#allocation3 + $0x68] sm:$0x1] %v3271_v16  ;;  %v3227_v16 = vld [vmem:[#allocation3 + $0x78] sm:$0x1] }
 0x1bb   : > { %v9188_v42 = vadd.f32 %v6980_v35, %v8892_v54  ;;  %v9190_v5 = vpop.f32.mrf.mxu1  ;;  %v3888_v14 = vor.u32 %v3887_v11, %v3884_v17  ;;  %v3893_v54 = vrot.slane %v3891_v30, 5 }
 0x1bc   : > { %11120 = vst [vmem:[#allocation22_spill] sm:$0xff] %v9190_v5  ;;  %v6982_v7 = vpop.f32.mrf.mxu0  ;;  %v3901_v5 = vshll.u32 %v3829_v22, 16 }
 0x1bd   : > { %11119 = vst [vmem:[#allocation21_spill] sm:$0xff] %v9188_v42  ;;  %v6983_v46 = vadd.f32 %v6982_v7, %v6981_v40  ;;  %v9194_v27 = vpop.f32.mrf.mxu1  ;;  %v3897_v42 = vrot.slane %v3895_v19, 4  ;;  %v3889_v7 = vrot.slane %v3888_v14, 4  ;;  %v6530_v19 = vrot.slane %v9175_v24, 9 }
 0x1be   : > { %11121 = vst [vmem:[#allocation23_spill] sm:$0xff] %v9194_v27  ;;  %v6984_v35 = vpop.f32.mrf.mxu0  ;;  %v3268_v27 = vsel %vm9062_vm0, 0, %v3267_v55  ;;  %v3903_v11 = vrot.slane %v3901_v5, 5 }
 0x1bf   : > { %v9200_v1 = vadd.f32 %v6983_v46, %v8899_v50  ;;  %v9202_v52 = vpop.f32.mrf.mxu1  ;;  %v3898_v63 = vor.u32 %v3897_v42, %v3893_v54  ;;  %3269 = vst [vmem:[#allocation3 + $0x5c] sm:$0x1] %v3268_v27  ;;  %v3228_v46 = vsel %vm9031_vm15, 0, %v3227_v16  ;;  %v3894_v14 = vsel %vm8153_vm13, %v3889_v7, %v3893_v54 }
 0x1c0   : > { %11123 = vst [vmem:[#allocation25_spill] sm:$0xff] %v9202_v52  ;;  %v6985_v40 = vpop.f32.mrf.mxu0  ;;  %v4318_v52 = vrot.slane %v3829_v22, 5  ;;  %3229 = vst [vmem:[#allocation3 + $0x78] sm:$0x1] %v3228_v46  ;;  %v9220_v27 = vsel %vm8137_vm11, %v6530_v19, %v4315_v41  ;;  %v6548_v22 = vcombine.low %v9175_v24, %v9181_v23  ;;  %v7884_v19 = vld [vmem:[%s11014_s3 + $0x178] sm:$0xff]  }
 0x1c1   : > { %11122 = vst [vmem:[#allocation24_spill] sm:$0xff] %v9200_v1  ;;  %v6986_v17 = vadd.f32 %v6985_v40, %v6984_v35  ;;  %v9206_v30 = vpop.f32.mrf.mxu1  ;;  %v3899_v1 = vrot.slane %v3898_v63, 4  ;;  %11124 = vst [vmem:[#allocation26_spill] sm:$0xff] %v9220_v27  ;;  %7407 = vmatprep.subr.bf16.mxu1 %v7884_v19 }
 0x1c2   : > { %v6987_v50 = vpop.f32.mrf.mxu0  ;;  %v9226_v40 = vsel %vm8137_vm11, %v4317_v44, %v4318_v52 }
 0x1c3   : > { %v9214_v42 = vadd.f32 %v6986_v17, %v8907_v4  ;;  %v9216_v5 = vpop.f32.mrf.mxu1  ;;  %v3904_v55 = vsel %vm8153_vm13, %v3899_v1, %v3903_v11  ;;  %11125 = vst [vmem:[#allocation27_spill] sm:$0xff] %v9226_v40 }
 0x1c4   : > { %v6988_v35 = vpop.f32.mrf.mxu0  ;;  %v6564_v7 = vcombine.low %v3894_v14, %v3904_v55 }
 0x1c5   : > { %v6989_v4 = vadd.f32 %v6988_v35, %v6987_v50  ;;  %v9230_v54 = vpop.f32.mrf.mxu1 }
 0x1c6   : > { %v6990_v41 = vpop.f32.mrf.mxu0  ;;  %5138 = vmatprep.mubr.bf16.mxu0 %v6564_v7 }
 0x1c7   : > { %v9235_v17 = vadd.f32 %v6989_v4, %v8916_v8  ;;  %v9237_v16 = vpop.f32.mrf.mxu1  ;;  %5139 = vmatmul.mubr.bf16.vlgmr.msra.gmra.mxu0 %v6548_v22  ;;  %v3224_v8 = vld [vmem:[#allocation3 + $0x6c] sm:$0x1] }
 0x1c8   : > { %v6991_v1 = vpop.f32.mrf.mxu0  ;;  %v3225_v46 = vsel %vm9031_vm15, 0, %v3224_v8 }
 0x1c9   : > { %v6992_v44 = vadd.f32 %v6991_v1, %v6990_v41  ;;  %v9239_v52 = vpop.f32.mrf.mxu1  ;;  %3226 = vst [vmem:[#allocation3 + $0x6c] sm:$0x1] %v3225_v46  ;;  %v3276_v1 = vld [vmem:[#allocation3 + $0x80] sm:$0x1] }
 0x1ca   : > { %v6993_v24 = vpop.f32.mrf.mxu0  ;;  %v3277_v8 = vsel %vm9062_vm0, 0, %v3276_v1 }
 0x1cb   : > { %v9242_v23 = vadd.f32 %v6992_v44, %v8920_v13  ;;  %v9244_v11 = vpop.f32.mrf.mxu1  ;;  %3278 = vst [vmem:[#allocation3 + $0x80] sm:$0x1] %v3277_v8 }
 0x1cc   : > { %v6994_v50 = vpop.f32.mrf.mxu0 }
 0x1cd   : > { %11126 = vst [vmem:[#allocation28_spill] sm:$0xff] %v9242_v23  ;;  %v6995_v14 = vadd.f32 %v6994_v50, %v6993_v24  ;;  %v9251_v35 = vpop.f32.mrf.mxu1 }
 0x1ce   : > { %v6996_v55 = vpop.f32.mrf.mxu0 }
 0x1cf   : > { %v9254_v13 = vadd.f32 %v6995_v14, %v8932_v34  ;;  %v9256_v22 = vpop.f32.mrf.mxu1 }
 0x1d0   : > { %v6997_v4 = vpop.f32.mrf.mxu0 }
 0x1d1   : > { %v6998_v7 = vadd.f32 %v6997_v4, %v6996_v55  ;;  %v9258_v41 = vpop.f32.mrf.mxu1 }
 0x1d2   : > { %v6999_v44 = vpop.f32.mrf.mxu0 }
 0x1d3   : > { %v9263_v24 = vadd.f32 %v6998_v7, %v8940_v59  ;;  %v9265_v19 = vpop.f32.mrf.mxu1  ;;  %v3274_v59 = vsel %vm9062_vm0, 0, %v3273_v15  ;;  %v3234_v7 = vsel %vm9031_vm15, 0, %v3233_v2 }
 0x1d4   : > { %v7000_v50 = vpop.f32.mrf.mxu0  ;;  %3275 = vst [vmem:[#allocation3 + $0x74] sm:$0x1] %v3274_v59  ;;  %3235 = vst [vmem:[#allocation3 + $0x90] sm:$0x1] %v3234_v7 }
 0x1d5   : > { %11127 = vst [vmem:[#allocation29_spill] sm:$0xff] %v9263_v24  ;;  %v7001_v34 = vadd.f32 %v7000_v50, %v6999_v44  ;;  %v9267_v46 = vpop.f32.mrf.mxu1  ;;  %v3230_v50 = vld [vmem:[#allocation3 + $0x84] sm:$0x1]  ;;  %v3282_v24 = vld [vmem:[#allocation3 + $0x98] sm:$0x1] }
 0x1d6   : > { %v7002_v14 = vpop.f32.mrf.mxu0 }
 0x1d7   : > { %v9270_v55 = vadd.f32 %v7001_v34, %v8943_v9  ;;  %v9272_v4 = vpop.f32.mrf.mxu1 }
 0x1d8   : > { %v7003_v63 = vpop.f32.mrf.mxu0 }
 0x1d9   : > { %11128 = vst [vmem:[#allocation30_spill] sm:$0xff] %v9270_v55  ;;  %v7004_v1 = vadd.f32 %v7003_v63, %v7002_v14  ;;  %v9274_v40 = vpop.f32.mrf.mxu1  ;;  %v3231_v63 = vsel %vm9031_vm15, 0, %v3230_v50 }
 0x1da   : > { %v7005_v44 = vpop.f32.mrf.mxu0  ;;  %3232 = vst [vmem:[#allocation3 + $0x84] sm:$0x1] %v3231_v63 }
 0x1db   : > { %v9281_v9 = vadd.f32 %v7004_v1, %v8946_v25  ;;  %v9283_v8 = vpop.f32.mrf.mxu1 }
 0x1dc   : > { %v7006_v34 = vpop.f32.mrf.mxu0 }
 0x1dd   : > { %11129 = vst [vmem:[#allocation31_spill] sm:$0xff] %v9281_v9  ;;  %v7007_v14 = vadd.f32 %v7006_v34, %v7005_v44  ;;  %v9287_v27 = vpop.f32.mrf.mxu1 }
 0x1de   : > { %v7008_v15 = vpop.f32.mrf.mxu0 }
 0x1df   : > { %v9290_v2 = vadd.f32 %v7007_v14, %v8952_v29  ;;  %v9292_v59 = vpop.f32.mrf.mxu1 }
 0x1e0   : > { %v7009_v7 = vpop.f32.mrf.mxu0  ;;  %v7119_v28 = vadd.f32 %v9292_v59, %v9287_v27  ;;  %v11164_v27 = vld [vmem:[#allocation28_spill] sm:$0xff] }
 0x1e1   : > { %11130 = vst [vmem:[#allocation32_spill] sm:$0xff] %v9290_v2  ;;  %v7010_v25 = vadd.f32 %v7009_v7, %v7008_v15  ;;  %v9294_v1 = vpop.f32.mrf.mxu1  ;;  %v3283_v15 = vsel %vm9062_vm0, 0, %v3282_v24  ;;  %v3279_v2 = vld [vmem:[#allocation3 + $0x8c] sm:$0x1] }
 0x1e2   : > { %v7011_v9 = vpop.f32.mrf.mxu0  ;;  %3284 = vst [vmem:[#allocation3 + $0x98] sm:$0x1] %v3283_v15 }
 0x1e3   : > { %v9297_v55 = vadd.f32 %v7010_v25, %v8958_v47  ;;  %v9299_v23 = vpop.f32.mrf.mxu1 }
 0x1e4   : > { %v7012_v44 = vpop.f32.mrf.mxu0 }
 0x1e5   : > { %11131 = vst [vmem:[#allocation33_spill] sm:$0xff] %v9297_v55  ;;  %v7013_v50 = vadd.f32 %v7012_v44, %v7011_v9  ;;  %v9301_v34 = vpop.f32.mrf.mxu1 }
 0x1e6   : > { %11132 = vst [vmem:[#allocation34_spill] sm:$0xff] %v9301_v34  ;;  %v7014_v63 = vpop.f32.mrf.mxu0 }
 0x1e7   : > { %v9304_v29 = vadd.f32 %v7013_v50, %v8961_v18  ;;  %v9306_v14 = vpop.f32.mrf.mxu1  ;;  %v3280_v18 = vsel %vm9062_vm0, 0, %v3279_v2  ;;  %v3239_v50 = vld [vmem:[#allocation3 + $0xa8] sm:$0x1] }
 0x1e8   : > { %11134 = vst [vmem:[#allocation36_spill] sm:$0xff] %v9306_v14  ;;  %v7015_v7 = vpop.f32.mrf.mxu0  ;;  %3281 = vst [vmem:[#allocation3 + $0x8c] sm:$0x1] %v3280_v18 }
 0x1e9   : > { %11133 = vst [vmem:[#allocation35_spill] sm:$0xff] %v9304_v29  ;;  %v7016_v47 = vadd.f32 %v7015_v7, %v7014_v63  ;;  %v9310_v25 = vpop.f32.mrf.mxu1  ;;  %v3236_v29 = vld [vmem:[#allocation3 + $0x9c] sm:$0x1]  ;;  %v3240_v63 = vsel %vm9031_vm15, 0, %v3239_v50 }
 0x1ea   : > { %v7017_v55 = vpop.f32.mrf.mxu0  ;;  %3241 = vst [vmem:[#allocation3 + $0xa8] sm:$0x1] %v3240_v63 }
 0x1eb   : > { %v9313_v9 = vadd.f32 %v7016_v47, %v8968_v26  ;;  %v9315_v44 = vpop.f32.mrf.mxu1  ;;  %v3237_v26 = vsel %vm9031_vm15, 0, %v3236_v29 }
 0x1ec   : > { %11136 = vst [vmem:[#allocation38_spill] sm:$0xff] %v9315_v44  ;;  %v7018_v34 = vpop.f32.mrf.mxu0  ;;  %3238 = vst [vmem:[#allocation3 + $0x9c] sm:$0x1] %v3237_v26  ;;  %v3288_v26 = vld [vmem:[#allocation3 + $0xb0] sm:$0x1] }
 0x1ed   : > { %11135 = vst [vmem:[#allocation37_spill] sm:$0xff] %v9313_v9  ;;  %v7019_v14 = vadd.f32 %v7018_v34, %v7017_v55  ;;  %v9319_v24 = vpop.f32.mrf.mxu1 }
 0x1ee   : > { %11137 = vst [vmem:[#allocation39_spill] sm:$0xff] %v9319_v24  ;;  %v7020_v15 = vpop.f32.mrf.mxu0 }
 0x1ef   : > { %v9326_v7 = vadd.f32 %v7019_v14, %v8974_v58  ;;  %v9328_v47 = vpop.f32.mrf.mxu1 }
 0x1f0   : > { %v7021_v2 = vpop.f32.mrf.mxu0 }
 0x1f1   : > { %11138 = vst [vmem:[#allocation40_spill] sm:$0xff] %v9326_v7  ;;  %v7022_v9 = vadd.f32 %v7021_v2, %v7020_v15  ;;  %v9330_v55 = vpop.f32.mrf.mxu1  ;;  %v3289_v2 = vsel %vm9062_vm0, 0, %v3288_v26 }
 0x1f2   : > { %v7023_v34 = vpop.f32.mrf.mxu0  ;;  %3290 = vst [vmem:[#allocation3 + $0xb0] sm:$0x1] %v3289_v2 }
 0x1f3   : > { %v9333_v18 = vadd.f32 %v7022_v9, %v8977_v61  ;;  %v9335_v50 = vpop.f32.mrf.mxu1 }
 0x1f4   : > { %v7024_v24 = vpop.f32.mrf.mxu0 }
 0x1f5   : > { %11139 = vst [vmem:[#allocation41_spill] sm:$0xff] %v9333_v18  ;;  %v7025_v29 = vadd.f32 %v7024_v24, %v7023_v34  ;;  %v9337_v44 = vpop.f32.mrf.mxu1 }
 0x1f6   : > { %11140 = vst [vmem:[#allocation42_spill] sm:$0xff] %v9337_v44  ;;  %v7026_v63 = vpop.f32.mrf.mxu0 }
 0x1f7   : > { %v9340_v58 = vadd.f32 %v7025_v29, %v8980_v49  ;;  %v9342_v14 = vpop.f32.mrf.mxu1  ;;  %v3285_v49 = vld [vmem:[#allocation3 + $0xa4] sm:$0x1]  ;;  %v3245_v29 = vld [vmem:[#allocation3 + $0xc0] sm:$0x1] }
 0x1f8   : > { %11142 = vst [vmem:[#allocation44_spill] sm:$0xff] %v9342_v14  ;;  %v7027_v15 = vpop.f32.mrf.mxu0  ;;  %v3286_v44 = vsel %vm9062_vm0, 0, %v3285_v49 }
 0x1f9   : > { %11141 = vst [vmem:[#allocation43_spill] sm:$0xff] %v9340_v58  ;;  %v7028_v7 = vadd.f32 %v7027_v15, %v7026_v63  ;;  %v9346_v61 = vpop.f32.mrf.mxu1  ;;  %v3246_v63 = vsel %vm9031_vm15, 0, %v3245_v29  ;;  %3287 = vst [vmem:[#allocation3 + $0xa4] sm:$0x1] %v3286_v44  ;;  %v3242_v15 = vld [vmem:[#allocation3 + $0xb4] sm:$0x1] }
 0x1fa   : > { %v7029_v9 = vpop.f32.mrf.mxu0  ;;  %3247 = vst [vmem:[#allocation3 + $0xc0] sm:$0x1] %v3246_v63 }
 0x1fb   : > { %v9349_v24 = vadd.f32 %v7028_v7, %v8986_v6  ;;  %v9351_v34 = vpop.f32.mrf.mxu1 }
 0x1fc   : > { %v7030_v18 = vpop.f32.mrf.mxu0 }
 0x1fd   : > { %11143 = vst [vmem:[#allocation45_spill] sm:$0xff] %v9349_v24  ;;  %v7031_v58 = vadd.f32 %v7030_v18, %v7029_v9  ;;  %v9353_v14 = vpop.f32.mrf.mxu1  ;;  %v3243_v18 = vsel %vm9031_vm15, 0, %v3242_v15  ;;  %v7068_v15 = vadd.f32 %v9048_v3, %v9038_v45 }
 0x1fe   : > { %v7032_v26 = vpop.f32.mrf.mxu0  ;;  %3244 = vst [vmem:[#allocation3 + $0xb4] sm:$0x1] %v3243_v18 }
 0x1ff   : > { %v9360_v6 = vadd.f32 %v7031_v58, %v8993_v56  ;;  %v9362_v7 = vpop.f32.mrf.mxu1 }
 0x200   : > { %v7033_v2 = vpop.f32.mrf.mxu0 }
 0x201   : > { %11144 = vst [vmem:[#allocation46_spill] sm:$0xff] %v9360_v6  ;;  %v7034_v9 = vadd.f32 %v7033_v2, %v7032_v26  ;;  %v9366_v24 = vpop.f32.mrf.mxu1  ;;  %v7065_v6 = vadd.f32 %v9027_v10, %v9017_v32  ;;  %v7071_v2 = vadd.f32 %v9069_v43, %v9053_v62  ;;  %v7077_v32 = vadd.f32 %v9106_v37, %v9096_v33  ;;  %v11146_v37 = vld [vmem:[#allocation8_spill] sm:$0xff] }
 0x202   : > { %v7035_v49 = vpop.f32.mrf.mxu0  ;;  %v7080_v10 = vadd.f32 %v9120_v20, %v9113_v48  ;;  %v7086_v33 = vadd.f32 %v9152_v12, %v9139_v36  ;;  %v7098_v36 = vadd.f32 %v9216_v5, %v9206_v30  ;;  %v7110_v30 = vadd.f32 %v9265_v19, %v9258_v41  ;;  %v11161_v41 = vld [vmem:[#allocation18_spill] sm:$0xff] }
 0x203   : > { %v9369_v29 = vadd.f32 %v7034_v9, %v9000_v53  ;;  %v9371_v44 = vpop.f32.mrf.mxu1  ;;  %v7074_v53 = vadd.f32 %v9086_v21, %v9073_v0  ;;  %v2826_v0 = vadd.f32 %v7065_v6, %v9025_v39  ;;  %v9400_v21 = vadd.f32 %v7068_v15, %v9046_v51  ;;  %v11151_v39 = vld [vmem:[#allocation20_spill] sm:$0xff]  ;;  %v11152_v6 = vld [vmem:[#allocation22_spill] sm:$0xff]  ;;  %v11153_v15 = vld [vmem:[#allocation23_spill] sm:$0xff] }
 0x204   : > { %v7036_v63 = vpop.f32.mrf.mxu0  ;;  %v7092_v51 = vadd.f32 %v11152_v6, %v11151_v39  ;;  %v7107_v39 = vadd.f32 %v9256_v22, %v9251_v35  ;;  %v11158_v6 = vld [vmem:[#allocation7_spill] sm:$0xff]  ;;  %v11160_v35 = vld [vmem:[#allocation24_spill] sm:$0xff] }
 0x205   : > { %v7037_v56 = vadd.f32 %v7036_v63, %v7035_v49  ;;  %v9373_v58 = vpop.f32.mrf.mxu1  ;;  %v3294_v63 = vld [vmem:[#allocation3 + $0xc8] sm:$0x1] }
 0x206   : > { %v7038_v26 = vpop.f32.mrf.mxu0  ;;  %v3295_v62 = vsel %vm9062_vm0, 0, %v3294_v63 }
 0x207   : > { %v9384_v18 = vadd.f32 %v7037_v56, %v9005_v57  ;;  %v9386_v9 = vpop.f32.mrf.mxu1  ;;  %v7083_v57 = vadd.f32 %v9135_v31, %v9128_v38  ;;  %3296 = vst [vmem:[#allocation3 + $0xc8] sm:$0x1] %v3295_v62  ;;  %v11147_v56 = vld [vmem:[#allocation9_spill] sm:$0xff]  ;;  %v11150_v31 = vld [vmem:[#allocation19_spill] sm:$0xff] }
 0x208   : > { %v7039_v49 = vpop.f32.mrf.mxu0  ;;  %v11149_v38 = vld [vmem:[#allocation13_spill] sm:$0xff] }
 0x209   : > { %11145 = vst [vmem:[#allocation47_spill] sm:$0xff] %v9384_v18  ;;  %v7040_v45 = vadd.f32 %v7039_v49, %v7038_v26  ;;  %v9392_v3 = vpop.f32.mrf.mxu1  ;;  %v2828_v26 = vadd.f32 %v7071_v2, %v11147_v56  ;;  %v11148_v49 = vld [vmem:[#allocation15_spill] sm:$0xff]  ;;  %v7089_v18 = vadd.f32 %v11150_v31, %v11149_v38  ;;  %v11154_v62 = vld [vmem:[#allocation25_spill] sm:$0xff]  ;;  %v7104_v31 = vadd.f32 %v9244_v11, %v9239_v52 }
 0x20a   : > { %v7041_v43 = vpop.f32.mrf.mxu0  ;;  %v2829_v63 = vadd.f32 %v7074_v53, %v11148_v49  ;;  %v7095_v60 = vadd.f32 %v11154_v62, %v11153_v15  ;;  %v11155_v53 = vld [vmem:[#allocation14_spill] sm:$0xff]  ;;  %v11159_v15 = vld [vmem:[#allocation16_spill] sm:$0xff] }
 0x20b   : > { %v9405_v48 = vadd.f32 %v7040_v45, %v11146_v37  ;;  %v9407_v20 = vpop.f32.mrf.mxu1  ;;  %v7101_v45 = vadd.f32 %v9237_v16, %v9230_v54  ;;  %v9424_v56 = vadd.f32 %v7077_v32, %v11155_v53  ;;  %v11156_v49 = vld [vmem:[#allocation10_spill] sm:$0xff]  ;;  %v11157_v54 = vld [vmem:[#allocation17_spill] sm:$0xff]  ;;  %v7113_v32 = vadd.f32 %v9272_v4, %v9267_v46 }
 0x20c   : > { %v7042_v12 = vpop.f32.mrf.mxu0  ;;  %v9427_v38 = vadd.f32 %v7080_v10, %v11156_v49  ;;  %v9436_v16 = vadd.f32 %v7083_v57, %v11157_v54  ;;  %v9444_v62 = vadd.f32 %v7086_v33, %v11159_v15  ;;  %v9449_v22 = vadd.f32 %v7095_v60, %v11160_v35  ;;  %v11162_v46 = vld [vmem:[#allocation21_spill] sm:$0xff]  ;;  %v11167_v49 = vld [vmem:[#allocation12_spill] sm:$0xff] }
 0x20d   : > { %v7043_v37 = vadd.f32 %v7042_v12, %v7041_v43  ;;  %v9421_v2 = vpop.f32.mrf.mxu1  ;;  %v3291_v43 = vld [vmem:[#allocation3 + $0xbc] sm:$0x1]  ;;  %v9452_v19 = vadd.f32 %v7089_v18, %v11161_v41  ;;  %v9455_v57 = vadd.f32 %v7098_v36, %v9214_v42  ;;  %v9458_v4 = vadd.f32 %v7092_v51, %v11162_v46  ;;  %v9472_v51 = vld [vmem:[%s11013_s2] ss:$0 sm:$0xff] }
 0x20e   : > { %v7044_v5 = vpop.f32.mrf.mxu0  ;;  %v3292_v52 = vsel %vm9062_vm0, 0, %v3291_v43  ;;  %v7116_v33 = vadd.f32 %v9283_v8, %v9274_v40  ;;  %v9465_v60 = vadd.f32 %v7101_v45, %v9235_v17  ;;  %v7122_v18 = vadd.f32 %v9299_v23, %v9294_v1  ;;  %v11163_v40 = vld [vmem:[#allocation29_spill] sm:$0xff]  ;;  %v11165_v17 = vld [vmem:[#allocation34_spill] sm:$0xff]  ;;  %v11166_v45 = vld [vmem:[#allocation36_spill] sm:$0xff] }
 0x20f   : > { %v9441_v10 = vadd.f32 %v7043_v37, %v11158_v6  ;;  %3293 = vst [vmem:[#allocation3 + $0xbc] sm:$0x1] %v3292_v52  ;;  %v7154_v12 = vpop.f32.mrf.mxu1  ;;  %v9475_v36 = vadd.f32 %v7107_v39, %v9254_v13  ;;  %v9478_v8 = vadd.f32 %v7110_v30, %v11163_v40  ;;  %v9481_v59 = vadd.f32 %v7104_v31, %v11164_v27  ;;  %v11169_v13 = vld [vmem:[#allocation38_spill] sm:$0xff]  ;;  %v11170_v43 = vld [vmem:[#allocation39_spill] sm:$0xff]  ;;  %v11172_v15 = vld [vmem:[#allocation44_spill] sm:$0xff] }
 0x210   : > { %v7045_v11 = vpop.f32.mrf.mxu0  ;;  %v7125_v53 = vadd.f32 %v11166_v45, %v11165_v17  ;;  %v7128_v39 = vadd.f32 %v11169_v13, %v9310_v25  ;;  %v7131_v30 = vadd.f32 %v9328_v47, %v11170_v43  ;;  %v7134_v31 = vadd.f32 %v9335_v50, %v9330_v55  ;;  %v11171_v6 = vld [vmem:[#allocation42_spill] sm:$0xff]  ;;  %v11173_v46 = vld [vmem:[#allocation32_spill] sm:$0xff]  ;;  %v11175_v40 = vld [vmem:[#allocation33_spill] sm:$0xff] }
 0x211   : > { %v7046_v37 = vadd.f32 %v7045_v11, %v7044_v5  ;;  %v11168_v5 = vld [vmem:[#allocation30_spill] sm:$0xff]  ;;  %v7137_v52 = vadd.f32 %v11172_v15, %v11171_v6  ;;  %v7156_v35 = vpop.f32.mrf.mxu1  ;;  %v7140_v25 = vadd.f32 %v9351_v34, %v9346_v61  ;;  %v7143_v47 = vadd.f32 %v9362_v7, %v9353_v14  ;;  %v11176_v45 = vld [vmem:[#allocation35_spill] sm:$0xff]  ;;  %v11178_v34 = vld [vmem:[#allocation41_spill] sm:$0xff] }
 0x212   : > { %v7673_v42 = vpop.f32.mrf.mxu0  ;;  %v9489_v54 = vadd.f32 %v7113_v32, %v11168_v5  ;;  %v9501_v32 = vadd.f32 %v7119_v28, %v11173_v46  ;;  %v7146_v55 = vadd.f32 %v9371_v44, %v9366_v24  ;;  %v9513_v27 = vadd.f32 %v7122_v18, %v11175_v40  ;;  %v11179_v7 = vld [vmem:[#allocation37_spill] sm:$0xff]  ;;  %v11180_v44 = vld [vmem:[#allocation43_spill] sm:$0xff] }
 0x213   : > { %v9486_v23 = vadd.f32 %v7046_v37, %v11167_v49  ;;  %v3089_v1 = vadd.f32 %v7673_v42, %v2828_v26  ;;  %v11174_v37 = vld [vmem:[#allocation31_spill] sm:$0xff]  ;;  %v9523_v14 = vadd.f32 %v7134_v31, %v11178_v34  ;;  %v9526_v24 = vadd.f32 %v7128_v39, %v11179_v7  ;;  %v7157_v5 = vpop.f32.mrf.mxu1  ;;  %v11181_v31 = vld [vmem:[#allocation46_spill] sm:$0xff] }
 0x214   : > { %v2960_v11 = vpop.f32.mrf.mxu0  ;;  %v9504_v42 = vadd.f32 %v7116_v33, %v11174_v37  ;;  %v9517_v33 = vadd.f32 %v7125_v53, %v11176_v45  ;;  %v9529_v18 = vadd.f32 %v7137_v52, %v11180_v44  ;;  %v9538_v15 = vadd.f32 %v7143_v47, %v11181_v31  ;;  %v11182_v52 = vld [vmem:[#allocation45_spill] sm:$0xff] }
 0x215   : > { %v3128_v26 = vadd.f32 %v9472_v51, %v3089_v1  ;;  %v3087_v41 = vadd.f32 %v2960_v11, %v2826_v0  ;;  %v11177_v1 = vld [vmem:[#allocation40_spill] sm:$0xff]  ;;  %v9541_v39 = vadd.f32 %v7146_v55, %v9369_v29  ;;  %v9544_v11 = vadd.f32 %v7140_v25, %v11182_v52 }
 0x216   : > { %v7674_v50 = vpop.f32.mrf.mxu0  ;;  %v9520_v61 = vadd.f32 %v7131_v30, %v11177_v1  ;;  %v9535_v30 = vadd.f32 %v9386_v9, %v9373_v58  ;;  %v9551_v58 = vadd.f32 %v7154_v12, %v9421_v2  ;;  %v9553_v9 = vadd.f32 %v7157_v5, %v7156_v35  ;;  %v3715_v1 = vld [vmem:[#allocation3 + $0xc] sm:$0xf] }
 0x217   : > { %v3160_v0 = vmax.f32 %v3128_v26, 0.0  ;;  %v3126_v28 = vadd.f32 %v9472_v51, %v3087_v41  ;;  %v3090_v17 = vadd.f32 %v7674_v50, %v2829_v63  ;;  %v9548_v26 = vadd.f32 %v9407_v20, %v9392_v3  ;;  %v3722_v20 = vld [vmem:[#allocation3 + $0x18] sm:$0xf] }
 0x218   : > { %v2963_v49 = vpop.f32.mrf.mxu0 }
 0x219   : > { %v6681_v13 = vpack.c.bf16 %v3160_v0, %v3160_v0  ;;  %v3158_v43 = vmax.f32 %v3126_v28, 0.0  ;;  %v3129_v63 = vadd.f32 %v9472_v51, %v3090_v17  ;;  %v3088_v53 = vadd.f32 %v2963_v49, %v9400_v21 }
 0x21a   : > { %v7677_v6 = vpop.f32.mrf.mxu0 }
 0x21b   : > { %v3411_v41 = vshrl.u32 %v6681_v13, 16  ;;  %v6679_v21 = vpack.c.bf16 %v3158_v43, %v3158_v43  ;;  %v3161_v46 = vmax.f32 %v3129_v63, 0.0  ;;  %v3127_v37 = vadd.f32 %v9472_v51, %v3088_v53 }
 0x21c   : > { %v3093_v29 = vadd.f32 %v7677_v6, %v9436_v16  ;;  %v2976_v47 = vpop.f32.mrf.mxu0  ;;  %v3414_v25 = vshll.u32 %v6681_v13, 16 }
 0x21d   : > { %v3413_v55 = vrot.slane %v3411_v41, 7  ;;  %v3394_v50 = vshrl.u32 %v6679_v21, 16  ;;  %v6682_v40 = vpack.c.bf16 %v3161_v46, %v3161_v46  ;;  %v3397_v2 = vshll.u32 %v6679_v21, 16 }
 0x21e   : > { %v3159_v12 = vmax.f32 %v3127_v37, 0.0  ;;  %v3132_v35 = vadd.f32 %v9472_v51, %v3093_v29  ;;  %v3091_v0 = vadd.f32 %v2976_v47, %v9424_v56  ;;  %v7678_v28 = vpop.f32.mrf.mxu0  ;;  %v3726_v56 = vld [vmem:[#allocation3 + $0x20] sm:$0x1] }
 0x21f   : > { %v3416_v16 = vor.u32 %v3414_v25, %v3413_v55  ;;  %v3417_v17 = vrot.slane %v3413_v55, 4  ;;  %v3396_v45 = vrot.slane %v3394_v50, 7  ;;  %v3419_v49 = vshrl.u32 %v6682_v40, 16 }
 0x220   : > { %v3422_v34 = vshll.u32 %v6682_v40, 16  ;;  %v6680_v7 = vpack.c.bf16 %v3159_v12, %v3159_v12  ;;  %v3164_v44 = vmax.f32 %v3132_v35, 0.0  ;;  %v3130_v5 = vadd.f32 %v9472_v51, %v3091_v0  ;;  %v2979_v13 = vpop.f32.mrf.mxu0 }
 0x221   : > { %v3723_v43 = vsel %vm9559_vm2, %v3416_v16, %v3722_v20  ;;  %v3399_v63 = vor.u32 %v3397_v2, %v3396_v45  ;;  %v3400_v53 = vrot.slane %v3396_v45, 4  ;;  %v3421_v6 = vrot.slane %v3419_v49, 7  ;;  %v3719_v45 = vld [vmem:[#allocation3 + $0x14] sm:$0x1] }
 0x222   : > { %3724 = vst [vmem:[#allocation3 + $0x18] sm:$0xf] %v3723_v43  ;;  %v3402_v31 = vshrl.u32 %v6680_v7, 16  ;;  %v3405_v52 = vshll.u32 %v6680_v7, 16  ;;  %v6685_v41 = vpack.c.bf16 %v3164_v44, %v3164_v44  ;;  %v3162_v21 = vmax.f32 %v3130_v5, 0.0  ;;  %v7681_v46 = vpop.f32.mrf.mxu0 }
 0x223   : > { %v3716_v37 = vsel %vm9559_vm2, %v3399_v63, %v3715_v1  ;;  %v3424_v29 = vor.u32 %v3422_v34, %v3421_v6  ;;  %v3426_v47 = vrot.slane %v3421_v6, 4  ;;  %v3094_v55 = vadd.f32 %v7678_v28, %v9444_v62  ;;  %v3736_v5 = vld [vmem:[#allocation3 + $0x30] sm:$0xf] }
 0x224   : > { %3717 = vst [vmem:[#allocation3 + $0xc] sm:$0xf] %v3716_v37  ;;  %v3404_v25 = vrot.slane %v3402_v31, 7  ;;  %v3445_v50 = vshrl.u32 %v6685_v41, 16  ;;  %v3448_v40 = vshll.u32 %v6685_v41, 16  ;;  %v6683_v20 = vpack.c.bf16 %v3162_v21, %v3162_v21  ;;  %v2992_v2 = vpop.f32.mrf.mxu0 }
 0x225   : > { %v3425_v35 = vsel %vm8109_vm7, %v3417_v17, %v3424_v29  ;;  %v3727_v16 = vsel %vm9031_vm15, %v3426_v47, %v3726_v56  ;;  %v3133_v49 = vadd.f32 %v9472_v51, %v3094_v55  ;;  %v3092_v1 = vadd.f32 %v2979_v13, %v9427_v38  ;;  %v7900_v56 = vld [vmem:[%s11014_s3 + $0x1f8] sm:$0xff]  }
 0x226   : > { %3725 = vst [vmem:[#allocation3 + $0x1c] sm:$0xf] %v3425_v35  ;;  %3728 = vst [vmem:[#allocation3 + $0x20] sm:$0x1] %v3727_v16  ;;  %v3407_v62 = vor.u32 %v3405_v52, %v3404_v25  ;;  %v3409_v28 = vrot.slane %v3404_v25, 4  ;;  %v3447_v34 = vrot.slane %v3445_v50, 7  ;;  %v7682_v44 = vpop.f32.mrf.mxu0  ;;  %v3097_v6 = vadd.f32 %v7681_v46, %v9449_v22  ;;  %7519 = vmatprep.subr.bf16.mxu0 %v7900_v56 }
 0x227   : > { %v3428_v7 = vshrl.u32 %v6683_v20, 16  ;;  %v3431_v43 = vshll.u32 %v6683_v20, 16  ;;  %v3165_v63 = vmax.f32 %v3133_v49, 0.0  ;;  %v3131_v17 = vadd.f32 %v9472_v51, %v3092_v1  ;;  %v7901_v38 = vld [vmem:[%s11014_s3 + $0x1b8] sm:$0xff]  }
 0x228   : > { %v3408_v13 = vsel %vm8109_vm7, %v3400_v53, %v3407_v62  ;;  %v3720_v31 = vsel %vm9031_vm15, %v3409_v28, %v3719_v45  ;;  %v3450_v52 = vor.u32 %v3448_v40, %v3447_v34  ;;  %v3451_v41 = vrot.slane %v3447_v34, 4  ;;  %v2995_v21 = vpop.f32.mrf.mxu0  ;;  %v3729_v55 = vld [vmem:[#allocation3 + $0x24] sm:$0xf]  ;;  %7520 = vmatpush3.bf16.msra.mxu0 %v7901_v38 }
 0x229   : > { %3718 = vst [vmem:[#allocation3 + $0x10] sm:$0xf] %v3408_v13  ;;  %3721 = vst [vmem:[#allocation3 + $0x14] sm:$0x1] %v3720_v31  ;;  %v3430_v22 = vrot.slane %v3428_v7, 7  ;;  %v6686_v46 = vpack.c.bf16 %v3165_v63, %v3165_v63  ;;  %v3163_v37 = vmax.f32 %v3131_v17, 0.0  ;;  %v3136_v29 = vadd.f32 %v9472_v51, %v3097_v6 }
 0x22a   : > { %v3737_v47 = vsel %vm9559_vm2, %v3450_v52, %v3736_v5  ;;  %v3095_v53 = vadd.f32 %v2992_v2, %v9452_v19  ;;  %v3098_v25 = vadd.f32 %v7682_v44, %v9455_v57  ;;  %v3096_v50 = vadd.f32 %v2995_v21, %v9458_v4  ;;  %v7685_v40 = vpop.f32.mrf.mxu0  ;;  %v3740_v7 = vld [vmem:[#allocation3 + $0x38] sm:$0x1] }
 0x22b   : > { %3738 = vst [vmem:[#allocation3 + $0x30] sm:$0xf] %v3737_v47  ;;  %v3433_v20 = vor.u32 %v3431_v43, %v3430_v22  ;;  %v3434_v35 = vrot.slane %v3430_v22, 4  ;;  %v3453_v16 = vshrl.u32 %v6686_v46, 16  ;;  %v3456_v45 = vshll.u32 %v6686_v46, 16 }
 0x22c   : > { %v6684_v49 = vpack.c.bf16 %v3163_v37, %v3163_v37  ;;  %v3168_v1 = vmax.f32 %v3136_v29, 0.0  ;;  %v3134_v62 = vadd.f32 %v9472_v51, %v3095_v53  ;;  %v3137_v28 = vadd.f32 %v9472_v51, %v3098_v25  ;;  %v3008_v34 = vpop.f32.mrf.mxu0  ;;  %v3733_v37 = vld [vmem:[#allocation3 + $0x2c] sm:$0x1] }
 0x22d   : > { %v3730_v19 = vsel %vm9559_vm2, %v3433_v20, %v3729_v55  ;;  %v3455_v57 = vrot.slane %v3453_v16, 7  ;;  %v3135_v4 = vadd.f32 %v9472_v51, %v3096_v50  ;;  %v3101_v2 = vadd.f32 %v7685_v40, %v9475_v36  ;;  %v3750_v40 = vld [vmem:[#allocation3 + $0x48] sm:$0xf] }
 0x22e   : > { %3731 = vst [vmem:[#allocation3 + $0x24] sm:$0xf] %v3730_v19  ;;  %v3436_v44 = vshrl.u32 %v6684_v49, 16  ;;  %v3439_v5 = vshll.u32 %v6684_v49, 16  ;;  %v6689_v43 = vpack.c.bf16 %v3168_v1, %v3168_v1  ;;  %v3166_v63 = vmax.f32 %v3134_v62, 0.0  ;;  %v7686_v13 = vpop.f32.mrf.mxu0 }
 0x22f   : > { %v3458_v17 = vor.u32 %v3456_v45, %v3455_v57  ;;  %v3460_v6 = vrot.slane %v3455_v57, 4  ;;  %v3169_v56 = vmax.f32 %v3137_v28, 0.0  ;;  %v3167_v38 = vmax.f32 %v3135_v4, 0.0  ;;  %v3743_v4 = vld [vmem:[#allocation3 + $0x3c] sm:$0xf] }
 0x230   : > { %v3438_v31 = vrot.slane %v3436_v44, 7  ;;  %v3479_v52 = vshrl.u32 %v6689_v43, 16  ;;  %v3482_v21 = vshll.u32 %v6689_v43, 16  ;;  %v6687_v22 = vpack.c.bf16 %v3166_v63, %v3166_v63  ;;  %v3011_v1 = vpop.f32.mrf.mxu0  ;;  %v3754_v63 = vld [vmem:[#allocation3 + $0x50] sm:$0x1] }
 0x231   : > { %v3459_v46 = vsel %vm8109_vm7, %v3451_v41, %v3458_v17  ;;  %v3741_v36 = vsel %vm9031_vm15, %v3460_v6, %v3740_v7  ;;  %v6690_v29 = vpack.c.bf16 %v3169_v56, %v3169_v56  ;;  %v6688_v47 = vpack.c.bf16 %v3167_v38, %v3167_v38  ;;  %v7906_v56 = vld [vmem:[%s11014_s3 + $0x1f0] sm:$0xff]  }
 0x232   : > { %3739 = vst [vmem:[#allocation3 + $0x34] sm:$0xf] %v3459_v46  ;;  %3742 = vst [vmem:[#allocation3 + $0x38] sm:$0x1] %v3741_v36  ;;  %v3441_v55 = vor.u32 %v3439_v5, %v3438_v31  ;;  %v3443_v53 = vrot.slane %v3438_v31, 4  ;;  %v3481_v25 = vrot.slane %v3479_v52, 7  ;;  %v3140_v17 = vadd.f32 %v9472_v51, %v3101_v2  ;;  %v7689_v36 = vpop.f32.mrf.mxu0  ;;  %7521 = vmatprep.subr.bf16.mxu0 %v7906_v56 }
 0x233   : > { %v3462_v50 = vshrl.u32 %v6687_v22, 16  ;;  %v3465_v20 = vshll.u32 %v6687_v22, 16  ;;  %v3487_v16 = vshrl.u32 %v6690_v29, 16  ;;  %v3490_v45 = vshll.u32 %v6690_v29, 16  ;;  %v7907_v38 = vld [vmem:[%s11014_s3 + $0x1b0] sm:$0xff]  }
 0x234   : > { %v3470_v49 = vshrl.u32 %v6688_v47, 16  ;;  %v3442_v41 = vsel %vm8109_vm7, %v3434_v35, %v3441_v55  ;;  %v3734_v62 = vsel %vm9031_vm15, %v3443_v53, %v3733_v37  ;;  %v3484_v28 = vor.u32 %v3482_v21, %v3481_v25  ;;  %v3747_v46 = vld [vmem:[#allocation3 + $0x44] sm:$0x1]  ;;  %7522 = vmatpush3.bf16.msra.mxu0 %v7907_v38 }
 0x235   : > { %v3485_v19 = vrot.slane %v3481_v25, 4  ;;  %3732 = vst [vmem:[#allocation3 + $0x28] sm:$0xf] %v3442_v41  ;;  %3735 = vst [vmem:[#allocation3 + $0x2c] sm:$0x1] %v3734_v62  ;;  %v3464_v57 = vrot.slane %v3462_v50, 7  ;;  %v3099_v35 = vadd.f32 %v3008_v34, %v9465_v60  ;;  %v3102_v6 = vadd.f32 %v7686_v13, %v9478_v8 }
 0x236   : > { %v3489_v7 = vrot.slane %v3487_v16, 7  ;;  %v3472_v44 = vrot.slane %v3470_v49, 7  ;;  %v3473_v5 = vshll.u32 %v6688_v47, 16  ;;  %v3751_v43 = vsel %vm9559_vm2, %v3484_v28, %v3750_v40  ;;  %v3024_v49 = vpop.f32.mrf.mxu0  ;;  %v11187_v41 = vld [vmem:[#allocation47_spill] sm:$0xff] }
 0x237   : > { %3752 = vst [vmem:[#allocation3 + $0x48] sm:$0xf] %v3751_v43  ;;  %v3467_v31 = vor.u32 %v3465_v20, %v3464_v57  ;;  %v3468_v52 = vrot.slane %v3464_v57, 4  ;;  %v3172_v60 = vmax.f32 %v3140_v17, 0.0  ;;  %v3138_v8 = vadd.f32 %v9472_v51, %v3099_v35  ;;  %v9654_v43 = vld [vmem:[#allocation3 + $0x10] sm:$0xf] }
 0x238   : > { %v3492_v21 = vor.u32 %v3490_v45, %v3489_v7  ;;  %v3494_v22 = vrot.slane %v3489_v7, 4  ;;  %v3475_v2 = vor.u32 %v3473_v5, %v3472_v44  ;;  %v3477_v37 = vrot.slane %v3472_v44, 4  ;;  %v9634_v45 = vld [vmem:[#allocation3 + $0xc] sm:$0xf]  ;;  %v9658_v35 = vpop.f32.mrf.mxu0 }
 0x239   : > { %v3744_v34 = vsel %vm9559_vm2, %v3467_v31, %v3743_v4  ;;  %v3141_v47 = vadd.f32 %v9472_v51, %v3102_v6  ;;  %v6693_v25 = vpack.c.bf16 %v3172_v60, %v3172_v60  ;;  %v3170_v50 = vmax.f32 %v3138_v8, 0.0 }
 0x23a   : > { %v3493_v13 = vsel %vm8109_vm7, %v3485_v19, %v3492_v21  ;;  %v3755_v29 = vsel %vm9031_vm15, %v3494_v22, %v3754_v63  ;;  %3745 = vst [vmem:[#allocation3 + $0x3c] sm:$0xf] %v3744_v34  ;;  %v3476_v55 = vsel %vm8109_vm7, %v3468_v52, %v3475_v2  ;;  %v3748_v53 = vsel %vm9031_vm15, %v3477_v37, %v3747_v46  ;;  %v7886_v46 = vld [vmem:[%s11014_s3 + $0x138] sm:$0xff]   ;;  %v3768_v37 = vld [vmem:[#allocation3 + $0x68] sm:$0x1]  ;;  %v7888_v34 = vld [vmem:[%s11014_s3 + $0x170] sm:$0xff]  }
 0x23b   : > { %3753 = vst [vmem:[#allocation3 + $0x4c] sm:$0xf] %v3493_v13  ;;  %3756 = vst [vmem:[#allocation3 + $0x50] sm:$0x1] %v3755_v29  ;;  %v3173_v40 = vmax.f32 %v3141_v47, 0.0  ;;  %v3100_v20 = vadd.f32 %v3011_v1, %v9481_v59  ;;  %v3105_v16 = vadd.f32 %v7689_v36, %v9501_v32  ;;  %v9638_v62 = vadd.f32 %v9535_v30, %v11187_v41 }
 0x23c   : > { %3746 = vst [vmem:[#allocation3 + $0x40] sm:$0xf] %v3476_v55  ;;  %3749 = vst [vmem:[#allocation3 + $0x44] sm:$0x1] %v3748_v53  ;;  %v3513_v28 = vshrl.u32 %v6693_v25, 16  ;;  %v6691_v19 = vpack.c.bf16 %v3170_v50, %v3170_v50  ;;  %v9642_v57 = vadd.f32 %v9551_v58, %v9441_v10  ;;  %v9646_v4 = vadd.f32 %v9548_v26, %v9405_v48  ;;  %v3027_v53 = vpop.f32.mrf.mxu0 }
 0x23d   : > { %v6694_v59 = vpack.c.bf16 %v3173_v40, %v3173_v40  ;;  %v3139_v32 = vadd.f32 %v9472_v51, %v3100_v20  ;;  %v3144_v1 = vadd.f32 %v9472_v51, %v3105_v16  ;;  %v9652_v7 = vadd.f32 %v9553_v9, %v9486_v23  ;;  %v3764_v58 = vld [vmem:[#allocation3 + $0x60] sm:$0xf]  ;;  %v3757_v9 = vld [vmem:[#allocation3 + $0x54] sm:$0xf]  ;;  %v3761_v50 = vld [vmem:[#allocation3 + $0x5c] sm:$0x1] }
 0x23e   : > { %v3515_v30 = vrot.slane %v3513_v28, 7  ;;  %v3516_v44 = vshll.u32 %v6693_v25, 16  ;;  %v3496_v5 = vshrl.u32 %v6691_v19, 16  ;;  %v3906_v10 = vshrl.u32 %v9634_v45, 16  ;;  %v11189_v16 = vld [vmem:[#allocation27_spill] sm:$0xff] }
 0x23f   : > { %v3521_v63 = vshrl.u32 %v6694_v59, 16  ;;  %v3171_v48 = vmax.f32 %v3139_v32, 0.0  ;;  %v3176_v26 = vmax.f32 %v3144_v1, 0.0  ;;  %v3909_v17 = vshll.u32 %v9634_v45, 16  ;;  %v9682_v28 = vld [vmem:[#allocation3 + $0x18] sm:$0xf] }
 0x240   : > { %v3518_v6 = vor.u32 %v3516_v44, %v3515_v30  ;;  %v3498_v56 = vrot.slane %v3496_v5, 7  ;;  %v3499_v38 = vshll.u32 %v6691_v19, 16  ;;  %v3524_v23 = vshll.u32 %v6694_v59, 16  ;;  %v7890_v19 = vld [vmem:[%s11014_s3 + $0x130] sm:$0xff]   ;;  %v7912_v5 = vld [vmem:[%s11014_s3 + $0x1e8] sm:$0xff]  }
 0x241   : > { %v3523_v31 = vrot.slane %v3521_v63, 7  ;;  %v6692_v52 = vpack.c.bf16 %v3171_v48, %v3171_v48  ;;  %v6697_v21 = vpack.c.bf16 %v3176_v26, %v3176_v26  ;;  %v9662_v22 = vcombine.low %v9634_v45, %v9654_v43  ;;  %v9691_v44 = vld [vmem:[#allocation3 + $0x1c] sm:$0xf]  ;;  %7523 = vmatprep.subr.bf16.mxu0 %v7912_v5 }
 0x242   : > { %v3765_v36 = vsel %vm9559_vm2, %v3518_v6, %v3764_v58  ;;  %v3501_v2 = vor.u32 %v3499_v38, %v3498_v56  ;;  %v3919_v60 = vshrl.u32 %v9654_v43, 16  ;;  %v3103_v8 = vadd.f32 %v3024_v49, %v9489_v54  ;;  %v11188_v54 = vld [vmem:[#allocation26_spill] sm:$0xff]  ;;  %v7913_v58 = vld [vmem:[%s11014_s3 + $0x1a8] sm:$0xff]  }
 0x243   : > { %v3519_v13 = vrot.slane %v3515_v30, 4  ;;  %3766 = vst [vmem:[#allocation3 + $0x60] sm:$0xf] %v3765_v36  ;;  %v3526_v29 = vor.u32 %v3524_v23, %v3523_v31  ;;  %v3528_v47 = vrot.slane %v3523_v31, 4  ;;  %v3504_v55 = vshrl.u32 %v6692_v52, 16  ;;  %4881 = vmatprep.mubr.bf16.mxu1 %v9662_v22  ;;  %v7892_v38 = vld [vmem:[%s11014_s3 + $0x168] sm:$0xff]   ;;  %v7693_v36 = vpop.f32.mrf.mxu0  ;;  %7524 = vmatpush3.bf16.msra.mxu0 %v7913_v58 }
 0x244   : > { %v3758_v25 = vsel %vm9559_vm2, %v3501_v2, %v3757_v9  ;;  %v3547_v40 = vshrl.u32 %v6697_v21, 16  ;;  %v6531_v20 = vrot.slane %v9634_v45, 9  ;;  %v11190_v49 = vcombine.low %v11188_v54, %v11189_v16  ;;  %v7902_v45 = vld [vmem:[%s11014_s3 + $0x158] sm:$0xff]  }
 0x245   : > { %v3142_v41 = vadd.f32 %v9472_v51, %v3103_v8  ;;  %3759 = vst [vmem:[#allocation3 + $0x54] sm:$0xf] %v3758_v25  ;;  %v3527_v59 = vsel %vm8109_vm7, %v3519_v13, %v3526_v29  ;;  %v3769_v32 = vsel %vm9031_vm15, %v3528_v47, %v3768_v37  ;;  %v3506_v1 = vrot.slane %v3504_v55, 7  ;;  %v9719_v47 = vld [vmem:[#allocation3 + $0x14] sm:$0x1] }
 0x246   : > { %4882 = vmatmul.mubr.bf16.vlgmr.msra.gmra.mxu1 %v11190_v49  ;;  %v3507_v30 = vshll.u32 %v6692_v52, 16  ;;  %3767 = vst [vmem:[#allocation3 + $0x64] sm:$0xf] %v3527_v59  ;;  %3770 = vst [vmem:[#allocation3 + $0x68] sm:$0x1] %v3769_v32  ;;  %v9699_v63 = vrot.slane %v3547_v40, 7  ;;  %v9710_v8 = vcombine.low %v9682_v28, %v9691_v44  ;;  %v3106_v13 = vadd.f32 %v9658_v35, %v9513_v27 }
 0x247   : > { %7408 = vmatpush3.bf16.msra.mxu1 %v7886_v46  ;;  %v3550_v48 = vshll.u32 %v6697_v21, 16  ;;  %v4322_v26 = vrot.slane %v9654_v43, 5  ;;  %v3174_v6 = vmax.f32 %v3142_v41, 0.0  ;;  %v3502_v23 = vrot.slane %v3498_v56, 4  ;;  %v3778_v52 = vld [vmem:[#allocation3 + $0x78] sm:$0xf] }
 0x248   : > { %7409 = vmatprep.subr.bf16.mxu1 %v7888_v34  ;;  %v3509_v9 = vor.u32 %v3507_v30, %v3506_v1  ;;  %v3511_v31 = vrot.slane %v3506_v1, 4  ;;  %v3930_v46 = vshrl.u32 %v9682_v28, 16  ;;  %v3933_v21 = vshll.u32 %v9682_v28, 16  ;;  %v7894_v55 = vld [vmem:[%s11014_s3 + $0x128] sm:$0xff]   ;;  %4889 = vmatprep.mubr.bf16.mxu1 %v9710_v8  ;;  %v3771_v59 = vld [vmem:[#allocation3 + $0x6c] sm:$0xf] }
 0x249   : > { %v3552_v2 = vor.u32 %v3550_v48, %v9699_v63  ;;  %v6695_v37 = vpack.c.bf16 %v3174_v6, %v3174_v6  ;;  %v3104_v29 = vadd.f32 %v3027_v53, %v9504_v42  ;;  %v3109_v27 = vadd.f32 %v7693_v36, %v9520_v61  ;;  %v7896_v42 = vld [vmem:[%s11014_s3 + $0x160] sm:$0xff]  }
 0x24a   : > { %v3510_v56 = vsel %vm8109_vm7, %v3502_v23, %v3509_v9  ;;  %v3762_v34 = vsel %vm9031_vm15, %v3511_v31, %v3761_v50  ;;  %v3943_v50 = vshrl.u32 %v9691_v44, 16  ;;  %v3145_v53 = vadd.f32 %v9472_v51, %v3106_v13  ;;  %v3040_v23 = vpop.f32.mrf.mxu0 }
 0x24b   : > { %7410 = vmatpush3.bf16.msra.mxu1 %v7890_v19  ;;  %3760 = vst [vmem:[#allocation3 + $0x58] sm:$0xf] %v3510_v56  ;;  %3763 = vst [vmem:[#allocation3 + $0x5c] sm:$0x1] %v3762_v34  ;;  %v3779_v25 = vsel %vm9559_vm2, %v3552_v2, %v3778_v52  ;;  %v3530_v40 = vshrl.u32 %v6695_v37, 16  ;;  %v3533_v35 = vshll.u32 %v6695_v37, 16  ;;  %v3143_v54 = vadd.f32 %v9472_v51, %v3104_v29 }
 0x24c   : > { %7411 = vmatprep.subr.bf16.mxu1 %v7892_v38  ;;  %3780 = vst [vmem:[#allocation3 + $0x78] sm:$0xf] %v3779_v25  ;;  %v4324_v16 = vrot.slane %v4322_v26, 4  ;;  %v3148_v41 = vadd.f32 %v9472_v51, %v3109_v27  ;;  %v4325_v19 = vrot.slane %v9719_v47, 5  ;;  %v3908_v61 = vrot.slane %v3906_v10, 4 }
 0x24d   : > { %v9734_v49 = vrot.slane %v3530_v40, 7  ;;  %v3177_v32 = vmax.f32 %v3145_v53, 0.0  ;;  %v3175_v1 = vmax.f32 %v3143_v54, 0.0  ;;  %v3911_v30 = vrot.slane %v3909_v17, 5  ;;  %v7898_v17 = vld [vmem:[%s11014_s3 + $0x120] sm:$0xff]  }
 0x24e   : > { %v3915_v5 = vshll.u32 %v9654_v43, 16  ;;  %v3180_v48 = vmax.f32 %v3148_v41, 0.0  ;;  %v4323_v38 = vsel %vm8137_vm11, %v6531_v20, %v4322_v26  ;;  %v4326_v10 = vsel %vm8137_vm11, %v4324_v16, %v4325_v19  ;;  %v7904_v43 = vld [vmem:[%s11014_s3 + $0x118] sm:$0xff]   ;;  %v7908_v16 = vld [vmem:[%s11014_s3 + $0x150] sm:$0xff]  }
 0x24f   : > { %7412 = vmatpush3.bf16.msra.mxu1 %v7894_v55  ;;  %v3535_v58 = vor.u32 %v3533_v35, %v9734_v49  ;;  %v6698_v9 = vpack.c.bf16 %v3177_v32, %v3177_v32  ;;  %v6696_v31 = vpack.c.bf16 %v3175_v1, %v3175_v1  ;;  %v9753_v52 = vcombine.low %v4323_v38, %v4326_v10 }
 0x250   : > { %7413 = vmatprep.subr.bf16.mxu1 %v7896_v42  ;;  %v3912_v36 = vor.u32 %v3911_v30, %v3908_v61  ;;  %v6701_v26 = vpack.c.bf16 %v3180_v48, %v3180_v48  ;;  %v3917_v2 = vrot.slane %v3915_v5, 5  ;;  %v3921_v37 = vrot.slane %v3919_v60, 4  ;;  %v9765_v42 = vpop.f32.mrf.mxu0 }
 0x251   : > { %v3772_v20 = vsel %vm9559_vm2, %v3535_v58, %v3771_v59  ;;  %v3553_v56 = vrot.slane %v9699_v63, 4  ;;  %v3536_v34 = vrot.slane %v9734_v49, 4  ;;  %v3555_v13 = vshrl.u32 %v6698_v9, 16  ;;  %4890 = vmatmul.mubr.bf16.gmra.mxu1 %v9753_v52  ;;  %v3782_v63 = vld [vmem:[#allocation3 + $0x80] sm:$0x1] }
 0x252   : > { %3773 = vst [vmem:[#allocation3 + $0x6c] sm:$0xf] %v3772_v20  ;;  %v3538_v29 = vshrl.u32 %v6696_v31, 16  ;;  %v3558_v55 = vshll.u32 %v6698_v9, 16  ;;  %v3541_v25 = vshll.u32 %v6696_v31, 16  ;;  %v3581_v40 = vshrl.u32 %v6701_v26, 16  ;;  %v3043_v9 = vpop.f32.mrf.mxu0 }
 0x253   : > { %v3922_v27 = vor.u32 %v3921_v37, %v3917_v2  ;;  %7414 = vmatpush3.bf16.msra.mxu1 %v7898_v17  ;;  %v3557_v60 = vrot.slane %v3555_v13, 7  ;;  %v3925_v53 = vshll.u32 %v9719_v47, 16  ;;  %v3107_v54 = vadd.f32 %v3040_v23, %v9517_v33  ;;  %v3775_v49 = vld [vmem:[#allocation3 + $0x74] sm:$0x1]  ;;  %v3792_v58 = vld [vmem:[#allocation3 + $0x90] sm:$0xf] }
 0x254   : > { %v3540_v35 = vrot.slane %v3538_v29, 7  ;;  %7415 = vmatprep.subr.bf16.mxu1 %v7902_v45  ;;  %v9775_v41 = vrot.slane %v3581_v40, 7  ;;  %v3584_v19 = vshll.u32 %v6701_v26, 16  ;;  %v3913_v61 = vrot.slane %v3912_v36, 4  ;;  %v7918_v33 = vld [vmem:[%s11014_s3 + $0x1e0] sm:$0xff]   ;;  %v7910_v31 = vld [vmem:[%s11014_s3 + $0x110] sm:$0xff]  }
 0x255   : > { %v3923_v59 = vrot.slane %v3922_v27, 4  ;;  %v3560_v32 = vor.u32 %v3558_v55, %v3557_v60  ;;  %v3562_v1 = vrot.slane %v3557_v60, 4  ;;  %v7919_v47 = vld [vmem:[%s11014_s3 + $0x1a0] sm:$0xff]   ;;  %v6532_v48 = vrot.slane %v9682_v28, 9  ;;  %v9786_v17 = vld [vmem:[#allocation3 + $0x24] sm:$0xf]  ;;  %7525 = vmatprep.subr.bf16.mxu0 %v7918_v33 }
 0x256   : > { %v3543_v30 = vor.u32 %v3541_v25, %v3540_v35  ;;  %v3545_v5 = vrot.slane %v3540_v35, 4  ;;  %v3586_v38 = vor.u32 %v3584_v19, %v9775_v41  ;;  %v3927_v10 = vrot.slane %v3925_v53, 5  ;;  %v9799_v37 = vld [vmem:[#allocation3 + $0x28] sm:$0xf]  ;;  %v7914_v13 = vld [vmem:[%s11014_s3 + $0x148] sm:$0xff]   ;;  %7526 = vmatpush3.bf16.msra.mxu0 %v7919_v47 }
 0x257   : > { %v3146_v23 = vadd.f32 %v9472_v51, %v3107_v54  ;;  %7416 = vmatpush3.bf16.msra.mxu1 %v7904_v43  ;;  %v3561_v36 = vsel %vm8109_vm7, %v3553_v56, %v3560_v32  ;;  %v3783_v45 = vsel %vm9031_vm15, %v3562_v1, %v3782_v63  ;;  %v4329_v40 = vrot.slane %v9691_v44, 5  ;;  %v3835_v63 = vld [vmem:[#allocation3 + $0x20] sm:$0x1] }
 0x258   : > { %v3544_v20 = vsel %vm8109_vm7, %v3536_v34, %v3543_v30  ;;  %v3776_v26 = vsel %vm9031_vm15, %v3545_v5, %v3775_v49  ;;  %7417 = vmatprep.subr.bf16.mxu1 %v7908_v16  ;;  %3781 = vst [vmem:[#allocation3 + $0x7c] sm:$0xf] %v3561_v36  ;;  %3784 = vst [vmem:[#allocation3 + $0x80] sm:$0x1] %v3783_v45  ;;  %v3793_v56 = vsel %vm9559_vm2, %v3586_v38, %v3792_v58  ;;  %v7697_v16 = vpop.f32.mrf.mxu0  ;;  %v7916_v49 = vld [vmem:[%s11014_s3 + $0x108] sm:$0xff]   ;;  %v7924_v38 = vld [vmem:[%s11014_s3 + $0x198] sm:$0xff]  }
 0x259   : > { %3774 = vst [vmem:[#allocation3 + $0x70] sm:$0xf] %v3544_v20  ;;  %3777 = vst [vmem:[#allocation3 + $0x74] sm:$0x1] %v3776_v26  ;;  %v3918_v34 = vsel %vm8153_vm13, %v3913_v61, %v3917_v2  ;;  %v3928_v55 = vsel %vm8153_vm13, %v3923_v59, %v3927_v10  ;;  %v3178_v25 = vmax.f32 %v3146_v23, 0.0  ;;  %v3587_v27 = vrot.slane %v9775_v41, 4 }
 0x25a   : > { %3794 = vst [vmem:[#allocation3 + $0x90] sm:$0xf] %v3793_v56  ;;  %v9812_v43 = vcombine.low %v3918_v34, %v3928_v55  ;;  %v3954_v60 = vshrl.u32 %v9786_v17, 16  ;;  %v9817_v2 = vcombine.low %v9786_v17, %v9799_v37  ;;  %v3932_v53 = vrot.slane %v3930_v46, 4  ;;  %v3056_v20 = vpop.f32.mrf.mxu0  ;;  %v7926_v26 = vld [vmem:[%s11014_s3 + $0x190] sm:$0xff]  }
 0x25b   : > { %v6699_v35 = vpack.c.bf16 %v3178_v25, %v3178_v25  ;;  %v3935_v54 = vrot.slane %v3933_v21, 5  ;;  %7418 = vmatpush3.bf16.msra.mxu1 %v7910_v31  ;;  %v3957_v19 = vshll.u32 %v9786_v17, 16  ;;  %v3967_v61 = vshrl.u32 %v9799_v37, 16  ;;  %v7920_v21 = vld [vmem:[%s11014_s3 + $0x140] sm:$0xff]  }
 0x25c   : > { %5146 = vmatprep.mubr.bf16.mxu0 %v9812_v43  ;;  %v3939_v59 = vshll.u32 %v9691_v44, 16  ;;  %v3945_v46 = vrot.slane %v3943_v50, 4  ;;  %7419 = vmatprep.subr.bf16.mxu1 %v7914_v13  ;;  %v3949_v30 = vshll.u32 %v3835_v63, 16  ;;  %v3110_v5 = vadd.f32 %v9765_v42, %v9523_v14  ;;  %v7923_v44 = vld [vmem:[%s11014_s3 + $0x1d8] sm:$0xff]  }
 0x25d   : > { %v3564_v32 = vshrl.u32 %v6699_v35, 16  ;;  %4897 = vmatprep.mubr.bf16.mxu1 %v9817_v2  ;;  %5147 = vmatmul.mubr.bf16.gmra.mxu0 %v9662_v22  ;;  %v3936_v1 = vor.u32 %v3935_v54, %v3932_v53  ;;  %v4332_v58 = vrot.slane %v3835_v63, 5  ;;  %v3108_v33 = vadd.f32 %v3043_v9, %v9526_v24  ;;  %v7925_v22 = vld [vmem:[%s11014_s3 + $0x1d0] sm:$0xff]   ;;  %v7922_v24 = vld [vmem:[%s11014_s3 + $0x100] sm:$0xff]  }
 0x25e   : > { %v3941_v50 = vrot.slane %v3939_v59, 5  ;;  %v3113_v47 = vadd.f32 %v7697_v16, %v9538_v15  ;;  %v3567_v14 = vshll.u32 %v6699_v35, 16  ;;  %v3149_v23 = vadd.f32 %v9472_v51, %v3110_v5  ;;  %7527 = vmatprep.subr.bf16.mxu0 %v7923_v44  ;;  %v3785_v15 = vld [vmem:[#allocation3 + $0x84] sm:$0xf]  ;;  %v9886_v44 = vld [vmem:[#allocation3 + $0x34] sm:$0xf] }
 0x25f   : > { %v9850_v10 = vrot.slane %v3564_v32, 7  ;;  %v3937_v42 = vrot.slane %v3936_v1, 4  ;;  %7420 = vmatpush3.bf16.msra.mxu1 %v7916_v49  ;;  %v3147_v31 = vadd.f32 %v9472_v51, %v3108_v33  ;;  %v4331_v45 = vrot.slane %v4329_v40, 4  ;;  %7528 = vmatpush3.bf16.msra.mxu0 %v7924_v38  ;;  %v9879_v32 = vpop.f32.mrf.mxu0 }
 0x260   : > { %v3946_v9 = vor.u32 %v3945_v46, %v3941_v50  ;;  %v3152_v36 = vadd.f32 %v9472_v51, %v3113_v47  ;;  %7421 = vmatprep.subr.bf16.mxu1 %v7920_v21  ;;  %v3951_v56 = vrot.slane %v3949_v30, 5  ;;  %v3181_v34 = vmax.f32 %v3149_v23, 0.0  ;;  %7529 = vmatprep.subr.bf16.mxu0 %v7925_v22  ;;  %v9877_v21 = vld [vmem:[#allocation3 + $0x30] sm:$0xf]  ;;  %v3796_v23 = vld [vmem:[#allocation3 + $0x98] sm:$0x1] }
 0x261   : > { %v3569_v13 = vor.u32 %v3567_v14, %v9850_v10  ;;  %v4330_v55 = vsel %vm8137_vm11, %v6532_v48, %v4329_v40  ;;  %v3179_v63 = vmax.f32 %v3147_v31, 0.0  ;;  %v4333_v53 = vsel %vm8137_vm11, %v4331_v45, %v4332_v58  ;;  %v7928_v58 = vld [vmem:[%s11014_s3 + $0x188] sm:$0xff]  }
 0x262   : > { %v3947_v25 = vrot.slane %v3946_v9, 4  ;;  %v3184_v35 = vmax.f32 %v3152_v36, 0.0  ;;  %v6702_v16 = vpack.c.bf16 %v3181_v34, %v3181_v34  ;;  %v9870_v49 = vcombine.low %v4330_v55, %v4333_v53 }
 0x263   : > { %v3786_v54 = vsel %vm9559_vm2, %v3569_v13, %v3785_v15  ;;  %v3111_v59 = vadd.f32 %v3056_v20, %v9529_v18  ;;  %7422 = vmatpush3.bf16.msra.mxu1 %v7922_v24  ;;  %v3942_v28 = vsel %vm8153_vm13, %v3937_v42, %v3941_v50  ;;  %v6700_v40 = vpack.c.bf16 %v3179_v63, %v3179_v63  ;;  %v7927_v50 = vld [vmem:[%s11014_s3 + $0x1c8] sm:$0xff]   ;;  %v3059_v20 = vpop.f32.mrf.mxu0  ;;  %v7931_v63 = vld [vmem:[%s11014_s3 + $0x238] sm:$0xff]  }
 0x264   : > { %3787 = vst [vmem:[#allocation3 + $0x84] sm:$0xf] %v3786_v54  ;;  %v3952_v48 = vsel %vm8153_vm13, %v3947_v25, %v3951_v56  ;;  %v6705_v46 = vpack.c.bf16 %v3184_v35, %v3184_v35  ;;  %7530 = vmatpush3.bf16.msra.mxu0 %v7926_v26  ;;  %v6533_v1 = vrot.slane %v9786_v17, 9  ;;  %v3589_v18 = vshrl.u32 %v6702_v16, 16  ;;  %4898 = vmatmul.mubr.bf16.gmra.mxu1 %v9870_v49  ;;  %v3806_v56 = vld [vmem:[#allocation3 + $0xa8] sm:$0xf] }
 0x265   : > { %v9882_v30 = vcombine.low %v3942_v28, %v3952_v48  ;;  %v3150_v5 = vadd.f32 %v9472_v51, %v3111_v59  ;;  %v3570_v33 = vrot.slane %v9850_v10, 4  ;;  %v4336_v47 = vrot.slane %v9799_v37, 5  ;;  %v7929_v51 = vld [vmem:[%s11014_s3 + $0x1c0] sm:$0xff]   ;;  %7531 = vmatprep.subr.bf16.mxu0 %v7927_v50  ;;  %7703 = vmatprep.subr.bf16.mxu1 %v7931_v63  ;;  %v7701_v50 = vpop.f32.mrf.mxu0 }
 0x266   : > { %v3572_v38 = vshrl.u32 %v6700_v40, 16  ;;  %v3615_v22 = vshrl.u32 %v6705_v46, 16  ;;  %v3591_v14 = vrot.slane %v3589_v18, 7  ;;  %v3592_v42 = vshll.u32 %v6702_v16, 16  ;;  %v3789_v10 = vld [vmem:[#allocation3 + $0x8c] sm:$0x1] }
 0x267   : > { %5154 = vmatprep.mubr.bf16.mxu0 %v9882_v30  ;;  %v3182_v24 = vmax.f32 %v3150_v5, 0.0  ;;  %v3978_v15 = vshrl.u32 %v9877_v21, 16  ;;  %v3575_v31 = vshll.u32 %v6700_v40, 16  ;;  %v3618_v45 = vshll.u32 %v6705_v46, 16  ;;  %v7930_v25 = vld [vmem:[%s11014_s3 + $0x180] sm:$0xff]  }
 0x268   : > { %v3574_v9 = vrot.slane %v3572_v38, 7  ;;  %v9901_v36 = vrot.slane %v3615_v22, 7  ;;  %5155 = vmatmul.mubr.bf16.gmra.mxu0 %v9710_v8  ;;  %v3594_v26 = vor.u32 %v3592_v42, %v3591_v14  ;;  %v3596_v13 = vrot.slane %v3591_v14, 4 }
 0x269   : > { %v6703_v34 = vpack.c.bf16 %v3182_v24, %v3182_v24  ;;  %v9906_v55 = vcombine.low %v9877_v21, %v9886_v44  ;;  %7532 = vmatpush3.bf16.msra.mxu0 %v7928_v58  ;;  %v3981_v16 = vshll.u32 %v9877_v21, 16  ;;  %v3956_v5 = vrot.slane %v3954_v60, 4 }
 0x26a   : > { %v3577_v35 = vor.u32 %v3575_v31, %v3574_v9  ;;  %v3579_v53 = vrot.slane %v3574_v9, 4  ;;  %v3620_v54 = vor.u32 %v3618_v45, %v9901_v36  ;;  %7533 = vmatprep.subr.bf16.mxu0 %v7929_v51  ;;  %v3595_v59 = vsel %vm8109_vm7, %v3587_v27, %v3594_v26  ;;  %v3838_v27 = vld [vmem:[#allocation3 + $0x2c] sm:$0x1]  ;;  %v3799_v51 = vld [vmem:[#allocation3 + $0x9c] sm:$0xf] }
 0x26b   : > { %v3797_v28 = vsel %vm9031_vm15, %v3596_v13, %v3796_v23  ;;  %v3598_v48 = vshrl.u32 %v6703_v34, 16  ;;  %v3601_v40 = vshll.u32 %v6703_v34, 16  ;;  %4905 = vmatprep.mubr.bf16.mxu1 %v9906_v55  ;;  %3795 = vst [vmem:[#allocation3 + $0x94] sm:$0xf] %v3595_v59  ;;  %v3959_v38 = vrot.slane %v3957_v19, 5 }
 0x26c   : > { %3798 = vst [vmem:[#allocation3 + $0x98] sm:$0x1] %v3797_v28  ;;  %v3578_v46 = vsel %vm8109_vm7, %v3570_v33, %v3577_v35  ;;  %v3790_v18 = vsel %vm9031_vm15, %v3579_v53, %v3789_v10  ;;  %v3807_v41 = vsel %vm9559_vm2, %v3620_v54, %v3806_v56  ;;  %v3963_v33 = vshll.u32 %v9799_v37, 16 }
 0x26d   : > { %3788 = vst [vmem:[#allocation3 + $0x88] sm:$0xf] %v3578_v46  ;;  %3791 = vst [vmem:[#allocation3 + $0x8c] sm:$0x1] %v3790_v18  ;;  %v9931_v58 = vrot.slane %v3598_v48, 7  ;;  %v3969_v22 = vrot.slane %v3967_v61, 4  ;;  %7534 = vmatpush3.bf16.msra.mxu0 %v7930_v25  ;;  %v3114_v42 = vadd.f32 %v9879_v32, %v9541_v39  ;;  %v3112_v23 = vadd.f32 %v3059_v20, %v9544_v11  ;;  %v3072_v32 = vpop.f32.mrf.mxu0 }
 0x26e   : > { %3808 = vst [vmem:[#allocation3 + $0xa8] sm:$0xf] %v3807_v41  ;;  %v3991_v14 = vshrl.u32 %v9886_v44, 16  ;;  %v6534_v60 = vrot.slane %v9877_v21, 9  ;;  %v3960_v9 = vor.u32 %v3959_v38, %v3956_v5  ;;  %v3965_v19 = vrot.slane %v3963_v33, 5 }
 0x26f   : > { %v3603_v24 = vor.u32 %v3601_v40, %v9931_v58  ;;  %v3973_v31 = vshll.u32 %v3838_v27, 16  ;;  %v4343_v10 = vrot.slane %v9886_v44, 5  ;;  %v9948_v61 = vld [vmem:[%s11013_s2] ss:$0 sm:$0xff]  ;;  %v3117_v39 = vadd.f32 %v7701_v50, %v9642_v57  ;;  %v9967_v18 = vld [vmem:[#allocation3 + $0x3c] sm:$0xf] }
 0x270   : > { %v3153_v45 = vadd.f32 %v9948_v61, %v3114_v42  ;;  %v3151_v26 = vadd.f32 %v9948_v61, %v3112_v23  ;;  %v3961_v20 = vrot.slane %v3960_v9, 4  ;;  %v3970_v13 = vor.u32 %v3969_v22, %v3965_v19  ;;  %v9979_v50 = vld [vmem:[#allocation3 + $0x40] sm:$0xf]  ;;  %v3810_v9 = vld [vmem:[#allocation3 + $0xb0] sm:$0x1] }
 0x271   : > { %v3800_v11 = vsel %vm9559_vm2, %v3603_v24, %v3799_v51  ;;  %v4339_v56 = vrot.slane %v3838_v27, 5  ;;  %v3156_v63 = vadd.f32 %v9948_v61, %v3117_v39  ;;  %v4338_v35 = vrot.slane %v4336_v47, 4  ;;  %v7702_v39 = vpop.f32.mrf.mxu0 }
 0x272   : > { %3801 = vst [vmem:[#allocation3 + $0x9c] sm:$0xf] %v3800_v11  ;;  %v3185_v34 = vmax.f32 %v3153_v45, 0.0  ;;  %v3183_v25 = vmax.f32 %v3151_v26, 0.0  ;;  %v3971_v53 = vrot.slane %v3970_v13, 4  ;;  %v3975_v54 = vrot.slane %v3973_v31, 5 }
 0x273   : > { %v4337_v57 = vsel %vm8137_vm11, %v6533_v1, %v4336_v47  ;;  %v3115_v59 = vadd.f32 %v3072_v32, %v9638_v62  ;;  %v3188_v40 = vmax.f32 %v3156_v63, 0.0  ;;  %v4340_v46 = vsel %vm8137_vm11, %v4338_v35, %v4339_v56 }
 0x274   : > { %v6706_v28 = vpack.c.bf16 %v3185_v34, %v3185_v34  ;;  %v6704_v48 = vpack.c.bf16 %v3183_v25, %v3183_v25  ;;  %v3966_v41 = vsel %vm8153_vm13, %v3961_v20, %v3965_v19  ;;  %v3976_v37 = vsel %vm8153_vm13, %v3971_v53, %v3975_v54  ;;  %v3803_v19 = vld [vmem:[#allocation3 + $0xa4] sm:$0x1] }
 0x275   : > { %v9973_v17 = vcombine.low %v4337_v57, %v4340_v46  ;;  %v3154_v1 = vadd.f32 %v9948_v61, %v3115_v59  ;;  %v3621_v62 = vrot.slane %v9901_v36, 4  ;;  %v9977_v47 = vcombine.low %v3966_v41, %v3976_v37  ;;  %v3820_v59 = vld [vmem:[#allocation3 + $0xc0] sm:$0xf]  ;;  %v3075_v41 = vpop.f32.mrf.mxu0  ;;  %v3813_v37 = vld [vmem:[#allocation3 + $0xb4] sm:$0xf] }
 0x276   : > { %v3623_v27 = vshrl.u32 %v6706_v28, 16  ;;  %v3606_v5 = vshrl.u32 %v6704_v48, 16  ;;  %v3604_v38 = vrot.slane %v9931_v58, 4  ;;  %v6709_v33 = vpack.c.bf16 %v3188_v40, %v3188_v40 }
 0x277   : > { %4906 = vmatmul.mubr.bf16.gmra.mxu1 %v9973_v17  ;;  %v3186_v22 = vmax.f32 %v3154_v1, 0.0  ;;  %v4002_v51 = vshrl.u32 %v9967_v18, 16  ;;  %5162 = vmatprep.mubr.bf16.mxu0 %v9977_v47  ;;  %v3626_v23 = vshll.u32 %v6706_v28, 16  ;;  %v3609_v36 = vshll.u32 %v6704_v48, 16  ;;  %v3841_v28 = vld [vmem:[#allocation3 + $0x38] sm:$0x1] }
 0x278   : > { %v3625_v42 = vrot.slane %v3623_v27, 7  ;;  %v3608_v24 = vrot.slane %v3606_v5, 7  ;;  %v3649_v31 = vshrl.u32 %v6709_v33, 16  ;;  %v4005_v26 = vshll.u32 %v9967_v18, 16  ;;  %5163 = vmatmul.mubr.bf16.gmra.mxu0 %v9817_v2 }
 0x279   : > { %v6707_v45 = vpack.c.bf16 %v3186_v22, %v3186_v22  ;;  %v9988_v58 = vcombine.low %v9967_v18, %v9979_v50  ;;  %v3652_v34 = vshll.u32 %v6709_v33, 16  ;;  %v3980_v63 = vrot.slane %v3978_v15, 4 }
 0x27a   : > { %v3628_v32 = vor.u32 %v3626_v23, %v3625_v42  ;;  %v3630_v11 = vrot.slane %v3625_v42, 4  ;;  %v3611_v20 = vor.u32 %v3609_v36, %v3608_v24  ;;  %v3613_v13 = vrot.slane %v3608_v24, 4 }
 0x27b   : > { %v9991_v56 = vrot.slane %v3649_v31, 7  ;;  %v3632_v25 = vshrl.u32 %v6707_v45, 16  ;;  %4913 = vmatprep.mubr.bf16.mxu1 %v9988_v58  ;;  %v3635_v40 = vshll.u32 %v6707_v45, 16  ;;  %v3983_v46 = vrot.slane %v3981_v16, 5 }
 0x27c   : > { %v3629_v35 = vsel %vm8109_vm7, %v3621_v62, %v3628_v32  ;;  %v3811_v53 = vsel %vm9031_vm15, %v3630_v11, %v3810_v9  ;;  %v3612_v54 = vsel %vm8109_vm7, %v3604_v38, %v3611_v20  ;;  %v3804_v57 = vsel %vm9031_vm15, %v3613_v13, %v3803_v19  ;;  %v10027_v13 = vld [vmem:[#allocation3 + $0x48] sm:$0xf] }
 0x27d   : > { %3809 = vst [vmem:[#allocation3 + $0xac] sm:$0xf] %v3629_v35  ;;  %3812 = vst [vmem:[#allocation3 + $0xb0] sm:$0x1] %v3811_v53  ;;  %v3654_v15 = vor.u32 %v3652_v34, %v9991_v56  ;;  %v10005_v48 = vrot.slane %v3632_v25, 7  ;;  %v4015_v1 = vshrl.u32 %v9979_v50, 16  ;;  %v3984_v22 = vor.u32 %v3983_v46, %v3980_v63 }
 0x27e   : > { %3802 = vst [vmem:[#allocation3 + $0xa0] sm:$0xf] %v3612_v54  ;;  %3805 = vst [vmem:[#allocation3 + $0xa4] sm:$0x1] %v3804_v57  ;;  %v6535_v62 = vrot.slane %v9967_v18, 9  ;;  %v3987_v27 = vshll.u32 %v9886_v44, 16  ;;  %v3118_v24 = vadd.f32 %v7702_v39, %v9652_v7  ;;  %v3116_v36 = vadd.f32 %v3075_v41, %v9646_v4 }
 0x27f   : > { %v3993_v5 = vrot.slane %v3991_v14, 4  ;;  %v3821_v38 = vsel %vm9559_vm2, %v3654_v15, %v3820_v59  ;;  %v3637_v33 = vor.u32 %v3635_v40, %v10005_v48  ;;  %v3997_v42 = vshll.u32 %v3841_v28, 16  ;;  %v10029_v7 = vld [vmem:[#allocation3 + $0x4c] sm:$0xf]  ;;  %v3844_v57 = vld [vmem:[#allocation3 + $0x44] sm:$0x1] }
 0x280   : > { %3822 = vst [vmem:[#allocation3 + $0xc0] sm:$0xf] %v3821_v38  ;;  %v4350_v16 = vrot.slane %v9979_v50, 5  ;;  %v3989_v23 = vrot.slane %v3987_v27, 5  ;;  %v3985_v19 = vrot.slane %v3984_v22, 4  ;;  %v4346_v14 = vrot.slane %v3841_v28, 5 }
 0x281   : > { %v3814_v9 = vsel %vm9559_vm2, %v3637_v33, %v3813_v37  ;;  %v4345_v31 = vrot.slane %v4343_v10, 4  ;;  %v3655_v45 = vrot.slane %v9991_v56, 4  ;;  %v3157_v11 = vadd.f32 %v9948_v61, %v3118_v24  ;;  %v3824_v22 = vld [vmem:[#allocation3 + $0xc8] sm:$0x1]  ;;  %v3817_v24 = vld [vmem:[#allocation3 + $0xbc] sm:$0x1] }
 0x282   : > { %3815 = vst [vmem:[#allocation3 + $0xb4] sm:$0xf] %v3814_v9  ;;  %v3994_v32 = vor.u32 %v3993_v5, %v3989_v23  ;;  %v3155_v20 = vadd.f32 %v9948_v61, %v3116_v36  ;;  %v3638_v3 = vrot.slane %v10005_v48, 4  ;;  %v3999_v4 = vrot.slane %v3997_v42, 5 }
 0x283   : > { %v4344_v39 = vsel %vm8137_vm11, %v6534_v60, %v4343_v10  ;;  %v4347_v56 = vsel %vm8137_vm11, %v4345_v31, %v4346_v14  ;;  %v3189_v25 = vmax.f32 %v3157_v11, 0.0  ;;  %v3990_v35 = vsel %vm8153_vm13, %v3985_v19, %v3989_v23 }
 0x284   : > { %v3995_v34 = vrot.slane %v3994_v32, 4  ;;  %v3187_v61 = vmax.f32 %v3155_v20, 0.0  ;;  %v10040_v63 = vcombine.low %v4344_v39, %v4347_v56  ;;  %v4026_v53 = vshrl.u32 %v10027_v13, 16 }
 0x285   : > { %v10047_v44 = vcombine.low %v10027_v13, %v10029_v7  ;;  %v4004_v21 = vrot.slane %v4002_v51, 4  ;;  %v6710_v10 = vpack.c.bf16 %v3189_v25, %v3189_v25  ;;  %v4007_v59 = vrot.slane %v4005_v26, 5  ;;  %v10078_v25 = vld [vmem:[#allocation3 + $0x58] sm:$0xf] }
 0x286   : > { %v4000_v60 = vsel %vm8153_vm13, %v3995_v34, %v3999_v4  ;;  %v6708_v54 = vpack.c.bf16 %v3187_v61, %v3187_v61  ;;  %4914 = vmatmul.mubr.bf16.gmra.mxu1 %v10040_v63  ;;  %v4029_v15 = vshll.u32 %v10027_v13, 16  ;;  %v4011_v48 = vshll.u32 %v9979_v50, 16 }
 0x287   : > { %v10056_v28 = vcombine.low %v3990_v35, %v4000_v60  ;;  %4921 = vmatprep.mubr.bf16.mxu1 %v10047_v44  ;;  %v4017_v51 = vrot.slane %v4015_v1, 4  ;;  %v3657_v40 = vshrl.u32 %v6710_v10, 16  ;;  %v4039_v41 = vshrl.u32 %v10029_v7, 16  ;;  %v3847_v60 = vld [vmem:[#allocation3 + $0x50] sm:$0x1] }
 0x288   : > { %v3640_v46 = vshrl.u32 %v6708_v54, 16  ;;  %v6536_v37 = vrot.slane %v10027_v13, 9  ;;  %v3660_v27 = vshll.u32 %v6710_v10, 16  ;;  %v4008_v5 = vor.u32 %v4007_v59, %v4004_v21  ;;  %v10068_v13 = vld [vmem:[#allocation3 + $0x54] sm:$0xf] }
 0x289   : > { %5170 = vmatprep.mubr.bf16.mxu0 %v10056_v28  ;;  %v4013_v26 = vrot.slane %v4011_v48, 5  ;;  %v4021_v38 = vshll.u32 %v3844_v57, 16  ;;  %v3659_v33 = vrot.slane %v3657_v40, 7  ;;  %v3643_v23 = vshll.u32 %v6708_v54, 16 }
 0x28a   : > { %v3642_v42 = vrot.slane %v3640_v46, 7  ;;  %5171 = vmatmul.mubr.bf16.gmra.mxu0 %v9906_v55  ;;  %v4352_v1 = vrot.slane %v4350_v16, 4  ;;  %v4357_v36 = vrot.slane %v10029_v7, 5  ;;  %v4009_v9 = vrot.slane %v4008_v5, 4  ;;  %v10107_v5 = vld [vmem:[#allocation3 + $0x60] sm:$0xf] }
 0x28b   : > { %v4018_v19 = vor.u32 %v4017_v51, %v4013_v26  ;;  %v4353_v14 = vrot.slane %v3844_v57, 5  ;;  %v3662_v31 = vor.u32 %v3660_v27, %v3659_v33  ;;  %v3664_v32 = vrot.slane %v3659_v33, 4 }
 0x28c   : > { %v3645_v11 = vor.u32 %v3643_v23, %v3642_v42  ;;  %v3647_v20 = vrot.slane %v3642_v42, 4  ;;  %v4023_v39 = vrot.slane %v4021_v38, 5  ;;  %v4351_v56 = vsel %vm8137_vm11, %v6535_v62, %v4350_v16 }
 0x28d   : > { %v4019_v4 = vrot.slane %v4018_v19, 4  ;;  %v4354_v34 = vsel %vm8137_vm11, %v4352_v1, %v4353_v14  ;;  %v3663_v61 = vsel %vm8109_vm7, %v3655_v45, %v3662_v31  ;;  %v3825_v35 = vsel %vm9031_vm15, %v3664_v32, %v3824_v22  ;;  %v10115_v22 = vld [vmem:[#allocation3 + $0x64] sm:$0xf] }
 0x28e   : > { %v3646_v21 = vsel %vm8109_vm7, %v3638_v3, %v3645_v11  ;;  %v3818_v18 = vsel %vm9031_vm15, %v3647_v20, %v3817_v24  ;;  %3823 = vst [vmem:[#allocation3 + $0xc4] sm:$0xf] %v3663_v61  ;;  %3826 = vst [vmem:[#allocation3 + $0xc8] sm:$0x1] %v3825_v35  ;;  %v4014_v50 = vsel %vm8153_vm13, %v4009_v9, %v4013_v26  ;;  %v4050_v45 = vshrl.u32 %v10068_v13, 16 }
 0x28f   : > { %3816 = vst [vmem:[#allocation3 + $0xb8] sm:$0xf] %v3646_v21  ;;  %3819 = vst [vmem:[#allocation3 + $0xbc] sm:$0x1] %v3818_v18  ;;  %v4024_v62 = vsel %vm8153_vm13, %v4019_v4, %v4023_v39  ;;  %v10092_v16 = vcombine.low %v4351_v56, %v4354_v34  ;;  %v10099_v0 = vcombine.low %v10068_v13, %v10078_v25  ;;  %v4028_v3 = vrot.slane %v4026_v53, 4 }
 0x290   : > { %v10095_v12 = vcombine.low %v4014_v50, %v4024_v62  ;;  %v4031_v10 = vrot.slane %v4029_v15, 5  ;;  %v4053_v54 = vshll.u32 %v10068_v13, 16  ;;  %v4063_v57 = vshrl.u32 %v10078_v25, 16  ;;  %v10136_v50 = vld [vmem:[#allocation3 + $0x6c] sm:$0xf] }
 0x291   : > { %4922 = vmatmul.mubr.bf16.gmra.mxu1 %v10092_v16  ;;  %v4035_v59 = vshll.u32 %v10029_v7, 16  ;;  %v4041_v48 = vrot.slane %v4039_v41, 4  ;;  %v4045_v40 = vshll.u32 %v3847_v60, 16  ;;  %v4360_v46 = vrot.slane %v3847_v60, 5  ;;  %v3850_v41 = vld [vmem:[#allocation3 + $0x5c] sm:$0x1] }
 0x292   : > { %5178 = vmatprep.mubr.bf16.mxu0 %v10095_v12  ;;  %4929 = vmatprep.mubr.bf16.mxu1 %v10099_v0  ;;  %v4032_v51 = vor.u32 %v4031_v10, %v4028_v3  ;;  %v4359_v27 = vrot.slane %v4357_v36, 4  ;;  %v4364_v15 = vrot.slane %v10078_v25, 5  ;;  %v4358_v26 = vsel %vm8137_vm11, %v6536_v37, %v4357_v36  ;;  %v3853_v60 = vld [vmem:[#allocation3 + $0x68] sm:$0x1] }
 0x293   : > { %5179 = vmatmul.mubr.bf16.gmra.mxu0 %v9988_v58  ;;  %v4037_v53 = vrot.slane %v4035_v59, 5  ;;  %v4074_v42 = vshrl.u32 %v10107_v5, 16  ;;  %v4052_v23 = vrot.slane %v4050_v45, 4  ;;  %v4047_v1 = vrot.slane %v4045_v40, 5 }
 0x294   : > { %v4361_v7 = vsel %vm8137_vm11, %v4359_v27, %v4360_v46  ;;  %v4033_v38 = vrot.slane %v4032_v51, 4  ;;  %v4055_v24 = vrot.slane %v4053_v54, 5  ;;  %v4059_v9 = vshll.u32 %v10078_v25, 16  ;;  %v10144_v54 = vld [vmem:[#allocation3 + $0x70] sm:$0xf] }
 0x295   : > { %v4042_v33 = vor.u32 %v4041_v48, %v4037_v53  ;;  %v4065_v19 = vrot.slane %v4063_v57, 4  ;;  %v10119_v31 = vcombine.low %v4358_v26, %v4361_v7  ;;  %v4077_v37 = vshll.u32 %v10107_v5, 16 }
 0x296   : > { %v4069_v36 = vshll.u32 %v3850_v41, 16  ;;  %v10124_v32 = vcombine.low %v10107_v5, %v10115_v22  ;;  %v4056_v11 = vor.u32 %v4055_v24, %v4052_v23  ;;  %v4061_v20 = vrot.slane %v4059_v9, 5  ;;  %v10163_v23 = vld [vmem:[#allocation3 + $0x78] sm:$0xf] }
 0x297   : > { %v4043_v14 = vrot.slane %v4042_v33, 4  ;;  %v4366_v4 = vrot.slane %v4364_v15, 4  ;;  %v6537_v39 = vrot.slane %v10068_v13, 9  ;;  %v4038_v56 = vsel %vm8153_vm13, %v4033_v38, %v4037_v53 }
 0x298   : > { %11193 = vst [vmem:[#allocation8_spill] sm:$0xff] %v10124_v32  ;;  %v4087_v25 = vshrl.u32 %v10115_v22, 16  ;;  %v4057_v35 = vrot.slane %v4056_v11, 4  ;;  %v4066_v21 = vor.u32 %v4065_v19, %v4061_v20  ;;  %v4367_v18 = vrot.slane %v3850_v41, 5  ;;  %v10170_v11 = vld [vmem:[#allocation3 + $0x7c] sm:$0xf] }
 0x299   : > { %v4048_v34 = vsel %vm8153_vm13, %v4043_v14, %v4047_v1  ;;  %4930 = vmatmul.mubr.bf16.gmra.mxu1 %v10119_v31  ;;  %v4371_v13 = vrot.slane %v10115_v22, 5  ;;  %v4071_v62 = vrot.slane %v4069_v36, 5  ;;  %v4365_v45 = vsel %vm8137_vm11, %v6537_v39, %v4364_v15  ;;  %v3856_v14 = vld [vmem:[#allocation3 + $0x74] sm:$0x1] }
 0x29a   : > { %v10133_v61 = vcombine.low %v4038_v56, %v4048_v34  ;;  %4937 = vmatprep.mubr.bf16.mxu1 %v10124_v32  ;;  %v4067_v3 = vrot.slane %v4066_v21, 4  ;;  %v4368_v10 = vsel %vm8137_vm11, %v4366_v4, %v4367_v18  ;;  %v4076_v57 = vrot.slane %v4074_v42, 4 }
 0x29b   : > { %v4079_v59 = vrot.slane %v4077_v37, 5  ;;  %v4098_v48 = vshrl.u32 %v10136_v50, 16  ;;  %v4101_v51 = vshll.u32 %v10136_v50, 16  ;;  %v4083_v40 = vshll.u32 %v10115_v22, 16 }
 0x29c   : > { %5186 = vmatprep.mubr.bf16.mxu0 %v10133_v61  ;;  %v4089_v46 = vrot.slane %v4087_v25, 4  ;;  %v4062_v27 = vsel %vm8153_vm13, %v4057_v35, %v4061_v20  ;;  %v4072_v53 = vsel %vm8153_vm13, %v4067_v3, %v4071_v62  ;;  %v4093_v26 = vshll.u32 %v3853_v60, 16 }
 0x29d   : > { %5187 = vmatmul.mubr.bf16.gmra.mxu0 %v10047_v44  ;;  %v4080_v15 = vor.u32 %v4079_v59, %v4076_v57  ;;  %v10154_v7 = vcombine.low %v4062_v27, %v4072_v53  ;;  %v10156_v41 = vcombine.low %v4365_v45, %v4368_v10  ;;  %v4111_v38 = vshrl.u32 %v10144_v54, 16  ;;  %v10191_v27 = vld [vmem:[#allocation3 + $0x84] sm:$0xf]  ;;  %v3859_v53 = vld [vmem:[#allocation3 + $0x80] sm:$0x1] }
 0x29e   : > { %v4085_v33 = vrot.slane %v4083_v40, 5  ;;  %v10161_v42 = vcombine.low %v10136_v50, %v10144_v54  ;;  %v4373_v22 = vrot.slane %v4371_v13, 4  ;;  %v6538_v1 = vrot.slane %v10107_v5, 9 }
 0x29f   : > { %5194 = vmatprep.mubr.bf16.mxu0 %v10154_v7  ;;  %v4378_v24 = vrot.slane %v10144_v54, 5  ;;  %v4081_v9 = vrot.slane %v4080_v15, 4  ;;  %v4095_v37 = vrot.slane %v4093_v26, 5  ;;  %v4374_v36 = vrot.slane %v3853_v60, 5 }
 0x2a0   : > { %11194 = vst [vmem:[#allocation9_spill] sm:$0xff] %v10161_v42  ;;  %v4090_v19 = vor.u32 %v4089_v46, %v4085_v33  ;;  %v4100_v20 = vrot.slane %v4098_v48, 4  ;;  %v4103_v4 = vrot.slane %v4101_v51, 5  ;;  %v4122_v5 = vshrl.u32 %v10163_v23, 16 }
 0x2a1   : > { %4938 = vmatmul.mubr.bf16.gmra.mxu1 %v10156_v41  ;;  %v4107_v56 = vshll.u32 %v10144_v54, 16  ;;  %v4113_v34 = vrot.slane %v4111_v38, 4  ;;  %v4375_v25 = vsel %vm8137_vm11, %v4373_v22, %v4374_v36  ;;  %v4125_v35 = vshll.u32 %v10163_v23, 16 }
 0x2a2   : > { %4945 = vmatprep.mubr.bf16.mxu1 %v10161_v42  ;;  %v4091_v39 = vrot.slane %v4090_v19, 4  ;;  %v4104_v21 = vor.u32 %v4103_v4, %v4100_v20  ;;  %v4117_v18 = vshll.u32 %v3856_v14, 16  ;;  %v4086_v62 = vsel %vm8153_vm13, %v4081_v9, %v4085_v33  ;;  %v10199_v33 = vld [vmem:[#allocation3 + $0x88] sm:$0xf] }
 0x2a3   : > { %v4135_v60 = vshrl.u32 %v10170_v11, 16  ;;  %v4109_v3 = vrot.slane %v4107_v56, 5  ;;  %v6539_v10 = vrot.slane %v10136_v50, 9  ;;  %v4372_v57 = vsel %vm8137_vm11, %v6538_v1, %v4371_v13 }
 0x2a4   : > { %v4096_v45 = vsel %vm8153_vm13, %v4091_v39, %v4095_v37  ;;  %v4380_v59 = vrot.slane %v4378_v24, 4  ;;  %v10188_v48 = vcombine.low %v4372_v57, %v4375_v25  ;;  %v4385_v51 = vrot.slane %v10170_v11, 5 }
 0x2a5   : > { %5195 = vmatmul.mubr.bf16.gmra.mxu0 %v10099_v0  ;;  %v10184_v54 = vcombine.low %v4086_v62, %v4096_v45  ;;  %v4105_v40 = vrot.slane %v4104_v21, 4  ;;  %v4114_v46 = vor.u32 %v4113_v34, %v4109_v3  ;;  %v10196_v50 = vcombine.low %v10163_v23, %v10170_v11  ;;  %v10220_v45 = vld [vmem:[#allocation3 + $0x90] sm:$0xf] }
 0x2a6   : > { %v4119_v15 = vrot.slane %v4117_v18, 5  ;;  %v4381_v26 = vrot.slane %v3856_v14, 5  ;;  %v4124_v38 = vrot.slane %v4122_v5, 4  ;;  %v4127_v22 = vrot.slane %v4125_v35, 5 }
 0x2a7   : > { %5202 = vmatprep.mubr.bf16.mxu0 %v10184_v54  ;;  %11195 = vst [vmem:[#allocation15_spill] sm:$0xff] %v10196_v50  ;;  %v4115_v13 = vrot.slane %v4114_v46, 4  ;;  %v4131_v1 = vshll.u32 %v10170_v11, 16  ;;  %v4137_v9 = vrot.slane %v4135_v60, 4  ;;  %v4146_v37 = vshrl.u32 %v10191_v27, 16 }
 0x2a8   : > { %v4382_v19 = vsel %vm8137_vm11, %v4380_v59, %v4381_v26  ;;  %v4149_v36 = vshll.u32 %v10191_v27, 16  ;;  %v4141_v14 = vshll.u32 %v3859_v53, 16  ;;  %v4110_v20 = vsel %vm8153_vm13, %v4105_v40, %v4109_v3  ;;  %v10222_v3 = vld [vmem:[#allocation3 + $0x94] sm:$0xf]  ;;  %v3862_v46 = vld [vmem:[#allocation3 + $0x8c] sm:$0x1] }
 0x2a9   : > { %4946 = vmatmul.mubr.bf16.gmra.mxu1 %v10188_v48  ;;  %v4120_v4 = vsel %vm8153_vm13, %v4115_v13, %v4119_v15  ;;  %v4128_v39 = vor.u32 %v4127_v22, %v4124_v38  ;;  %v4133_v5 = vrot.slane %v4131_v1, 5  ;;  %v4159_v56 = vshrl.u32 %v10199_v33, 16 }
 0x2aa   : > { %4953 = vmatprep.mubr.bf16.mxu1 %v10196_v50  ;;  %v10211_v11 = vcombine.low %v4110_v20, %v4120_v4  ;;  %v4379_v34 = vsel %vm8137_vm11, %v6539_v10, %v4378_v24  ;;  %v4143_v18 = vrot.slane %v4141_v14, 5  ;;  %v4387_v62 = vrot.slane %v4385_v51, 4 }
 0x2ab   : > { %v4138_v25 = vor.u32 %v4137_v9, %v4133_v5  ;;  %v10218_v35 = vcombine.low %v4379_v34, %v4382_v19  ;;  %v4129_v21 = vrot.slane %v4128_v39, 4  ;;  %v4148_v57 = vrot.slane %v4146_v37, 4  ;;  %v10247_v39 = vld [vmem:[#allocation3 + $0xa0] sm:$0xf] }
 0x2ac   : > { %11196 = vst [vmem:[#allocation13_spill] sm:$0xff] %v10211_v11  ;;  %v4151_v59 = vrot.slane %v4149_v36, 5  ;;  %v4155_v40 = vshll.u32 %v10199_v33, 16  ;;  %v10227_v24 = vcombine.low %v10191_v27, %v10199_v33  ;;  %v4388_v10 = vrot.slane %v3859_v53, 5 }
 0x2ad   : > { %5203 = vmatmul.mubr.bf16.gmra.mxu0 %v10124_v32  ;;  %11197 = vst [vmem:[#allocation19_spill] sm:$0xff] %v10218_v35  ;;  %v4139_v60 = vrot.slane %v4138_v25, 4  ;;  %v4161_v15 = vrot.slane %v4159_v56, 4  ;;  %v6540_v26 = vrot.slane %v10163_v23, 9  ;;  %v4392_v38 = vrot.slane %v10199_v33, 5 }
 0x2ae   : > { %5210 = vmatprep.mubr.bf16.mxu0 %v10211_v11  ;;  %11198 = vst [vmem:[#allocation20_spill] sm:$0xff] %v10227_v24  ;;  %v4157_v22 = vrot.slane %v4155_v40, 5  ;;  %v4389_v1 = vsel %vm8137_vm11, %v4387_v62, %v4388_v10  ;;  %v4170_v9 = vshrl.u32 %v10220_v45, 16  ;;  %v4173_v53 = vshll.u32 %v10220_v45, 16  ;;  %v10253_v62 = vld [vmem:[#allocation3 + $0x9c] sm:$0xf] }
 0x2af   : > { %v4144_v13 = vsel %vm8153_vm13, %v4139_v60, %v4143_v18  ;;  %v4183_v19 = vshrl.u32 %v10222_v3, 16  ;;  %v4134_v23 = vsel %vm8153_vm13, %v4129_v21, %v4133_v5  ;;  %v4152_v37 = vor.u32 %v4151_v59, %v4148_v57  ;;  %v3865_v40 = vld [vmem:[#allocation3 + $0x98] sm:$0x1] }
 0x2b0   : > { %v4162_v33 = vor.u32 %v4161_v15, %v4157_v22  ;;  %v4165_v36 = vshll.u32 %v3862_v46, 16  ;;  %v10242_v14 = vcombine.low %v4134_v23, %v4144_v13  ;;  %v4386_v20 = vsel %vm8137_vm11, %v6540_v26, %v4385_v51 }
 0x2b1   : > { %4954 = vmatmul.mubr.bf16.gmra.mxu1 %v10218_v35  ;;  %v10250_v56 = vcombine.low %v4386_v20, %v4389_v1  ;;  %v4394_v34 = vrot.slane %v4392_v38, 4  ;;  %v4179_v5 = vshll.u32 %v10222_v3, 16  ;;  %v4185_v25 = vrot.slane %v4183_v19, 4 }
 0x2b2   : > { %4961 = vmatprep.mubr.bf16.mxu1 %v10227_v24  ;;  %11199 = vst [vmem:[#allocation22_spill] sm:$0xff] %v10242_v14  ;;  %v4163_v4 = vrot.slane %v4162_v33, 4  ;;  %v4153_v21 = vrot.slane %v4152_v37, 4  ;;  %v4167_v18 = vrot.slane %v4165_v36, 5  ;;  %v4172_v60 = vrot.slane %v4170_v9, 4 }
 0x2b3   : > { %11200 = vst [vmem:[#allocation23_spill] sm:$0xff] %v10250_v56  ;;  %v4175_v57 = vrot.slane %v4173_v53, 5  ;;  %v10257_v51 = vcombine.low %v10220_v45, %v10222_v3  ;;  %v4207_v59 = vshrl.u32 %v10247_v39, 16  ;;  %v4181_v10 = vrot.slane %v4179_v5, 5 }
 0x2b4   : > { %v4399_v15 = vrot.slane %v10222_v3, 5  ;;  %v4168_v26 = vsel %vm8153_vm13, %v4163_v4, %v4167_v18  ;;  %v4395_v13 = vrot.slane %v3862_v46, 5  ;;  %v6541_v1 = vrot.slane %v10191_v27, 9 }
 0x2b5   : > { %5211 = vmatmul.mubr.bf16.gmra.mxu0 %v10161_v42  ;;  %11201 = vst [vmem:[#allocation25_spill] sm:$0xff] %v10257_v51  ;;  %v4194_v9 = vshrl.u32 %v10253_v62, 16  ;;  %v4197_v53 = vshll.u32 %v10253_v62, 16  ;;  %v4186_v19 = vor.u32 %v4185_v25, %v4181_v10  ;;  %v4158_v23 = vsel %vm8153_vm13, %v4153_v21, %v4157_v22  ;;  %v10278_v25 = vld [vmem:[#allocation3 + $0xac] sm:$0xf] }
 0x2b6   : > { %5218 = vmatprep.mubr.bf16.mxu0 %v10242_v14  ;;  %v4396_v37 = vsel %vm8137_vm11, %v4394_v34, %v4395_v13  ;;  %v4176_v3 = vor.u32 %v4175_v57, %v4172_v60  ;;  %v4189_v33 = vshll.u32 %v3865_v40, 16  ;;  %v10272_v36 = vcombine.low %v4158_v23, %v4168_v26  ;;  %v10283_v34 = vld [vmem:[#allocation3 + $0xa8] sm:$0xf] }
 0x2b7   : > { %v4203_v46 = vshll.u32 %v10247_v39, 16  ;;  %v4209_v27 = vrot.slane %v4207_v59, 4  ;;  %v4393_v20 = vsel %vm8137_vm11, %v6541_v1, %v4392_v38  ;;  %v4187_v4 = vrot.slane %v4186_v19, 4  ;;  %v3868_v38 = vld [vmem:[#allocation3 + $0xa4] sm:$0x1] }
 0x2b8   : > { %11202 = vst [vmem:[#allocation14_spill] sm:$0xff] %v10272_v36  ;;  %v4401_v5 = vrot.slane %v4399_v15, 4  ;;  %v10281_v22 = vcombine.low %v4393_v20, %v4396_v37  ;;  %v4196_v21 = vrot.slane %v4194_v9, 4  ;;  %v4199_v18 = vrot.slane %v4197_v53, 5  ;;  %v3877_v42 = vld [vmem:[#allocation3 + $0xc8] sm:$0x1] }
 0x2b9   : > { %4962 = vmatmul.mubr.bf16.gmra.mxu1 %v10250_v56  ;;  %v10285_v60 = vrot.slane %v4203_v46, 5  ;;  %v4406_v57 = vrot.slane %v10247_v39, 5  ;;  %v4177_v59 = vrot.slane %v4176_v3, 4  ;;  %v4191_v26 = vrot.slane %v4189_v33, 5 }
 0x2ba   : > { %4969 = vmatprep.mubr.bf16.mxu1 %v10257_v51  ;;  %11203 = vst [vmem:[#allocation10_spill] sm:$0xff] %v10281_v22  ;;  %v4402_v13 = vrot.slane %v3865_v40, 5  ;;  %v10290_v1 = vcombine.low %v10253_v62, %v10247_v39  ;;  %v4231_v19 = vshrl.u32 %v10278_v25, 16  ;;  %v6542_v37 = vrot.slane %v10220_v45, 9 }
 0x2bb   : > { %v4210_v23 = vor.u32 %v4209_v27, %v10285_v60  ;;  %v4192_v9 = vsel %vm8153_vm13, %v4187_v4, %v4191_v26  ;;  %v4218_v40 = vshrl.u32 %v10283_v34, 16  ;;  %v4221_v39 = vshll.u32 %v10283_v34, 16  ;;  %v7311_v26 = vpop.f32.mrf.mxu0 }
 0x2bc   : > { %v4403_v53 = vsel %vm8137_vm11, %v4401_v5, %v4402_v13  ;;  %v4200_v3 = vor.u32 %v4199_v18, %v4196_v21  ;;  %v4213_v33 = vshll.u32 %v3868_v38, 16  ;;  %v4227_v46 = vshll.u32 %v10278_v25, 16  ;;  %v10309_v5 = vld [vmem:[#allocation3 + $0xc0] sm:$0xf]  ;;  %v10315_v21 = vld [vmem:[#allocation3 + $0xb0] sm:$0x1] }
 0x2bd   : > { %5219 = vmatmul.mubr.bf16.gmra.mxu0 %v10196_v50  ;;  %v6543_v45 = vrot.slane %v10253_v62, 9  ;;  %v4182_v27 = vsel %vm8153_vm13, %v4177_v59, %v4181_v10  ;;  %v4400_v20 = vsel %vm8137_vm11, %v6542_v37, %v4399_v15  ;;  %v4408_v4 = vrot.slane %v4406_v57, 4  ;;  %v10324_v50 = vld [vmem:[#allocation3 + $0xb8] sm:$0xf]  ;;  %v7312_v15 = vpop.f32.mrf.mxu0 }
 0x2be   : > { %5226 = vmatprep.mubr.bf16.mxu0 %v10272_v36  ;;  %v10311_v13 = vcombine.low %v4182_v27, %v4192_v9  ;;  %v10313_v36 = vld [vmem:[#allocation3 + $0xb4] sm:$0xf]  ;;  %v10317_v18 = vrot.slane %v4227_v46, 5  ;;  %v4233_v62 = vrot.slane %v4231_v19, 4  ;;  %v10320_v10 = vcombine.low %v4400_v20, %v4403_v53  ;;  %v10327_v46 = vld [vmem:[#allocation3 + $0xc4] sm:$0xf] }
 0x2bf   : > { %v4409_v37 = vrot.slane %v3868_v38, 5  ;;  %v4215_v9 = vrot.slane %v4213_v33, 5  ;;  %v4220_v27 = vrot.slane %v4218_v40, 4  ;;  %v4223_v56 = vrot.slane %v4221_v39, 5 }
 0x2c0   : > { %11204 = vst [vmem:[#allocation17_spill] sm:$0xff] %v10311_v13  ;;  %11205 = vst [vmem:[#allocation7_spill] sm:$0xff] %v10320_v10  ;;  %v10331_v19 = vcombine.low %v10283_v34, %v10278_v25  ;;  %v4407_v53 = vsel %vm8137_vm11, %v6543_v45, %v4406_v57  ;;  %v4242_v20 = vshrl.u32 %v10313_v36, 16  ;;  %v4234_v40 = vor.u32 %v4233_v62, %v10317_v18 }
 0x2c1   : > { %4970 = vmatmul.mubr.bf16.gmra.mxu1 %v10281_v22  ;;  %v4211_v22 = vrot.slane %v4210_v23, 4  ;;  %v4201_v23 = vrot.slane %v4200_v3, 4  ;;  %v4410_v38 = vsel %vm8137_vm11, %v4408_v4, %v4409_v37  ;;  %v4426_v39 = vshrl.u32 %v10309_v5, 16 }
 0x2c2   : > { %4977 = vmatprep.mubr.bf16.mxu1 %v10290_v1  ;;  %v4429_v33 = vshll.u32 %v10309_v5, 16  ;;  %v4255_v59 = vshrl.u32 %v10324_v50, 16  ;;  %v4237_v57 = vshll.u32 %v10315_v21, 16  ;;  %v4439_v45 = vshrl.u32 %v10327_v46, 16 }
 0x2c3   : > { %v4216_v3 = vsel %vm8153_vm13, %v4211_v22, %v4215_v9  ;;  %v4251_v4 = vshll.u32 %v10324_v50, 16  ;;  %v4206_v22 = vsel %vm8153_vm13, %v4201_v23, %v10285_v60  ;;  %v4245_v62 = vshll.u32 %v10313_v36, 16 }
 0x2c4   : > { %v4224_v37 = vor.u32 %v4223_v56, %v4220_v27  ;;  %v10353_v9 = vadd.f32 %v7312_v15, %v7311_v26  ;;  %v10362_v14 = vcombine.low %v10313_v36, %v10324_v50  ;;  %v4235_v35 = vrot.slane %v4234_v40, 4 }
 0x2c5   : > { %5227 = vmatmul.mubr.bf16.gmra.mxu0 %v10227_v24  ;;  %v4428_v11 = vrot.slane %v4426_v39, 4  ;;  %v4431_v32 = vrot.slane %v4429_v33, 5  ;;  %v4435_v60 = vshll.u32 %v10327_v46, 16  ;;  %v4239_v56 = vrot.slane %v4237_v57, 5 }
 0x2c6   : > { %5234 = vmatprep.mubr.bf16.mxu0 %v10311_v13  ;;  %v10357_v13 = vcombine.low %v4407_v53, %v4410_v38  ;;  %v4253_v26 = vrot.slane %v4251_v4, 5  ;;  %v4257_v15 = vrot.slane %v4255_v59, 4  ;;  %v4441_v23 = vrot.slane %v4439_v45, 4  ;;  %v3874_v59 = vld [vmem:[#allocation3 + $0xbc] sm:$0x1] }
 0x2c7   : > { %v4225_v27 = vrot.slane %v4224_v37, 4  ;;  %v4432_v53 = vor.u32 %v4431_v32, %v4428_v11  ;;  %v4437_v38 = vrot.slane %v4435_v60, 5  ;;  %v4247_v24 = vrot.slane %v4245_v62, 5 }
 0x2c8   : > { %v6546_v40 = vrot.slane %v10309_v5, 9  ;;  %v4454_v39 = vrot.slane %v10327_v46, 5  ;;  %v4240_v33 = vsel %vm8153_vm13, %v4235_v35, %v4239_v56  ;;  %v11206_v57 = vrot.slane %v10278_v25, 5 }
 0x2c9   : > { %4978 = vmatmul.mubr.bf16.gmra.mxu1 %v10320_v10  ;;  %v10355_v10 = vcombine.low %v4206_v22, %v4216_v3  ;;  %v4445_v3 = vshll.u32 %v3877_v42, 16  ;;  %v4244_v22 = vrot.slane %v4242_v20, 4  ;;  %v4433_v45 = vrot.slane %v4432_v53, 4 }
 0x2ca   : > { %4985 = vmatprep.mubr.bf16.mxu1 %v10331_v19  ;;  %v4415_v4 = vrot.slane %v11206_v57, 4  ;;  %v4258_v32 = vor.u32 %v4257_v15, %v4253_v26  ;;  %v4455_v11 = vsel %vm8137_vm11, %v6546_v40, %v4454_v39  ;;  %v4456_v20 = vrot.slane %v4454_v39, 4 }
 0x2cb   : > { %v4457_v62 = vrot.slane %v3877_v42, 5  ;;  %v4416_v37 = vrot.slane %v10315_v21, 5  ;;  %v4438_v35 = vsel %vm8153_vm13, %v4433_v45, %v4437_v38  ;;  %v4447_v56 = vrot.slane %v4445_v3, 5 }
 0x2cc   : > { %v4248_v53 = vor.u32 %v4247_v24, %v4244_v22  ;;  %v4261_v15 = vshll.u32 %v3874_v59, 16  ;;  %v11207_v24 = vmov %v11206_v57  ;;  %v11209_v45 = vrot.slane %v10324_v50, 5  ;;  %v7941_v50 = vld [vmem:[%s11014_s3 + $0x238] sm:$0xff]  }
 0x2cd   : > { %5235 = vmatmul.mubr.bf16.gmra.mxu0 %v10257_v51  ;;  %v4442_v51 = vor.u32 %v4441_v23, %v4437_v38  ;;  %v4230_v23 = vsel %vm8153_vm13, %v4225_v27, %v10317_v18  ;;  %v4458_v40 = vsel %vm8137_vm11, %v4456_v20, %v4457_v62  ;;  %v4417_v42 = vsel %vm8137_vm11, %v4415_v4, %v4416_v37 }
 0x2ce   : > { %5242 = vmatprep.mubr.bf16.mxu0 %v10355_v10  ;;  %v10385_v39 = vcombine.low %v4230_v23, %v4240_v33  ;;  %v10391_v38 = vcombine.low %v4455_v11, %v4458_v40  ;;  %v11208_v18 = vrot.slane %v10283_v34, 9  ;;  %v4249_v33 = vrot.slane %v4248_v53, 4 }
 0x2cf   : > { %v4443_v60 = vrot.slane %v4442_v51, 4  ;;  %v4259_v51 = vrot.slane %v4258_v32, 4  ;;  %v4263_v57 = vrot.slane %v4261_v15, 5  ;;  %v10407_v4 = vcombine.low %v10309_v5, %v10327_v46 }
 0x2d0   : > { %v4414_v27 = vsel %vm8137_vm11, %v11208_v18, %v11207_v24  ;;  %v4422_v32 = vrot.slane %v11209_v45, 4  ;;  %v4423_v34 = vrot.slane %v3874_v59, 5  ;;  %v4254_v11 = vsel %vm8153_vm13, %v4249_v33, %v4253_v26  ;;  %v7935_v26 = vld [vmem:[%s11014_s3 + $0x218] sm:$0xff]   ;;  %v11211_v24 = vld [vmem:[#allocation8_spill] sm:$0xff] }
 0x2d1   : > { %4986 = vmatmul.mubr.bf16.gmra.mxu1 %v10357_v13  ;;  %v4448_v21 = vsel %vm8153_vm13, %v4443_v60, %v4447_v56  ;;  %v10403_v22 = vcombine.low %v4414_v27, %v4417_v42  ;;  %v4264_v25 = vsel %vm8153_vm13, %v4259_v51, %v4263_v57  ;;  %v6545_v20 = vrot.slane %v10313_v36, 9  ;;  %v7932_v36 = vld [vmem:[%s11014_s3 + $0x230] sm:$0xff]   ;;  %v11213_v57 = vld [vmem:[#allocation19_spill] sm:$0xff] }
 0x2d2   : > { %4993 = vmatprep.mubr.bf16.mxu1 %v10362_v14  ;;  %v10394_v3 = vcombine.low %v4438_v35, %v4448_v21  ;;  %v10418_v62 = vcombine.low %v4254_v11, %v4264_v25  ;;  %v4424_v5 = vsel %vm8137_vm11, %v4422_v32, %v4423_v34  ;;  %v11210_v46 = vmov %v11209_v45  ;;  %v10496_v11 = vld [vmem:[#allocation3 + $0xcc] sm:$0xf] }
 0x2d3   : > { %v4421_v37 = vsel %vm8137_vm11, %v6545_v20, %v11210_v46  ;;  %v10498_v20 = vld [vmem:[#allocation3 + $0xd0] sm:$0xf]  ;;  %v11215_v46 = vld [vmem:[#allocation22_spill] sm:$0xff] }
 0x2d4   : > { %v10428_v59 = vcombine.low %v4421_v37, %v4424_v5  ;;  %v10500_v5 = vld [vmem:[#allocation3 + $0xd4] sm:$0x1] }
 0x2d5   : > { %5243 = vmatmul.mubr.bf16.gmra.mxu0 %v10290_v1 }
 0x2d6   : > { %5250 = vmatprep.mubr.bf16.mxu0 %v10385_v39 }
 0x2d9   : > { %4994 = vmatmul.mubr.bf16.gmra.mxu1 %v10403_v22 }
 0x2da   : > { %5001 = vmatprep.mubr.bf16.mxu1 %v10407_v4 }
 0x2dd   : > { %5251 = vmatmul.mubr.bf16.gmra.mxu0 %v10331_v19 }
 0x2de   : > { %5258 = vmatprep.mubr.bf16.mxu0 %v10418_v62 }
 0x2e1   : > { %5002 = vmatmul.mubr.bf16.gmra.mxu1 %v10428_v59 }
 0x2e2   : > { %5435 = vmatprep.mubr.bf16.mxu1 %v9753_v52  ;;  %v7933_v52 = vld [vmem:[%s11014_s3 + $0x228] sm:$0xff]  }
 0x2e5   : > { %5259 = vmatmul.mubr.bf16.gmra.mxu0 %v10362_v14 }
 0x2e6   : > { %5764 = vmatprep.mubr.bf16.mxu0 %v9882_v30 }
 0x2e9   : > { %5436 = vmatmul.mubr.bf16.vlgmr.msra.gmra.mxu1 %v9812_v43  ;;  %v7934_v43 = vld [vmem:[%s11014_s3 + $0x220] sm:$0xff]  }
 0x2ea   : > { %5443 = vmatprep.mubr.bf16.mxu1 %v9870_v49  ;;  %7704 = vmatpush3.bf16.msra.mxu1 %v7941_v50  ;;  %v4488_v50 = vrot.slane %v10498_v20, 5 }
 0x2eb   : > { %7705 = vmatprep.subr.bf16.mxu1 %v7932_v36 }
 0x2ed   : > { %5765 = vmatmul.mubr.bf16.vlgmr.msra.gmra.mxu0 %v9710_v8  ;;  %v7936_v8 = vld [vmem:[%s11014_s3 + $0x210] sm:$0xff]  }
 0x2ee   : > { %5772 = vmatprep.mubr.bf16.mxu0 %v9977_v47  ;;  %7706 = vmatpush3.bf16.msra.mxu1 %v7932_v36  ;;  %v6547_v36 = vrot.slane %v10496_v11, 9 }
 0x2ef   : > { %7707 = vmatprep.subr.bf16.mxu1 %v7933_v52 }
 0x2f1   : > { %5444 = vmatmul.mubr.bf16.gmra.mxu1 %v9882_v30  ;;  %v7937_v30 = vld [vmem:[%s11014_s3 + $0x208] sm:$0xff]  }
 0x2f2   : > { %5451 = vmatprep.mubr.bf16.mxu1 %v9973_v17  ;;  %7708 = vmatpush3.bf16.msra.mxu1 %v7933_v52 }
 0x2f3   : > { %7709 = vmatprep.subr.bf16.mxu1 %v7934_v43 }
 0x2f5   : > { %5773 = vmatmul.mubr.bf16.gmra.mxu0 %v9817_v2  ;;  %v7938_v2 = vld [vmem:[%s11014_s3 + $0x200] sm:$0xff]  }
 0x2f6   : > { %5780 = vmatprep.mubr.bf16.mxu0 %v10056_v28  ;;  %7710 = vmatpush3.bf16.msra.mxu1 %v7934_v43 }
 0x2f7   : > { %7711 = vmatprep.subr.bf16.mxu1 %v7935_v26 }
 0x2f9   : > { %5452 = vmatmul.mubr.bf16.gmra.mxu1 %v9977_v47  ;;  %v7314_v47 = vpop.f32.mrf.mxu0 }
 0x2fa   : > { %5459 = vmatprep.mubr.bf16.mxu1 %v10040_v63  ;;  %7712 = vmatpush3.bf16.msra.mxu1 %v7935_v26 }
 0x2fb   : > { %7713 = vmatprep.subr.bf16.mxu1 %v7936_v8  ;;  %v7315_v60 = vpop.f32.mrf.mxu0 }
 0x2fc   : > { %v7316_v53 = vadd.f32 %v7315_v60, %v7314_v47  ;;  %v11216_v47 = vld [vmem:[#allocation23_spill] sm:$0xff] }
 0x2fd   : > { %5781 = vmatmul.mubr.bf16.gmra.mxu0 %v9906_v55 }
 0x2fe   : > { %5788 = vmatprep.mubr.bf16.mxu0 %v10095_v12  ;;  %7714 = vmatpush3.bf16.msra.mxu1 %v7936_v8  ;;  %v10510_v8 = vsel %vm8137_vm11, %v6547_v36, %v4488_v50 }
 0x2ff   : > { %7715 = vmatprep.subr.bf16.mxu1 %v7937_v30 }
 0x301   : > { %5460 = vmatmul.mubr.bf16.gmra.mxu1 %v10056_v28 }
 0x302   : > { %5467 = vmatprep.mubr.bf16.mxu1 %v10092_v16  ;;  %7716 = vmatpush3.bf16.msra.mxu1 %v7937_v30  ;;  %v4490_v30 = vrot.slane %v4488_v50, 4 }
 0x303   : > { %7717 = vmatprep.subr.bf16.mxu1 %v7938_v2 }
 0x305   : > { %5789 = vmatmul.mubr.bf16.gmra.mxu0 %v9988_v58 }
 0x306   : > { %v7199_v35 = vpop.f32.mrf.mxu1  ;;  %5796 = vmatprep.mubr.bf16.mxu0 %v10133_v61  ;;  %7718 = vmatpush3.bf16.msra.mxu1 %v7938_v2 }
 0x308   : > { %v7200_v55 = vpop.f32.mrf.mxu1 }
 0x309   : > { %v7201_v56 = vadd.f32 %v7200_v55, %v7199_v35  ;;  %5468 = vmatmul.mubr.bf16.gmra.mxu1 %v10095_v12 }
 0x30a   : > { %v7202_v23 = vpop.f32.mrf.mxu1  ;;  %5475 = vmatprep.mubr.bf16.mxu1 %v10119_v31 }
 0x30b   : > { %v10477_v28 = vadd.f32 %v10353_v9, %v7201_v56 }
 0x30c   : > { %v7203_v15 = vpop.f32.mrf.mxu1 }
 0x30d   : > { %v7204_v40 = vadd.f32 %v7203_v15, %v7202_v23  ;;  %5797 = vmatmul.mubr.bf16.gmra.mxu0 %v10047_v44 }
 0x30e   : > { %5804 = vmatprep.mubr.bf16.mxu0 %v10154_v7 }
 0x30f   : > { %v10481_v58 = vadd.f32 %v7316_v53, %v7204_v40  ;;  %v11217_v40 = vld [vmem:[#allocation15_spill] sm:$0xff] }
 0x311   : > { %5476 = vmatmul.mubr.bf16.gmra.mxu1 %v10133_v61  ;;  %v7205_v12 = vpop.f32.mrf.mxu1  ;;  %v11212_v61 = vld [vmem:[#allocation13_spill] sm:$0xff] }
 0x312   : > { %5483 = vmatprep.mubr.bf16.mxu1 %v10156_v41 }
 0x313   : > { %v7206_v42 = vpop.f32.mrf.mxu1 }
 0x314   : > { %v7207_v21 = vadd.f32 %v7206_v42, %v7205_v12  ;;  %v11218_v42 = vld [vmem:[#allocation14_spill] sm:$0xff] }
 0x315   : > { %5805 = vmatmul.mubr.bf16.gmra.mxu0 %v10099_v0  ;;  %v7208_v9 = vpop.f32.mrf.mxu1 }
 0x316   : > { %5812 = vmatprep.mubr.bf16.mxu0 %v10184_v54 }
 0x317   : > { %v7209_v51 = vpop.f32.mrf.mxu1 }
 0x318   : > { %v7210_v44 = vadd.f32 %v7209_v51, %v7208_v9  ;;  %v11219_v51 = vld [vmem:[#allocation10_spill] sm:$0xff] }
 0x319   : > { %5484 = vmatmul.mubr.bf16.gmra.mxu1 %v10154_v7  ;;  %v11214_v7 = vld [vmem:[#allocation9_spill] sm:$0xff] }
 0x31a   : > { %5491 = vmatprep.mubr.bf16.mxu1 %v10188_v48 }
 0x31d   : > { %5813 = vmatmul.mubr.bf16.gmra.mxu0 %v11211_v24  ;;  %v7317_v18 = vpop.f32.mrf.mxu0  ;;  %v11221_v24 = vld [vmem:[#allocation17_spill] sm:$0xff] }
 0x31e   : > { %5820 = vmatprep.mubr.bf16.mxu0 %v11212_v61 }
 0x31f   : > { %v7318_v27 = vpop.f32.mrf.mxu0 }
 0x320   : > { %v7319_v33 = vadd.f32 %v7318_v27, %v7317_v18 }
 0x321   : > { %5492 = vmatmul.mubr.bf16.gmra.mxu1 %v10184_v54  ;;  %v7320_v0 = vpop.f32.mrf.mxu0  ;;  %v4491_v54 = vrot.slane %v10500_v5, 5 }
 0x322   : > { %5499 = vmatprep.mubr.bf16.mxu1 %v11213_v57  ;;  %v10493_v45 = vadd.f32 %v7319_v33, %v7207_v21  ;;  %v11222_v33 = vld [vmem:[#allocation7_spill] sm:$0xff] }
 0x323   : > { %v7321_v32 = vpop.f32.mrf.mxu0  ;;  %v10516_v55 = vsel %vm8137_vm11, %v4490_v30, %v4491_v54 }
 0x324   : > { %v7322_v25 = vadd.f32 %v7321_v32, %v7320_v0  ;;  %v7211_v34 = vpop.f32.mrf.mxu1  ;;  %v6665_v23 = vcombine.low %v10510_v8, %v10516_v55 }
 0x325   : > { %5821 = vmatmul.mubr.bf16.gmra.mxu0 %v11214_v7 }
 0x326   : > { %5828 = vmatprep.mubr.bf16.mxu0 %v11215_v46  ;;  %v10503_v37 = vadd.f32 %v7322_v25, %v7210_v44  ;;  %v7212_v52 = vpop.f32.mrf.mxu1  ;;  %v11220_v44 = vld [vmem:[#allocation20_spill] sm:$0xff] }
 0x327   : > { %v7213_v26 = vadd.f32 %v7212_v52, %v7211_v34  ;;  %v11223_v34 = vld [vmem:[#allocation25_spill] sm:$0xff] }
 0x328   : > { %v7323_v43 = vpop.f32.mrf.mxu0  ;;  %v7214_v2 = vpop.f32.mrf.mxu1 }
 0x329   : > { %5500 = vmatmul.mubr.bf16.gmra.mxu1 %v11212_v61 }
 0x32a   : > { %5507 = vmatprep.mubr.bf16.mxu1 %v11216_v47  ;;  %v7324_v35 = vpop.f32.mrf.mxu0  ;;  %v7215_v56 = vpop.f32.mrf.mxu1 }
 0x32b   : > { %v7325_v60 = vadd.f32 %v7324_v35, %v7323_v43  ;;  %v7216_v15 = vadd.f32 %v7215_v56, %v7214_v2  ;;  %v4460_v2 = vshrl.u32 %v10496_v11, 16  ;;  %v4463_v35 = vshll.u32 %v10496_v11, 16 }
 0x32c   : > { %v7326_v53 = vpop.f32.mrf.mxu0  ;;  %v4473_v56 = vshrl.u32 %v10498_v20, 16 }
 0x32d   : > { %5829 = vmatmul.mubr.bf16.gmra.mxu0 %v11217_v40  ;;  %v10521_v12 = vadd.f32 %v7325_v60, %v7213_v26  ;;  %v4469_v60 = vshll.u32 %v10498_v20, 16 }
 0x32e   : > { %5836 = vmatprep.mubr.bf16.mxu0 %v11218_v42  ;;  %v7327_v21 = vpop.f32.mrf.mxu0 }
 0x32f   : > { %v7328_v9 = vadd.f32 %v7327_v21, %v7326_v53  ;;  %v4465_v21 = vrot.slane %v4463_v35, 5 }
 0x331   : > { %5508 = vmatmul.mubr.bf16.gmra.mxu1 %v11215_v46  ;;  %v10525_v6 = vadd.f32 %v7328_v9, %v7216_v15  ;;  %v4471_v9 = vrot.slane %v4469_v60, 5 }
 0x332   : > { %5515 = vmatprep.mubr.bf16.mxu1 %v11219_v51 }
 0x335   : > { %5837 = vmatmul.mubr.bf16.gmra.mxu0 %v11220_v44  ;;  %v4475_v44 = vrot.slane %v4473_v56, 4 }
 0x336   : > { %5844 = vmatprep.mubr.bf16.mxu0 %v11221_v24 }
 0x337   : > { %v7217_v18 = vpop.f32.mrf.mxu1 }
 0x338   : > { %v7329_v61 = vpop.f32.mrf.mxu0 }
 0x339   : > { %5516 = vmatmul.mubr.bf16.gmra.mxu1 %v11218_v42  ;;  %v7218_v27 = vpop.f32.mrf.mxu1 }
 0x33a   : > { %5523 = vmatprep.mubr.bf16.mxu1 %v11222_v33  ;;  %v7219_v0 = vadd.f32 %v7218_v27, %v7217_v18  ;;  %v7330_v32 = vpop.f32.mrf.mxu0 }
 0x33b   : > { %v7220_v25 = vpop.f32.mrf.mxu1  ;;  %v7331_v7 = vadd.f32 %v7330_v32, %v7329_v61 }
 0x33c   : > { %v7332_v46 = vpop.f32.mrf.mxu0 }
 0x33d   : > { %5845 = vmatmul.mubr.bf16.gmra.mxu0 %v11223_v34  ;;  %v7221_v54 = vpop.f32.mrf.mxu1  ;;  %v10534_v36 = vadd.f32 %v7331_v7, %v7219_v0  ;;  %v4479_v7 = vshll.u32 %v10500_v5, 16 }
 0x33e   : > { %5852 = vmatprep.mubr.bf16.mxu0 %v10355_v10  ;;  %v7222_v50 = vadd.f32 %v7221_v54, %v7220_v25  ;;  %v7333_v52 = vpop.f32.mrf.mxu0  ;;  %v4476_v25 = vor.u32 %v4475_v44, %v4471_v9 }
 0x33f   : > { %v7334_v43 = vadd.f32 %v7333_v52, %v7332_v46 }
 0x341   : > { %5524 = vmatmul.mubr.bf16.gmra.mxu1 %v11221_v24  ;;  %v10538_v26 = vadd.f32 %v7334_v43, %v7222_v50 }
 0x342   : > { %5531 = vmatprep.mubr.bf16.mxu1 %v10357_v13 }
 0x345   : > { %5853 = vmatmul.mubr.bf16.gmra.mxu0 %v10290_v1  ;;  %v4462_v1 = vrot.slane %v4460_v2, 4  ;;  %v4481_v2 = vrot.slane %v4479_v7, 5 }
 0x346   : > { %5860 = vmatprep.mubr.bf16.mxu0 %v10385_v39  ;;  %v7223_v30 = vpop.f32.mrf.mxu1 }
 0x348   : > { %v7224_v53 = vpop.f32.mrf.mxu1 }
 0x349   : > { %5532 = vmatmul.mubr.bf16.gmra.mxu1 %v10355_v10  ;;  %v7225_v15 = vadd.f32 %v7224_v53, %v7223_v30  ;;  %v4466_v10 = vor.u32 %v4465_v21, %v4462_v1  ;;  %v4477_v30 = vrot.slane %v4476_v25, 4 }
 0x34a   : > { %v7335_v40 = vpop.f32.mrf.mxu0  ;;  %5539 = vmatprep.mubr.bf16.mxu1 %v10403_v22  ;;  %v7226_v42 = vpop.f32.mrf.mxu1 }
 0x34b   : > { %v4467_v43 = vrot.slane %v4466_v10, 4 }
 0x34c   : > { %v7336_v24 = vpop.f32.mrf.mxu0  ;;  %v7227_v18 = vpop.f32.mrf.mxu1 }
 0x34d   : > { %5861 = vmatmul.mubr.bf16.gmra.mxu0 %v10331_v19  ;;  %v7337_v61 = vadd.f32 %v7336_v24, %v7335_v40  ;;  %v7228_v27 = vadd.f32 %v7227_v18, %v7226_v42  ;;  %v4482_v40 = vsel %vm8153_vm13, %v4477_v30, %v4481_v2 }
 0x34e   : > { %5868 = vmatprep.mubr.bf16.mxu0 %v10418_v62  ;;  %v7338_v0 = vpop.f32.mrf.mxu0 }
 0x34f   : > { %v10550_v32 = vadd.f32 %v7337_v61, %v7225_v15 }
 0x350   : > { %v7339_v34 = vpop.f32.mrf.mxu0 }
 0x351   : > { %v7340_v46 = vadd.f32 %v7339_v34, %v7338_v0  ;;  %v7229_v54 = vpop.f32.mrf.mxu1  ;;  %5540 = vmatmul.mubr.bf16.gmra.mxu1 %v10385_v39  ;;  %v4472_v39 = vsel %vm8153_vm13, %v4467_v43, %v4471_v9 }
 0x352   : > { %5547 = vmatprep.mubr.bf16.mxu1 %v10428_v59  ;;  %v6648_v24 = vcombine.low %v4472_v39, %v4482_v40 }
 0x353   : > { %v10555_v50 = vadd.f32 %v7340_v46, %v7228_v27  ;;  %v7341_v19 = vpop.f32.mrf.mxu0  ;;  %v7230_v52 = vpop.f32.mrf.mxu1 }
 0x354   : > { %v7231_v35 = vadd.f32 %v7230_v52, %v7229_v54 }
 0x355   : > { %5869 = vmatmul.mubr.bf16.gmra.mxu0 %v10362_v14  ;;  %v7342_v60 = vpop.f32.mrf.mxu0  ;;  %v7232_v56 = vpop.f32.mrf.mxu1 }
 0x356   : > { %5876 = vmatprep.mubr.bf16.mxu0 %v10394_v3  ;;  %v7343_v5 = vadd.f32 %v7342_v60, %v7341_v19 }
 0x357   : > { %v7344_v53 = vpop.f32.mrf.mxu0  ;;  %v7233_v15 = vpop.f32.mrf.mxu1 }
 0x358   : > { %v10563_v42 = vadd.f32 %v7343_v5, %v7231_v35  ;;  %v7234_v1 = vadd.f32 %v7233_v15, %v7232_v56 }
 0x359   : > { %v7345_v21 = vpop.f32.mrf.mxu0  ;;  %v7235_v44 = vpop.f32.mrf.mxu1  ;;  %5548 = vmatmul.mubr.bf16.gmra.mxu1 %v10418_v62  ;;  %v6647_v62 = vcombine.low %v10496_v11, %v10498_v20 }
 0x35a   : > { %v7346_v14 = vadd.f32 %v7345_v21, %v7344_v53  ;;  %5555 = vmatprep.mubr.bf16.mxu1 %v10391_v38 }
 0x35b   : > { %v7236_v18 = vpop.f32.mrf.mxu1 }
 0x35c   : > { %v10567_v61 = vadd.f32 %v7346_v14, %v7234_v1  ;;  %v7237_v27 = vadd.f32 %v7236_v18, %v7235_v44 }
 0x35d   : > { %v7347_v0 = vpop.f32.mrf.mxu0  ;;  %5877 = vmatmul.mubr.bf16.gmra.mxu0 %v10407_v4  ;;  %v7238_v29 = vpop.f32.mrf.mxu1 }
 0x35e   : > { %5884 = vmatprep.mubr.bf16.mxu0 %v6648_v24 }
 0x35f   : > { %v7348_v9 = vpop.f32.mrf.mxu0  ;;  %v7239_v10 = vpop.f32.mrf.mxu1 }
 0x360   : > { %v7349_v25 = vadd.f32 %v7348_v9, %v7347_v0  ;;  %v7240_v7 = vadd.f32 %v7239_v10, %v7238_v29 }
 0x361   : > { %v7350_v34 = vpop.f32.mrf.mxu0  ;;  %v7241_v46 = vpop.f32.mrf.mxu1  ;;  %5556 = vmatmul.mubr.bf16.gmra.mxu1 %v10394_v3 }
 0x362   : > { %v10573_v54 = vadd.f32 %v7349_v25, %v7237_v27  ;;  %7719 = vmatprep.mubr.bf16.mxu1 %v9870_v49 }
 0x363   : > { %v7351_v19 = vpop.f32.mrf.mxu0  ;;  %v7242_v52 = vpop.f32.mrf.mxu1 }
 0x364   : > { %v7352_v4 = vadd.f32 %v7351_v19, %v7350_v34  ;;  %v7243_v43 = vadd.f32 %v7242_v52, %v7241_v46 }
 0x365   : > { %v7353_v30 = vpop.f32.mrf.mxu0  ;;  %5885 = vmatmul.mubr.bf16.gmra.mxu0 %v6647_v62  ;;  %v7244_v2 = vpop.f32.mrf.mxu1 }
 0x366   : > { %v10576_v35 = vadd.f32 %v7352_v4, %v7240_v7 }
 0x367   : > { %v7354_v60 = vpop.f32.mrf.mxu0  ;;  %v7245_v56 = vpop.f32.mrf.mxu1 }
 0x368   : > { %v7355_v5 = vadd.f32 %v7354_v60, %v7353_v30  ;;  %v7246_v3 = vadd.f32 %v7245_v56, %v7244_v2 }
 0x369   : > { %v7356_v53 = vpop.f32.mrf.mxu0  ;;  %v7247_v15 = vpop.f32.mrf.mxu1  ;;  %7720 = vmatmul.mubr.bf16.vlgmr.msra.gmra.mxu1 %v9973_v17 }
 0x36a   : > { %v10579_v11 = vadd.f32 %v7355_v5, %v7243_v43  ;;  %7723 = vmatprep.mubr.bf16.mxu1 %v10040_v63 }
 0x36b   : > { %v7357_v49 = vpop.f32.mrf.mxu0  ;;  %v7248_v20 = vpop.f32.mrf.mxu1 }
 0x36c   : > { %v7358_v39 = vadd.f32 %v7357_v49, %v7356_v53  ;;  %v7249_v40 = vadd.f32 %v7248_v20, %v7247_v15 }
 0x36d   : > { %v7359_v1 = vpop.f32.mrf.mxu0  ;;  %v7250_v21 = vpop.f32.mrf.mxu1 }
 0x36e   : > { %v10582_v44 = vadd.f32 %v7358_v39, %v7246_v3 }
 0x36f   : > { %v7360_v14 = vpop.f32.mrf.mxu0  ;;  %v7251_v24 = vpop.f32.mrf.mxu1 }
 0x370   : > { %v7361_v18 = vadd.f32 %v7360_v14, %v7359_v1  ;;  %v7252_v27 = vadd.f32 %v7251_v24, %v7250_v21 }
 0x371   : > { %v7362_v0 = vpop.f32.mrf.mxu0  ;;  %v7253_v29 = vpop.f32.mrf.mxu1  ;;  %7724 = vmatmul.mubr.bf16.gmra.mxu1 %v10092_v16 }
 0x372   : > { %v10585_v17 = vadd.f32 %v7361_v18, %v7249_v40  ;;  %7727 = vmatprep.mubr.bf16.mxu1 %v10119_v31 }
 0x373   : > { %v7363_v63 = vpop.f32.mrf.mxu0  ;;  %v7254_v9 = vpop.f32.mrf.mxu1 }
 0x374   : > { %v7364_v10 = vadd.f32 %v7363_v63, %v7362_v0  ;;  %v7255_v25 = vadd.f32 %v7254_v9, %v7253_v29 }
 0x375   : > { %v7365_v7 = vpop.f32.mrf.mxu0  ;;  %v7256_v34 = vpop.f32.mrf.mxu1 }
 0x376   : > { %v10588_v46 = vadd.f32 %v7364_v10, %v7252_v27 }
 0x377   : > { %v7366_v62 = vpop.f32.mrf.mxu0  ;;  %v7257_v19 = vpop.f32.mrf.mxu1 }
 0x378   : > { %v7367_v52 = vadd.f32 %v7366_v62, %v7365_v7  ;;  %v7258_v4 = vadd.f32 %v7257_v19, %v7256_v34 }
 0x379   : > { %v7368_v43 = vpop.f32.mrf.mxu0  ;;  %v7259_v30 = vpop.f32.mrf.mxu1  ;;  %7728 = vmatmul.mubr.bf16.gmra.mxu1 %v10156_v41 }
 0x37a   : > { %v10591_v16 = vadd.f32 %v7367_v52, %v7255_v25  ;;  %7731 = vmatprep.mubr.bf16.mxu1 %v10188_v48 }
 0x37b   : > { %v7369_v31 = vpop.f32.mrf.mxu0  ;;  %v7260_v2 = vpop.f32.mrf.mxu1 }
 0x37c   : > { %v7370_v60 = vadd.f32 %v7369_v31, %v7368_v43  ;;  %v7261_v56 = vadd.f32 %v7260_v2, %v7259_v30 }
 0x37d   : > { %v7371_v5 = vpop.f32.mrf.mxu0  ;;  %v7262_v3 = vpop.f32.mrf.mxu1 }
 0x37e   : > { %v10594_v53 = vadd.f32 %v7370_v60, %v7258_v4 }
 0x37f   : > { %v7372_v15 = vpop.f32.mrf.mxu0  ;;  %v7263_v49 = vpop.f32.mrf.mxu1 }
 0x380   : > { %v7373_v20 = vadd.f32 %v7372_v15, %v7371_v5  ;;  %v7264_v39 = vadd.f32 %v7263_v49, %v7262_v3 }
 0x381   : > { %v7374_v40 = vpop.f32.mrf.mxu0  ;;  %v7265_v1 = vpop.f32.mrf.mxu1  ;;  %7732 = vmatmul.mubr.bf16.gmra.mxu1 %v11213_v57 }
 0x382   : > { %v10597_v41 = vadd.f32 %v7373_v20, %v7261_v56  ;;  %7735 = vmatprep.mubr.bf16.mxu1 %v11216_v47 }
 0x383   : > { %v7375_v48 = vpop.f32.mrf.mxu0  ;;  %v7266_v21 = vpop.f32.mrf.mxu1 }
 0x384   : > { %v7376_v14 = vadd.f32 %v7375_v48, %v7374_v40  ;;  %v7267_v24 = vadd.f32 %v7266_v21, %v7265_v1 }
 0x385   : > { %v7377_v18 = vpop.f32.mrf.mxu0  ;;  %v7268_v27 = vpop.f32.mrf.mxu1 }
 0x386   : > { %v10600_v0 = vadd.f32 %v7376_v14, %v7264_v39 }
 0x387   : > { %v7378_v29 = vpop.f32.mrf.mxu0  ;;  %v7269_v63 = vpop.f32.mrf.mxu1 }
 0x388   : > { %v7379_v9 = vadd.f32 %v7378_v29, %v7377_v18  ;;  %v7270_v10 = vadd.f32 %v7269_v63, %v7268_v27 }
 0x389   : > { %v7380_v25 = vpop.f32.mrf.mxu0  ;;  %v7271_v7 = vpop.f32.mrf.mxu1  ;;  %7736 = vmatmul.mubr.bf16.gmra.mxu1 %v11219_v51 }
 0x38a   : > { %v10603_v57 = vadd.f32 %v7379_v9, %v7267_v24  ;;  %7739 = vmatprep.mubr.bf16.mxu1 %v11222_v33 }
 0x38b   : > { %v7381_v47 = vpop.f32.mrf.mxu0  ;;  %v7272_v34 = vpop.f32.mrf.mxu1 }
 0x38c   : > { %v7382_v62 = vadd.f32 %v7381_v47, %v7380_v25  ;;  %v7273_v19 = vadd.f32 %v7272_v34, %v7271_v7 }
 0x38d   : > { %v7383_v52 = vpop.f32.mrf.mxu0  ;;  %v7274_v4 = vpop.f32.mrf.mxu1 }
 0x38e   : > { %v10606_v43 = vadd.f32 %v7382_v62, %v7270_v10 }
 0x38f   : > { %v7384_v30 = vpop.f32.mrf.mxu0  ;;  %v7275_v31 = vpop.f32.mrf.mxu1 }
 0x390   : > { %v7385_v2 = vadd.f32 %v7384_v30, %v7383_v52  ;;  %v7276_v60 = vadd.f32 %v7275_v31, %v7274_v4 }
 0x391   : > { %v7386_v56 = vpop.f32.mrf.mxu0  ;;  %v7277_v5 = vpop.f32.mrf.mxu1  ;;  %7740 = vmatmul.mubr.bf16.gmra.mxu1 %v10357_v13 }
 0x392   : > { %v10609_v51 = vadd.f32 %v7385_v2, %v7273_v19  ;;  %7743 = vmatprep.mubr.bf16.mxu1 %v10403_v22 }
 0x393   : > { %v7387_v33 = vpop.f32.mrf.mxu0  ;;  %v7278_v3 = vpop.f32.mrf.mxu1 }
 0x394   : > { %v7388_v15 = vadd.f32 %v7387_v33, %v7386_v56  ;;  %v7279_v49 = vadd.f32 %v7278_v3, %v7277_v5 }
 0x395   : > { %v7389_v20 = vpop.f32.mrf.mxu0  ;;  %v7280_v39 = vpop.f32.mrf.mxu1 }
 0x396   : > { %v10612_v40 = vadd.f32 %v7388_v15, %v7276_v60 }
 0x397   : > { %v7390_v1 = vpop.f32.mrf.mxu0  ;;  %v7281_v48 = vpop.f32.mrf.mxu1 }
 0x398   : > { %v7391_v21 = vadd.f32 %v7390_v1, %v7389_v20  ;;  %v7282_v14 = vadd.f32 %v7281_v48, %v7280_v39 }
 0x399   : > { %v7392_v24 = vpop.f32.mrf.mxu0  ;;  %v7283_v18 = vpop.f32.mrf.mxu1  ;;  %7744 = vmatmul.mubr.bf16.gmra.mxu1 %v10428_v59 }
 0x39a   : > { %v10615_v13 = vadd.f32 %v7391_v21, %v7279_v49  ;;  %7747 = vmatprep.mubr.bf16.mxu1 %v10391_v38 }
 0x39b   : > { %v7393_v22 = vpop.f32.mrf.mxu0  ;;  %v7284_v27 = vpop.f32.mrf.mxu1 }
 0x39c   : > { %v7394_v29 = vadd.f32 %v7393_v22, %v7392_v24  ;;  %v7285_v63 = vadd.f32 %v7284_v27, %v7283_v18 }
 0x39d   : > { %v7395_v9 = vpop.f32.mrf.mxu0  ;;  %v7286_v10 = vpop.f32.mrf.mxu1 }
 0x39e   : > { %v10618_v25 = vadd.f32 %v7394_v29, %v7282_v14 }
 0x39f   : > { %v7396_v7 = vpop.f32.mrf.mxu0  ;;  %v7287_v47 = vpop.f32.mrf.mxu1 }
 0x3a0   : > { %v7397_v34 = vadd.f32 %v7396_v7, %v7395_v9  ;;  %v7288_v62 = vadd.f32 %v7287_v47, %v7286_v10 }
 0x3a1   : > { %v7398_v19 = vpop.f32.mrf.mxu0  ;;  %v7289_v52 = vpop.f32.mrf.mxu1  ;;  %7748 = vmatmul.mubr.bf16.gmra.mxu1 %v6665_v23 }
 0x3a2   : > { %v10623_v59 = vadd.f32 %v7397_v34, %v7285_v63 }
 0x3a3   : > { %v7399_v38 = vpop.f32.mrf.mxu0  ;;  %v7290_v4 = vpop.f32.mrf.mxu1 }
 0x3a4   : > { %v7400_v30 = vadd.f32 %v7399_v38, %v7398_v19  ;;  %v7291_v31 = vadd.f32 %v7290_v4, %v7289_v52 }
 0x3a5   : > { %v7401_v2 = vpop.f32.mrf.mxu0  ;;  %v7292_v60 = vpop.f32.mrf.mxu1 }
 0x3a6   : > { %v10625_v56 = vadd.f32 %v7400_v30, %v7288_v62 }
 0x3a7   : > { %v7402_v5 = vpop.f32.mrf.mxu0  ;;  %v7293_v33 = vpop.f32.mrf.mxu1 }
 0x3a8   : > { %v7403_v3 = vadd.f32 %v7402_v5, %v7401_v2  ;;  %v7294_v15 = vadd.f32 %v7293_v33, %v7292_v60 }
 0x3a9   : > { %v7404_v49 = vpop.f32.mrf.mxu0  ;;  %v7423_v20 = vpop.f32.mrf.mxu1 }
 0x3aa   : > { %v10627_v39 = vadd.f32 %v7403_v3, %v7291_v31 }
 0x3ab   : > { %v7405_v8 = vpop.f32.mrf.mxu0  ;;  %v7424_v55 = vpop.f32.mrf.mxu1 }
 0x3ac   : > { %11224 = vst [vmem:[#allocation16_spill] sm:$0xff] %v10627_v39  ;;  %v7406_v23 = vadd.f32 %v7405_v8, %v7404_v49  ;;  %v7425_v1 = vadd.f32 %v7424_v55, %v7423_v20 }
 0x3ad   : > { %v7535_v48 = vpop.f32.mrf.mxu0  ;;  %v7426_v21 = vpop.f32.mrf.mxu1 }
 0x3ae   : > { %v10629_v14 = vadd.f32 %v7406_v23, %v7294_v15  ;;  %v5564_v24 = vadd.f32 %v7425_v1, %v10477_v28 }
 0x3af   : > { %v7536_v18 = vpop.f32.mrf.mxu0  ;;  %v7427_v22 = vpop.f32.mrf.mxu1 }
 0x3b0   : > { %11225 = vst [vmem:[#allocation24_spill] sm:$0xff] %v10629_v14  ;;  %v7537_v27 = vadd.f32 %v7536_v18, %v7535_v48  ;;  %v7428_v29 = vadd.f32 %v7427_v22, %v7426_v21 }
 0x3b1   : > { %v7538_v63 = vpop.f32.mrf.mxu0  ;;  %v7429_v9 = vpop.f32.mrf.mxu1 }
 0x3b2   : > { %v5565_v10 = vadd.f32 %v7428_v29, %v10481_v58  ;;  %v10633_v7 = vadd.f32 %v7537_v27, %v5564_v24 }
 0x3b3   : > { %v7539_v47 = vpop.f32.mrf.mxu0  ;;  %v7430_v34 = vpop.f32.mrf.mxu1 }
 0x3b4   : > { %v7540_v62 = vadd.f32 %v7539_v47, %v7538_v63  ;;  %v7431_v19 = vadd.f32 %v7430_v34, %v7429_v9 }
 0x3b5   : > { %v10635_v52 = vpop.f32.mrf.mxu0  ;;  %v7432_v38 = vpop.f32.mrf.mxu1 }
 0x3b6   : > { %v10638_v4 = vadd.f32 %v7431_v19, %v10493_v45  ;;  %v10640_v28 = vadd.f32 %v7540_v62, %v5565_v10 }
 0x3b7   : > { %v10642_v30 = vpop.f32.mrf.mxu0  ;;  %v7433_v31 = vpop.f32.mrf.mxu1 }
 0x3b8   : > { %v7434_v2 = vadd.f32 %v7433_v31, %v7432_v38 }
 0x3b9   : > { %v10644_v60 = vpop.f32.mrf.mxu0  ;;  %v7435_v58 = vpop.f32.mrf.mxu1 }
 0x3ba   : > { %v10647_v5 = vadd.f32 %v7434_v2, %v10503_v37 }
 0x3bb   : > { %v10649_v33 = vpop.f32.mrf.mxu0  ;;  %v7436_v3 = vpop.f32.mrf.mxu1 }
 0x3bc   : > { %v7437_v15 = vadd.f32 %v7436_v3, %v7435_v58 }
 0x3bd   : > { %v10651_v49 = vpop.f32.mrf.mxu0  ;;  %v7438_v45 = vpop.f32.mrf.mxu1 }
 0x3be   : > { %v10654_v20 = vadd.f32 %v7437_v15, %v10521_v12 }
 0x3bf   : > { %v10656_v8 = vpop.f32.mrf.mxu0  ;;  %v7439_v55 = vpop.f32.mrf.mxu1 }
 0x3c0   : > { %v7440_v23 = vadd.f32 %v7439_v55, %v7438_v45 }
 0x3c1   : > { %v10658_v1 = vpop.f32.mrf.mxu0  ;;  %v7441_v48 = vpop.f32.mrf.mxu1 }
 0x3c2   : > { %v10661_v37 = vadd.f32 %v7440_v23, %v10525_v6 }
 0x3c3   : > { %v10663_v21 = vpop.f32.mrf.mxu0  ;;  %v7442_v24 = vpop.f32.mrf.mxu1 }
 0x3c4   : > { %v7443_v18 = vadd.f32 %v7442_v24, %v7441_v48 }
 0x3c5   : > { %v10665_v22 = vpop.f32.mrf.mxu0  ;;  %v7444_v27 = vpop.f32.mrf.mxu1 }
 0x3c6   : > { %v10668_v12 = vadd.f32 %v7443_v18, %v10534_v36 }
 0x3c7   : > { %v10670_v29 = vpop.f32.mrf.mxu0  ;;  %v7445_v63 = vpop.f32.mrf.mxu1 }
 0x3c8   : > { %v7446_v9 = vadd.f32 %v7445_v63, %v7444_v27 }
 0x3c9   : > { %v10672_v10 = vpop.f32.mrf.mxu0  ;;  %v7447_v47 = vpop.f32.mrf.mxu1 }
 0x3ca   : > { %v10675_v6 = vadd.f32 %v7446_v9, %v10538_v26 }
 0x3cb   : > { %v10677_v34 = vpop.f32.mrf.mxu0  ;;  %v7448_v62 = vpop.f32.mrf.mxu1 }
 0x3cc   : > { %v7449_v19 = vadd.f32 %v7448_v62, %v7447_v47 }
 0x3cd   : > { %v10679_v38 = vpop.f32.mrf.mxu0  ;;  %v7450_v31 = vpop.f32.mrf.mxu1 }
 0x3ce   : > { %v10682_v36 = vadd.f32 %v7449_v19, %v10550_v32 }
 0x3cf   : > { %v10684_v2 = vpop.f32.mrf.mxu0  ;;  %v7451_v58 = vpop.f32.mrf.mxu1 }
 0x3d0   : > { %v7452_v3 = vadd.f32 %v7451_v58, %v7450_v31 }
 0x3d1   : > { %v10686_v15 = vpop.f32.mrf.mxu0  ;;  %v7453_v45 = vpop.f32.mrf.mxu1 }
 0x3d2   : > { %v10689_v26 = vadd.f32 %v7452_v3, %v10555_v50 }
 0x3d3   : > { %v10691_v55 = vpop.f32.mrf.mxu0  ;;  %v7454_v23 = vpop.f32.mrf.mxu1 }
 0x3d4   : > { %11226 = vst [vmem:[#allocation18_spill] sm:$0xff] %v10689_v26  ;;  %v7455_v48 = vadd.f32 %v7454_v23, %v7453_v45 }
 0x3d5   : > { %v10693_v24 = vpop.f32.mrf.mxu0  ;;  %v7456_v18 = vpop.f32.mrf.mxu1 }
 0x3d6   : > { %v10696_v32 = vadd.f32 %v7455_v48, %v10563_v42 }
 0x3d7   : > { %v10698_v27 = vpop.f32.mrf.mxu0  ;;  %v7457_v63 = vpop.f32.mrf.mxu1 }
 0x3d8   : > { %v7458_v9 = vadd.f32 %v7457_v63, %v7456_v18 }
 0x3d9   : > { %v10700_v47 = vpop.f32.mrf.mxu0  ;;  %v7459_v62 = vpop.f32.mrf.mxu1 }
 0x3da   : > { %v10703_v50 = vadd.f32 %v7458_v9, %v10567_v61 }
 0x3db   : > { %v10705_v19 = vpop.f32.mrf.mxu0  ;;  %v7460_v31 = vpop.f32.mrf.mxu1 }
 0x3dc   : > { %v7461_v58 = vadd.f32 %v7460_v31, %v7459_v62 }
 0x3dd   : > { %v10707_v3 = vpop.f32.mrf.mxu0  ;;  %v7462_v45 = vpop.f32.mrf.mxu1 }
 0x3de   : > { %v10710_v42 = vadd.f32 %v7461_v58, %v10573_v54 }
 0x3df   : > { %v10712_v23 = vpop.f32.mrf.mxu0  ;;  %v7463_v48 = vpop.f32.mrf.mxu1 }
 0x3e0   : > { %11227 = vst [vmem:[#allocation21_spill] sm:$0xff] %v10710_v42  ;;  %v7464_v18 = vadd.f32 %v7463_v48, %v7462_v45 }
 0x3e1   : > { %v10714_v63 = vpop.f32.mrf.mxu0  ;;  %v7465_v14 = vpop.f32.mrf.mxu1 }
 0x3e2   : > { %11228 = vst [vmem:[#allocation29_spill] sm:$0xff] %v10714_v63  ;;  %v10717_v61 = vadd.f32 %v7464_v18, %v10576_v35 }
 0x3e3   : > { %v10719_v9 = vpop.f32.mrf.mxu0  ;;  %v7466_v39 = vpop.f32.mrf.mxu1 }
 0x3e4   : > { %11229 = vst [vmem:[#allocation28_spill] sm:$0xff] %v10717_v61  ;;  %11230 = vst [vmem:[#allocation34_spill] sm:$0xff] %v10719_v9  ;;  %v7467_v62 = vadd.f32 %v7466_v39, %v7465_v14 }
 0x3e5   : > { %v10721_v31 = vpop.f32.mrf.mxu0  ;;  %v7468_v26 = vpop.f32.mrf.mxu1 }
 0x3e6   : > { %v10724_v54 = vadd.f32 %v7467_v62, %v10579_v11 }
 0x3e7   : > { %v10726_v58 = vpop.f32.mrf.mxu0  ;;  %v7469_v42 = vpop.f32.mrf.mxu1 }
 0x3e8   : > { %11231 = vst [vmem:[#allocation36_spill] sm:$0xff] %v10724_v54  ;;  %v7470_v45 = vadd.f32 %v7469_v42, %v7468_v26 }
 0x3e9   : > { %v10728_v48 = vpop.f32.mrf.mxu0  ;;  %v7471_v63 = vpop.f32.mrf.mxu1 }
 0x3ea   : > { %11232 = vst [vmem:[#allocation12_spill] sm:$0xff] %v10728_v48  ;;  %v10731_v35 = vadd.f32 %v7470_v45, %v10582_v44 }
 0x3eb   : > { %v10733_v18 = vpop.f32.mrf.mxu0  ;;  %v7472_v61 = vpop.f32.mrf.mxu1 }
 0x3ec   : > { %11233 = vst [vmem:[#allocation30_spill] sm:$0xff] %v10731_v35  ;;  %v7473_v39 = vadd.f32 %v7472_v61, %v7471_v63 }
 0x3ed   : > { %v10735_v14 = vpop.f32.mrf.mxu0  ;;  %v7474_v9 = vpop.f32.mrf.mxu1 }
 0x3ee   : > { %11234 = vst [vmem:[#allocation38_spill] sm:$0xff] %v10735_v14  ;;  %v10738_v11 = vadd.f32 %v7473_v39, %v10585_v17 }
 0x3ef   : > { %v10740_v62 = vpop.f32.mrf.mxu0  ;;  %v7475_v54 = vpop.f32.mrf.mxu1 }
 0x3f0   : > { %11235 = vst [vmem:[#allocation39_spill] sm:$0xff] %v10738_v11  ;;  %11236 = vst [vmem:[#allocation42_spill] sm:$0xff] %v10740_v62  ;;  %v7476_v26 = vadd.f32 %v7475_v54, %v7474_v9 }
 0x3f1   : > { %v10742_v42 = vpop.f32.mrf.mxu0  ;;  %v7477_v48 = vpop.f32.mrf.mxu1 }
 0x3f2   : > { %11237 = vst [vmem:[#allocation44_spill] sm:$0xff] %v10742_v42  ;;  %v10745_v44 = vadd.f32 %v7476_v26, %v10588_v46 }
 0x3f3   : > { %v10747_v45 = vpop.f32.mrf.mxu0  ;;  %v7478_v35 = vpop.f32.mrf.mxu1 }
 0x3f4   : > { %11238 = vst [vmem:[#allocation32_spill] sm:$0xff] %v10745_v44  ;;  %11239 = vst [vmem:[#allocation31_spill] sm:$0xff] %v10747_v45  ;;  %v7479_v63 = vadd.f32 %v7478_v35, %v7477_v48 }
 0x3f5   : > { %v10749_v61 = vpop.f32.mrf.mxu0  ;;  %v7480_v14 = vpop.f32.mrf.mxu1 }
 0x3f6   : > { %v10752_v17 = vadd.f32 %v7479_v63, %v10591_v16 }
 0x3f7   : > { %v10754_v39 = vpop.f32.mrf.mxu0  ;;  %v7481_v11 = vpop.f32.mrf.mxu1 }
 0x3f8   : > { %11240 = vst [vmem:[#allocation33_spill] sm:$0xff] %v10752_v17  ;;  %v7482_v9 = vadd.f32 %v7481_v11, %v7480_v14 }
 0x3f9   : > { %v10756_v54 = vpop.f32.mrf.mxu0  ;;  %v7483_v42 = vpop.f32.mrf.mxu1 }
 0x3fa   : > { %11241 = vst [vmem:[#allocation35_spill] sm:$0xff] %v10756_v54  ;;  %v10759_v46 = vadd.f32 %v7482_v9, %v10594_v53 }
 0x3fb   : > { %v7484_v26 = vpop.f32.mrf.mxu1  ;;  %v10761_v45 = vpop.f32.mrf.mxu0 }
 0x3fc   : > { %11242 = vst [vmem:[#allocation40_spill] sm:$0xff] %v10759_v46  ;;  %v7485_v44 = vadd.f32 %v7484_v26, %v7483_v42 }
 0x3fd   : > { %v7486_v48 = vpop.f32.mrf.mxu1  ;;  %v10766_v17 = vpop.f32.mrf.mxu0 }
 0x3fe   : > { %v10764_v35 = vadd.f32 %v7485_v44, %v10597_v41 }
 0x3ff   : > { %v7487_v16 = vpop.f32.mrf.mxu1  ;;  %v10771_v53 = vpop.f32.mrf.mxu0 }
 0x400   : > { %11243 = vst [vmem:[#allocation41_spill] sm:$0xff] %v10764_v35  ;;  %v7488_v63 = vadd.f32 %v7487_v16, %v7486_v48 }
 0x401   : > { %v7489_v62 = vpop.f32.mrf.mxu1  ;;  %v10776_v41 = vpop.f32.mrf.mxu0 }
 0x402   : > { %v10769_v14 = vadd.f32 %v7488_v63, %v10600_v0  ;;  %11245 = vst [vmem:[#allocation43_spill] sm:$0xff] %v10776_v41 }
 0x403   : > { %v7490_v11 = vpop.f32.mrf.mxu1  ;;  %v10781_v0 = vpop.f32.mrf.mxu0 }
 0x404   : > { %11244 = vst [vmem:[#allocation37_spill] sm:$0xff] %v10769_v14  ;;  %v7491_v54 = vadd.f32 %v7490_v11, %v7489_v62 }
 0x405   : > { %v7492_v9 = vpop.f32.mrf.mxu1 }
 0x406   : > { %v10774_v42 = vadd.f32 %v7491_v54, %v10603_v57  ;;  %v10786_v57 = vpop.f32.mrf.mxu0 }
 0x407   : > { %v7493_v26 = vpop.f32.mrf.mxu1 }
 0x408   : > { %v7494_v46 = vadd.f32 %v7493_v26, %v7492_v9 }
 0x409   : > { %v7495_v44 = vpop.f32.mrf.mxu1 }
 0x40a   : > { %v10779_v48 = vadd.f32 %v7494_v46, %v10606_v43  ;;  %v10791_v43 = vpop.f32.mrf.mxu0 }
 0x40b   : > { %v7496_v16 = vpop.f32.mrf.mxu1 }
 0x40c   : > { %11246 = vst [vmem:[#allocation46_spill] sm:$0xff] %v10779_v48  ;;  %v7497_v35 = vadd.f32 %v7496_v16, %v7495_v44 }
 0x40d   : > { %v7498_v63 = vpop.f32.mrf.mxu1 }
 0x40e   : > { %v10784_v62 = vadd.f32 %v7497_v35, %v10609_v51  ;;  %v10796_v51 = vpop.f32.mrf.mxu0 }
 0x40f   : > { %v7499_v11 = vpop.f32.mrf.mxu1 }
 0x410   : > { %11247 = vst [vmem:[#allocation45_spill] sm:$0xff] %v10784_v62  ;;  %v7500_v14 = vadd.f32 %v7499_v11, %v7498_v63 }
 0x411   : > { %v7501_v54 = vpop.f32.mrf.mxu1 }
 0x412   : > { %v10789_v9 = vadd.f32 %v7500_v14, %v10612_v40  ;;  %v10801_v40 = vpop.f32.mrf.mxu0 }
 0x413   : > { %v7502_v26 = vpop.f32.mrf.mxu1 }
 0x414   : > { %11248 = vst [vmem:[#allocation4_spill] sm:$0xff] %v10789_v9  ;;  %v7503_v41 = vadd.f32 %v7502_v26, %v7501_v54 }
 0x415   : > { %v7504_v46 = vpop.f32.mrf.mxu1 }
 0x416   : > { %v10794_v44 = vadd.f32 %v7503_v41, %v10615_v13  ;;  %v10806_v41 = vpop.f32.mrf.mxu0 }
 0x417   : > { %v7505_v16 = vpop.f32.mrf.mxu1 }
 0x418   : > { %v7506_v48 = vadd.f32 %v7505_v16, %v7504_v46 }
 0x419   : > { %v7507_v35 = vpop.f32.mrf.mxu1 }
 0x41a   : > { %v10799_v63 = vadd.f32 %v7506_v48, %v10618_v25  ;;  %v7543_v48 = vadd.f32 %v10642_v30, %v10635_v52  ;;  %v7555_v30 = vadd.f32 %v10670_v29, %v10665_v22 }
 0x41b   : > { %v7508_v11 = vpop.f32.mrf.mxu1 }
 0x41c   : > { %v7509_v62 = vadd.f32 %v7508_v11, %v7507_v35  ;;  %v10817_v35 = vpop.f32.mrf.mxu0 }
 0x41d   : > { %v7510_v14 = vpop.f32.mrf.mxu1 }
 0x41e   : > { %v10804_v54 = vadd.f32 %v7509_v62, %v10623_v59  ;;  %v7546_v62 = vadd.f32 %v10649_v33, %v10644_v60  ;;  %v7549_v33 = vadd.f32 %v10656_v8, %v10651_v49  ;;  %v7558_v49 = vadd.f32 %v10677_v34, %v10672_v10 }
 0x41f   : > { %v7511_v26 = vpop.f32.mrf.mxu1  ;;  %v7567_v34 = vadd.f32 %v10698_v27, %v10693_v24 }
 0x420   : > { %11249 = vst [vmem:[#allocation11_spill] sm:$0xff] %v10804_v54  ;;  %v7512_v13 = vadd.f32 %v7511_v26, %v7510_v14  ;;  %v5895_v14 = vadd.f32 %v7543_v48, %v10638_v4  ;;  %v10826_v26 = vpop.f32.mrf.mxu0  ;;  %v5896_v4 = vadd.f32 %v7546_v62, %v10647_v5  ;;  %v5899_v5 = vadd.f32 %v7555_v30, %v10668_v12 }
 0x421   : > { %v10808_v46 = vpop.f32.mrf.mxu1 }
 0x422   : > { %v10811_v16 = vadd.f32 %v7512_v13, %v10625_v56  ;;  %v10831_v13 = vld [vmem:[%s11015_s4] ss:$0 sm:$0xff]  ;;  %v10841_v48 = vpop.f32.mrf.mxu0 }
 0x423   : > { %v10813_v25 = vpop.f32.mrf.mxu1 }
 0x424   : > { %11250 = vst [vmem:[#allocation47_spill] sm:$0xff] %v10811_v16 }
 0x425   : > { %v10819_v11 = vpop.f32.mrf.mxu1 }
 0x427   : > { %v10821_v59 = vpop.f32.mrf.mxu1 }
 0x429   : > { %v7721_v56 = vpop.f32.mrf.mxu1 }
 0x42a   : > { %v6156_v52 = vadd.f32 %v7721_v56, %v5895_v14 }
 0x42b   : > { %v6027_v16 = vpop.f32.mrf.mxu1 }
 0x42c   : > { %v6195_v54 = vadd.f32 %v10831_v13, %v6156_v52  ;;  %v6154_v60 = vadd.f32 %v6027_v16, %v10633_v7  ;;  %v10855_v52 = vpop.f32.mrf.mxu0 }
 0x42d   : > { %v7722_v22 = vpop.f32.mrf.mxu1 }
 0x42e   : > { %v6227_v29 = vmax.f32 %v6195_v54, 0.0  ;;  %v6193_v14 = vadd.f32 %v10831_v13, %v6154_v60  ;;  %v6157_v56 = vadd.f32 %v7722_v22, %v5896_v4  ;;  %v5897_v54 = vadd.f32 %v7549_v33, %v10654_v20 }
 0x42f   : > { %v6030_v7 = vpop.f32.mrf.mxu1  ;;  %v7552_v60 = vadd.f32 %v10663_v21, %v10658_v1  ;;  %v5900_v20 = vadd.f32 %v7558_v49, %v10675_v6  ;;  %v7561_v1 = vadd.f32 %v10684_v2, %v10679_v38  ;;  %v10869_v21 = vpop.f32.mrf.mxu0  ;;  %v7570_v6 = vadd.f32 %v10705_v19, %v10700_v47 }
 0x430   : > { %6259 = vst [vmem:[%s10846_s19 + $0x10] sm:$0xff] %v6227_v29  ;;  %v6225_v8 = vmax.f32 %v6193_v14, 0.0  ;;  %v6196_v16 = vadd.f32 %v10831_v13, %v6157_v56  ;;  %v6155_v62 = vadd.f32 %v6030_v7, %v10640_v28  ;;  %v5903_v7 = vadd.f32 %v7567_v34, %v10696_v32 }
 0x431   : > { %v7725_v9 = vpop.f32.mrf.mxu1  ;;  %v5898_v14 = vadd.f32 %v7552_v60, %v10661_v37  ;;  %v10879_v49 = vpop.f32.mrf.mxu0  ;;  %v7564_v37 = vadd.f32 %v10691_v55, %v10686_v15  ;;  %v7579_v47 = vadd.f32 %v10726_v58, %v10721_v31  ;;  %v7573_v15 = vadd.f32 %v10712_v23, %v10707_v3 }
 0x432   : > { %6257 = vst [vmem:[%s10846_s19] sm:$0xff] %v6225_v8  ;;  %v6228_v12 = vmax.f32 %v6196_v16, 0.0  ;;  %v6194_v30 = vadd.f32 %v10831_v13, %v6155_v62  ;;  %v6160_v10 = vadd.f32 %v7725_v9, %v5899_v5  ;;  %v5901_v16 = vadd.f32 %v7561_v1, %v10682_v36  ;;  %v11253_v1 = vld [vmem:[#allocation12_spill] sm:$0xff] }
 0x433   : > { %v6043_v4 = vpop.f32.mrf.mxu1  ;;  %v5904_v36 = vadd.f32 %v7570_v6, %v10703_v50  ;;  %v10893_v55 = vpop.f32.mrf.mxu0  ;;  %v7582_v50 = vadd.f32 %v10733_v18, %v11253_v1  ;;  %v7591_v18 = vadd.f32 %v10754_v39, %v10749_v61 }
 0x434   : > { %6260 = vst [vmem:[%s10846_s19 + $0x18] sm:$0xff] %v6228_v12  ;;  %v6226_v28 = vmax.f32 %v6194_v30, 0.0  ;;  %v6199_v22 = vadd.f32 %v10831_v13, %v6160_v10  ;;  %v6158_v29 = vadd.f32 %v6043_v4, %v5897_v54  ;;  %v11251_v4 = vld [vmem:[#allocation18_spill] sm:$0xff] }
 0x435   : > { %v7726_v33 = vpop.f32.mrf.mxu1 }
 0x436   : > { %6258 = vst [vmem:[%s10846_s19 + $0x8] sm:$0xff] %v6226_v28  ;;  %v6231_v9 = vmax.f32 %v6199_v22, 0.0  ;;  %v6197_v24 = vadd.f32 %v10831_v13, %v6158_v29  ;;  %v6161_v27 = vadd.f32 %v7726_v33, %v5900_v20  ;;  %v5902_v28 = vadd.f32 %v7564_v37, %v11251_v4  ;;  %v11252_v29 = vld [vmem:[#allocation36_spill] sm:$0xff]  ;;  %v11262_v4 = vld [vmem:[#allocation35_spill] sm:$0xff] }
 0x437   : > { %v6046_v56 = vpop.f32.mrf.mxu1  ;;  %v5907_v20 = vadd.f32 %v7579_v47, %v11252_v29  ;;  %v11258_v47 = vld [vmem:[#allocation38_spill] sm:$0xff] }
 0x438   : > { %6263 = vst [vmem:[%s10846_s19 + $0x30] sm:$0xff] %v6231_v9  ;;  %v6229_v38 = vmax.f32 %v6197_v24, 0.0  ;;  %v6200_v2 = vadd.f32 %v10831_v13, %v6161_v27  ;;  %v6159_v5 = vadd.f32 %v6046_v56, %v5898_v14  ;;  %v10903_v9 = vpop.f32.mrf.mxu0  ;;  %v11254_v27 = vld [vmem:[#allocation21_spill] sm:$0xff] }
 0x439   : > { %v7729_v8 = vpop.f32.mrf.mxu1  ;;  %v5905_v14 = vadd.f32 %v7573_v15, %v11254_v27  ;;  %v11255_v56 = vld [vmem:[#allocation29_spill] sm:$0xff]  ;;  %v11260_v15 = vld [vmem:[#allocation28_spill] sm:$0xff] }
 0x43a   : > { %6261 = vst [vmem:[%s10846_s19 + $0x20] sm:$0xff] %v6229_v38  ;;  %v6232_v32 = vmax.f32 %v6200_v2, 0.0  ;;  %v6198_v62 = vadd.f32 %v10831_v13, %v6159_v5  ;;  %v6164_v54 = vadd.f32 %v7729_v8, %v5903_v7  ;;  %v11256_v7 = vld [vmem:[#allocation34_spill] sm:$0xff] }
 0x43b   : > { %v6059_v19 = vpop.f32.mrf.mxu1  ;;  %v7576_v6 = vadd.f32 %v11256_v7, %v11255_v56 }
 0x43c   : > { %6264 = vst [vmem:[%s10846_s19 + $0x38] sm:$0xff] %v6232_v32  ;;  %v6230_v60 = vmax.f32 %v6198_v62, 0.0  ;;  %v6203_v12 = vadd.f32 %v10831_v13, %v6164_v54  ;;  %v6162_v30 = vadd.f32 %v6059_v19, %v5901_v16  ;;  %v11257_v62 = vld [vmem:[#allocation30_spill] sm:$0xff] }
 0x43d   : > { %v7730_v10 = vpop.f32.mrf.mxu1  ;;  %v5908_v54 = vadd.f32 %v7582_v50, %v11257_v62  ;;  %v11259_v19 = vld [vmem:[#allocation42_spill] sm:$0xff] }
 0x43e   : > { %6262 = vst [vmem:[%s10846_s19 + $0x28] sm:$0xff] %v6230_v60  ;;  %v6235_v34 = vmax.f32 %v6203_v12, 0.0  ;;  %v6201_v31 = vadd.f32 %v10831_v13, %v6162_v30  ;;  %v6165_v58 = vadd.f32 %v7730_v10, %v5904_v36  ;;  %v7585_v60 = vadd.f32 %v11259_v19, %v11258_v47  ;;  %v10917_v12 = vpop.f32.mrf.mxu0 }
 0x43f   : > { %v6062_v22 = vpop.f32.mrf.mxu1  ;;  %v5906_v10 = vadd.f32 %v7576_v6, %v11260_v15  ;;  %v11268_v15 = vld [vmem:[#allocation41_spill] sm:$0xff] }
 0x440   : > { %6267 = vst [vmem:[%s10846_s19 + $0x50] sm:$0xff] %v6235_v34  ;;  %v6233_v3 = vmax.f32 %v6201_v31, 0.0  ;;  %v6204_v23 = vadd.f32 %v10831_v13, %v6165_v58  ;;  %v6163_v33 = vadd.f32 %v6062_v22, %v5902_v28  ;;  %v11261_v31 = vld [vmem:[#allocation33_spill] sm:$0xff]  ;;  %v7594_v28 = vadd.f32 %v10761_v45, %v11262_v4  ;;  %v10927_v1 = vpop.f32.mrf.mxu0 }
 0x441   : > { %v7733_v24 = vpop.f32.mrf.mxu1  ;;  %v5911_v58 = vadd.f32 %v7591_v18, %v11261_v31  ;;  %v7603_v45 = vadd.f32 %v10791_v43, %v10786_v57  ;;  %v11266_v18 = vld [vmem:[#allocation40_spill] sm:$0xff] }
 0x442   : > { %6265 = vst [vmem:[%s10846_s19 + $0x40] sm:$0xff] %v6233_v3  ;;  %v6236_v38 = vmax.f32 %v6204_v23, 0.0  ;;  %v6202_v2 = vadd.f32 %v10831_v13, %v6163_v33  ;;  %v6168_v5 = vadd.f32 %v7733_v24, %v5907_v20  ;;  %v11263_v3 = vld [vmem:[#allocation39_spill] sm:$0xff]  ;;  %v11264_v33 = vld [vmem:[#allocation44_spill] sm:$0xff] }
 0x443   : > { %v6075_v8 = vpop.f32.mrf.mxu1  ;;  %v5909_v23 = vadd.f32 %v7585_v60, %v11263_v3  ;;  %v11265_v24 = vld [vmem:[#allocation31_spill] sm:$0xff]  ;;  %v5915_v60 = vadd.f32 %v7603_v45, %v10774_v42  ;;  %v7618_v45 = vadd.f32 %v10893_v55, %v10879_v49  ;;  %v11273_v49 = vld [vmem:[#allocation16_spill] sm:$0xff] }
 0x444   : > { %6268 = vst [vmem:[%s10846_s19 + $0x58] sm:$0xff] %v6236_v38  ;;  %v6234_v16 = vmax.f32 %v6202_v2, 0.0  ;;  %v6207_v37 = vadd.f32 %v10831_v13, %v6168_v5  ;;  %v6166_v32 = vadd.f32 %v6075_v8, %v5905_v14  ;;  %v7588_v27 = vadd.f32 %v11265_v24, %v11264_v33 }
 0x445   : > { %v7734_v30 = vpop.f32.mrf.mxu1  ;;  %v5912_v8 = vadd.f32 %v7594_v28, %v11266_v18 }
 0x446   : > { %6266 = vst [vmem:[%s10846_s19 + $0x48] sm:$0xff] %v6234_v16  ;;  %v6239_v36 = vmax.f32 %v6207_v37, 0.0  ;;  %v6205_v61 = vadd.f32 %v10831_v13, %v6166_v32  ;;  %v6169_v39 = vadd.f32 %v7734_v30, %v5908_v54  ;;  %v7597_v16 = vadd.f32 %v10771_v53, %v10766_v17  ;;  %v10941_v37 = vpop.f32.mrf.mxu0  ;;  %v11267_v54 = vld [vmem:[#allocation32_spill] sm:$0xff] }
 0x447   : > { %v6078_v34 = vpop.f32.mrf.mxu1  ;;  %v5910_v47 = vadd.f32 %v7588_v27, %v11267_v54  ;;  %v7606_v30 = vadd.f32 %v10801_v40, %v10796_v51  ;;  %v7615_v51 = vadd.f32 %v10869_v21, %v10855_v52  ;;  %v11271_v21 = vld [vmem:[#allocation37_spill] sm:$0xff] }
 0x448   : > { %6271 = vst [vmem:[%s10846_s19 + $0x70] sm:$0xff] %v6239_v36  ;;  %v6237_v22 = vmax.f32 %v6205_v61, 0.0  ;;  %v6208_v29 = vadd.f32 %v10831_v13, %v6169_v39  ;;  %v6167_v20 = vadd.f32 %v6078_v34, %v5906_v10  ;;  %v7625_v61 = vpop.f32.mrf.mxu0  ;;  %v5913_v10 = vadd.f32 %v7597_v16, %v11268_v15  ;;  %v11269_v34 = vld [vmem:[#allocation43_spill] sm:$0xff] }
 0x449   : > { %v7737_v50 = vpop.f32.mrf.mxu1  ;;  %v7600_v31 = vadd.f32 %v10781_v0, %v11269_v34  ;;  %v7609_v0 = vadd.f32 %v10817_v35, %v10806_v41  ;;  %v11276_v34 = vld [vmem:[#allocation11_spill] sm:$0xff] }
 0x44a   : > { %6269 = vst [vmem:[%s10846_s19 + $0x60] sm:$0xff] %v6237_v22  ;;  %v6240_v14 = vmax.f32 %v6208_v29, 0.0  ;;  %v6206_v56 = vadd.f32 %v10831_v13, %v6167_v20  ;;  %v6172_v7 = vadd.f32 %v7737_v50, %v5911_v58  ;;  %v11270_v20 = vld [vmem:[#allocation46_spill] sm:$0xff]  ;;  %v7626_v3 = vpop.f32.mrf.mxu0 }
 0x44b   : > { %v6091_v6 = vpop.f32.mrf.mxu1  ;;  %v5916_v50 = vadd.f32 %v7606_v30, %v11270_v20  ;;  %v5914_v27 = vadd.f32 %v7600_v31, %v11271_v21  ;;  %v7627_v16 = vadd.f32 %v7626_v3, %v7625_v61  ;;  %v11277_v3 = vld [vmem:[#allocation47_spill] sm:$0xff] }
 0x44c   : > { %6272 = vst [vmem:[%s10846_s19 + $0x78] sm:$0xff] %v6240_v14  ;;  %v6238_v38 = vmax.f32 %v6206_v56, 0.0  ;;  %v6211_v2 = vadd.f32 %v10831_v13, %v6172_v7  ;;  %v6170_v5 = vadd.f32 %v6091_v6, %v5909_v23  ;;  %v7515_v14 = vadd.f32 %v10813_v25, %v10808_v46 }
 0x44d   : > { %v7738_v32 = vpop.f32.mrf.mxu1  ;;  %v5919_v7 = vadd.f32 %v7615_v51, %v10794_v44 }
 0x44e   : > { %6270 = vst [vmem:[%s10846_s19 + $0x68] sm:$0xff] %v6238_v38  ;;  %v6243_v62 = vmax.f32 %v6211_v2, 0.0  ;;  %v6209_v57 = vadd.f32 %v10831_v13, %v6170_v5  ;;  %v6173_v43 = vadd.f32 %v7738_v32, %v5912_v8  ;;  %v7628_v38 = vpop.f32.mrf.mxu0  ;;  %v11272_v5 = vld [vmem:[#allocation45_spill] sm:$0xff]  ;;  %v7612_v8 = vadd.f32 %v10841_v48, %v10826_v26 }
 0x44f   : > { %v6094_v19 = vpop.f32.mrf.mxu1  ;;  %v5917_v18 = vadd.f32 %v7609_v0, %v11272_v5  ;;  %v5594_v55 = vadd.f32 %v7515_v14, %v11273_v49  ;;  %v7518_v32 = vadd.f32 %v10821_v59, %v10819_v11  ;;  %v5920_v26 = vadd.f32 %v7618_v45, %v10799_v63  ;;  %v11274_v59 = vld [vmem:[#allocation4_spill] sm:$0xff] }
 0x450   : > { %6275 = vst [vmem:[%s10846_s19 + $0x90] sm:$0xff] %v6243_v62  ;;  %v6241_v17 = vmax.f32 %v6209_v57, 0.0  ;;  %v6212_v53 = vadd.f32 %v10831_v13, %v6173_v43  ;;  %v6171_v36 = vadd.f32 %v6094_v19, %v5910_v47  ;;  %v7621_v48 = vadd.f32 %v10917_v12, %v10903_v9  ;;  %v7629_v47 = vpop.f32.mrf.mxu0 }
 0x451   : > { %v7741_v39 = vpop.f32.mrf.mxu1  ;;  %v7630_v15 = vadd.f32 %v7629_v47, %v7628_v38 }
 0x452   : > { %6273 = vst [vmem:[%s10846_s19 + $0x80] sm:$0xff] %v6241_v17  ;;  %v6244_v58 = vmax.f32 %v6212_v53, 0.0  ;;  %v6210_v42 = vadd.f32 %v10831_v13, %v6171_v36  ;;  %v6176_v4 = vadd.f32 %v7741_v39, %v5915_v60  ;;  %v5918_v17 = vadd.f32 %v7612_v8, %v11274_v59  ;;  %v11275_v53 = vld [vmem:[#allocation24_spill] sm:$0xff] }
 0x453   : > { %v6107_v40 = vpop.f32.mrf.mxu1  ;;  %v5595_v36 = vadd.f32 %v7518_v32, %v11275_v53  ;;  %v5923_v39 = vadd.f32 %v7627_v16, %v5594_v55  ;;  %v5921_v31 = vadd.f32 %v7621_v48, %v11276_v34 }
 0x454   : > { %6276 = vst [vmem:[%s10846_s19 + $0x98] sm:$0xff] %v6244_v58  ;;  %v6242_v28 = vmax.f32 %v6210_v42, 0.0  ;;  %v6215_v22 = vadd.f32 %v10831_v13, %v6176_v4  ;;  %v6174_v29 = vadd.f32 %v6107_v40, %v5913_v10  ;;  %v7624_v58 = vadd.f32 %v10941_v37, %v10927_v1 }
 0x455   : > { %v7742_v23 = vpop.f32.mrf.mxu1  ;;  %v5924_v20 = vadd.f32 %v7630_v15, %v5595_v36 }
 0x456   : > { %6274 = vst [vmem:[%s10846_s19 + $0x88] sm:$0xff] %v6242_v28  ;;  %v6247_v33 = vmax.f32 %v6215_v22, 0.0  ;;  %v6213_v24 = vadd.f32 %v10831_v13, %v6174_v29  ;;  %v6177_v52 = vadd.f32 %v7742_v23, %v5916_v50  ;;  %v5922_v23 = vadd.f32 %v7624_v58, %v11277_v3 }
 0x457   : > { %v6110_v56 = vpop.f32.mrf.mxu1 }
 0x458   : > { %6279 = vst [vmem:[%s10846_s19 + $0xb0] sm:$0xff] %v6247_v33  ;;  %v6245_v41 = vmax.f32 %v6213_v24, 0.0  ;;  %v6216_v35 = vadd.f32 %v10831_v13, %v6177_v52  ;;  %v6175_v6 = vadd.f32 %v6110_v56, %v5914_v27 }
 0x459   : > { %v7745_v2 = vpop.f32.mrf.mxu1 }
 0x45a   : > { %6277 = vst [vmem:[%s10846_s19 + $0xa0] sm:$0xff] %v6245_v41  ;;  %v6248_v46 = vmax.f32 %v6216_v35, 0.0  ;;  %v6214_v44 = vadd.f32 %v10831_v13, %v6175_v6  ;;  %v6180_v25 = vadd.f32 %v7745_v2, %v5919_v7 }
 0x45b   : > { %v6123_v62 = vpop.f32.mrf.mxu1 }
 0x45c   : > { %6280 = vst [vmem:[%s10846_s19 + $0xb8] sm:$0xff] %v6248_v46  ;;  %v6246_v57 = vmax.f32 %v6214_v44, 0.0  ;;  %v6219_v43 = vadd.f32 %v10831_v13, %v6180_v25  ;;  %v6178_v54 = vadd.f32 %v6123_v62, %v5917_v18 }
 0x45d   : > { %v7746_v19 = vpop.f32.mrf.mxu1 }
 0x45e   : > { %6278 = vst [vmem:[%s10846_s19 + $0xa8] sm:$0xff] %v6246_v57  ;;  %v6251_v60 = vmax.f32 %v6219_v43, 0.0  ;;  %v6217_v30 = vadd.f32 %v10831_v13, %v6178_v54  ;;  %v6181_v11 = vadd.f32 %v7746_v19, %v5920_v26 }
 0x45f   : > { %v6126_v61 = vpop.f32.mrf.mxu1 }
 0x460   : > { %6283 = vst [vmem:[%s10846_s19 + $0xd0] sm:$0xff] %v6251_v60  ;;  %v6249_v63 = vmax.f32 %v6217_v30, 0.0  ;;  %v6220_v9 = vadd.f32 %v10831_v13, %v6181_v11  ;;  %v6179_v12 = vadd.f32 %v6126_v61, %v5918_v17 }
 0x461   : > { %v7749_v10 = vpop.f32.mrf.mxu1 }
 0x462   : > { %6281 = vst [vmem:[%s10846_s19 + $0xc0] sm:$0xff] %v6249_v63  ;;  %v6252_v42 = vmax.f32 %v6220_v9, 0.0  ;;  %v6218_v4 = vadd.f32 %v10831_v13, %v6179_v12  ;;  %v6184_v51 = vadd.f32 %v7749_v10, %v5923_v39 }
 0x463   : > { %v6139_v40 = vpop.f32.mrf.mxu1 }
 0x464   : > { %6284 = vst [vmem:[%s10846_s19 + $0xd8] sm:$0xff] %v6252_v42  ;;  %v6250_v28 = vmax.f32 %v6218_v4, 0.0  ;;  %v6223_v22 = vadd.f32 %v10831_v13, %v6184_v51  ;;  %v6182_v29 = vadd.f32 %v6139_v40, %v5921_v31 }
 0x465   : > { %v7750_v50 = vpop.f32.mrf.mxu1 }
 0x466   : > { %6282 = vst [vmem:[%s10846_s19 + $0xc8] sm:$0xff] %v6250_v28  ;;  %v6255_v0 = vmax.f32 %v6223_v22, 0.0  ;;  %v6221_v1 = vadd.f32 %v10831_v13, %v6182_v29  ;;  %v6185_v37 = vadd.f32 %v7750_v50, %v5924_v20 }
 0x467   : > { %v6142_v33 = vpop.f32.mrf.mxu1 }
 0x468   : > { %6287 = vst [vmem:[%s10846_s19 + $0xf0] sm:$0xff] %v6255_v0  ;;  %v6253_v24 = vmax.f32 %v6221_v1, 0.0  ;;  %v6224_v52 = vadd.f32 %v10831_v13, %v6185_v37  ;;  %v6183_v21 = vadd.f32 %v6142_v33, %v5922_v23 }
 0x46a   : > { %6285 = vst [vmem:[%s10846_s19 + $0xe0] sm:$0xff] %v6253_v24  ;;  %v6256_v27 = vmax.f32 %v6224_v52, 0.0  ;;  %v6222_v14 = vadd.f32 %v10831_v13, %v6183_v21 }
 0x46c   : > { %6288 = vst [vmem:[%s10846_s19 + $0xf8] sm:$0xff] %v6256_v27  ;;  %v6254_v56 = vmax.f32 %v6222_v14, 0.0 }
 0x46e   : > { %6286 = vst [vmem:[%s10846_s19 + $0xe8] sm:$0xff] %v6254_v56 }
 0x46f PF: > { %s15_s18 = sadd.s32 1, %s7948_s18  }
 0x470   : > { %p12_p4 = scmp.ge.s32.totalorder %s15_s18, 4  }
 0x472   :  { %14 = sbr.rel (!%p12_p4) target bundleno = 1 (0x1), region = 73 }

</bundles_post_ra>
